<compile_context>
chip_gen: v6e
topology: v6e:2x2x1
jax: 0.10.0
libtpu: 0.0.40
codegen_flags: <defaults>
</compile_context>

<pallas_src>
import jax
import jax.numpy as jnp
import numpy as np
from jax.experimental import pallas as pl
from jax.experimental.pallas import tpu as pltpu


def decoder_kernel(emb_ref, proj_ref, w_ref, b_ref, et_ref, pred_ref):
    """Single-shot LSTM decoder.

    emb_ref : (T-1, Bp, Hp)  time-major padded embeddings
    proj_ref: (Bp, Hp)       precomputed text_proj + image_proj (padded)
    w_ref   : (2*Hp, 4*Hp)   fused [Wih; Whh] gate weights (padded, gate order i,f,g,o)
    b_ref   : (1, 4*Hp)      fused b_ih + b_hh (padded)
    et_ref  : (Hp, Vp)       embedding matrix transposed (padded)
    pred_ref: ((T-1)*Bp, Vp) logits, time-major, lane-dense
    """
    time_step, Bp, Hp = emb_ref.shape

    proj = proj_ref[...]                                   # (Bp, Hp)
    bias = b_ref[...]                                      # (1, 4*Hp)

    hx = jnp.zeros((Bp, Hp), jnp.float32)
    cx = jnp.zeros((Bp, Hp), jnp.float32)

    xts = []
    # Fully unrolled static loop: 7 tiny steps, no grid / pipeline overhead.
    for t in range(time_step):
        x = emb_ref[t]                                     # (Bp, Hp)
        xh = jnp.concatenate([x, hx], axis=-1)             # (Bp, 2*Hp)
        gates = jnp.dot(xh, w_ref[...],
                        preferred_element_type=jnp.float32) + bias  # (Bp, 4*Hp)

        # 128-lane-aligned gate blocks (PyTorch gate order: i, f, g, o).
        i_g = jax.nn.sigmoid(gates[:, 0 * Hp:1 * Hp])
        f_g = jax.nn.sigmoid(gates[:, 1 * Hp:2 * Hp])
        g_g = jnp.tanh(gates[:, 2 * Hp:3 * Hp])
        o_g = jax.nn.sigmoid(gates[:, 3 * Hp:4 * Hp])

        cx = f_g * cx + i_g * g_g
        hx = o_g * jnp.tanh(cx)

        xts.append(proj + hx)                              # (Bp, Hp)

    # Batched vocab projection across all timesteps: one MXU matmul, one
    # lane-dense writeback.
    xt_all = jnp.concatenate(xts, axis=0)                  # ((T-1)*Bp, Hp)
    pred_ref[...] = jnp.dot(xt_all, et_ref[...],
                            preferred_element_type=jnp.float32)


def _round_up(x, m):
    return ((x + m - 1) // m) * m


def decoder_rnn_forward(params, text_features, image_features, labels):
    """Pallas equivalent of DecoderRNN.forward -> (B, T-1, V) logits."""
    E = params["embed"]                            # (V, H), row 0 zero (padding_idx=0)
    Wt, bt = params["w_text"], params["b_text"]    # (Dt, H), (1, H)
    Wi, bi = params["w_image"], params["b_image"]  # (Di, H), (1, H)
    Wih, bih = params["w_ih"], params["b_ih"]      # (H, 4H), (1, 4H)
    Whh, bhh = params["w_hh"], params["b_hh"]      # (H, 4H), (1, 4H)

    B, T = labels.shape
    time_step = T - 1
    V, H = E.shape

    LANE, SUB = 128, 8
    Hp = _round_up(H, LANE)
    Vp = _round_up(V, LANE)
    Bp = _round_up(B, SUB)

    # ---- one-time work hoisted out of the kernel -------------------------
    img_mean = jnp.mean(image_features, axis=1)                     # (B, Di)
    proj = (text_features @ Wt + bt) + (img_mean @ Wi + bi)         # (B, H)
    proj_p = jnp.zeros((Bp, Hp), jnp.float32).at[:B, :H].set(proj)

    # embedding gather stays in glue; time-major, padded
    emb = E[labels[:, :-1]]                                         # (B, T-1, H)
    emb_tm = jnp.transpose(emb, (1, 0, 2))                          # (T-1, B, H)
    emb_p = jnp.zeros((time_step, Bp, Hp), jnp.float32)
    emb_p = emb_p.at[:, :B, :H].set(emb_tm)

    # ---- fused + padded LSTM gate weights --------------------------------
    # gate g of the padded 4*Hp axis occupies columns [g*Hp, g*Hp + H)
    W_f = jnp.zeros((2 * Hp, 4 * Hp), jnp.float32)
    b_f = jnp.zeros((1, 4 * Hp), jnp.float32)
    b_sum = (bih + bhh).reshape(1, 4 * H)
    for g in range(4):
        W_f = W_f.at[:H, g * Hp:g * Hp + H].set(Wih[:, g * H:(g + 1) * H])
        W_f = W_f.at[Hp:Hp + H, g * Hp:g * Hp + H].set(Whh[:, g * H:(g + 1) * H])
        b_f = b_f.at[:, g * Hp:g * Hp + H].set(b_sum[:, g * H:(g + 1) * H])

    # padded E^T for the batched vocab projection
    ET_p = jnp.zeros((Hp, Vp), jnp.float32).at[:H, :V].set(E.T)

    vmem = pl.BlockSpec(memory_space=pltpu.MemorySpace.VMEM)
    out_p = pl.pallas_call(
        decoder_kernel,
        out_shape=jax.ShapeDtypeStruct((time_step * Bp, Vp), jnp.float32),
        in_specs=[vmem, vmem, vmem, vmem, vmem],
        out_specs=vmem,
    )(emb_p, proj_p, W_f, b_f, ET_p)

    # ((T-1)*Bp, Vp) -> (B, T-1, V)
    out = out_p.reshape(time_step, Bp, Vp)
    out = jnp.transpose(out, (1, 0, 2))[:B, :, :V]
    return out


def decoder_rnn_reference(params, text_features, image_features, labels):
    """Pure-JAX reference matching the PyTorch forward pass."""
    E = params["embed"]
    Wt, bt = params["w_text"], params["b_text"]
    Wi, bi = params["w_image"], params["b_image"]
    Wih, bih = params["w_ih"], params["b_ih"]
    Whh, bhh = params["w_hh"], params["b_hh"]

    B, T = labels.shape
    time_step = T - 1
    H = E.shape[1]

    emb = E[labels[:, :-1]]
    img_mean = jnp.mean(image_features, axis=1)
    proj = (text_features @ Wt + bt) + (img_mean @ Wi + bi)

    hx = jnp.zeros((B, H), jnp.float32)
    cx = jnp.zeros((B, H), jnp.float32)
    outs = []
    for i in range(time_step):
        x = emb[:, i, :]
        gates = x @ Wih + bih + hx @ Whh + bhh
        i_g = jax.nn.sigmoid(gates[:, 0 * H:1 * H])
        f_g = jax.nn.sigmoid(gates[:, 1 * H:2 * H])
        g_g = jnp.tanh(gates[:, 2 * H:3 * H])
        o_g = jax.nn.sigmoid(gates[:, 3 * H:4 * H])
        cx = f_g * cx + i_g * g_g
        hx = o_g * jnp.tanh(cx)
        xt = proj + hx
        outs.append(xt @ E.T)
    return jnp.stack(outs, axis=1)


def make_params(key, image_hidden_size, text_hidden_size, label_hidden_size, vocab_size):
    ks = jax.random.split(key, 10)
    H = label_hidden_size
    s = 0.1
    embed = s * jax.random.normal(ks[0], (vocab_size, H), jnp.float32)
    embed = embed.at[0].set(0.0)  # padding_idx=0
    return {
        "embed": embed,
        # nn.Linear weights stored pre-transposed: (in, out)
        "w_text": s * jax.random.normal(ks[1], (text_hidden_size, H), jnp.float32),
        "b_text": s * jax.random.normal(ks[2], (1, H), jnp.float32),
        "w_image": s * jax.random.normal(ks[3], (image_hidden_size, H), jnp.float32),
        "b_image": s * jax.random.normal(ks[4], (1, H), jnp.float32),
        # LSTMCell weights pre-transposed: (in, 4H) / (H, 4H); gate order i,f,g,o
        "w_ih": s * jax.random.normal(ks[5], (H, 4 * H), jnp.float32),
        "b_ih": s * jax.random.normal(ks[6], (1, 4 * H), jnp.float32),
        "w_hh": s * jax.random.normal(ks[7], (H, 4 * H), jnp.float32),
        "b_hh": s * jax.random.normal(ks[8], (1, 4 * H), jnp.float32),
    }


if __name__ == "__main__":
    # small, forward-consistent shapes
    B = 4                 # batch
    T = 8                 # label sequence length (time_step = T - 1 = 7)
    HW = 16               # spatial positions of image features
    image_hidden_size = 48
    text_hidden_size = 64
    label_hidden_size = 32
    vocab_size = 50

    key = jax.random.PRNGKey(0)
    kp, k1, k2, k3 = jax.random.split(key, 4)

    params = make_params(kp, image_hidden_size, text_hidden_size,
                         label_hidden_size, vocab_size)

    text_features = jax.random.normal(k1, (B, text_hidden_size), jnp.float32)
    image_features = jax.random.normal(k2, (B, HW, image_hidden_size), jnp.float32)
    labels = jax.random.randint(k3, (B, T), 0, vocab_size, dtype=jnp.int32)

    out = decoder_rnn_forward(params, text_features, image_features, labels)
    out = jax.block_until_ready(out)

    ref = decoder_rnn_reference(params, text_features, image_features, labels)
    ref = jax.block_until_ready(ref)

    assert out.shape == (B, T - 1, vocab_size), out.shape
    np.testing.assert_allclose(np.asarray(out), np.asarray(ref), rtol=5e-3, atol=5e-3)

    print("KERNEL_OK")
</pallas_src>

<mosaic_0001>
module attributes {stable_mosaic.version = 11 : i64} {
  func.func @decoder_kernel(%arg0: memref<7x8x128xf32, #tpu.memory_space<vmem>>, %arg1: memref<8x128xf32, #tpu.memory_space<vmem>>, %arg2: memref<256x512xf32, #tpu.memory_space<vmem>>, %arg3: memref<1x512xf32, #tpu.memory_space<vmem>>, %arg4: memref<128x128xf32, #tpu.memory_space<vmem>>, %arg5: memref<56x128xf32, #tpu.memory_space<vmem>>) attributes {dimension_semantics = [], scalar_prefetch = 0 : i64, scratch_operands = 0 : i64, tpu.core_type = #tpu.core_type<tc>} {
    %c0 = arith.constant 0 : index
    %c0_0 = arith.constant 0 : index
    %0 = vector.load %arg1[%c0, %c0_0] : memref<8x128xf32, #tpu.memory_space<vmem>>, vector<8x128xf32>
    %c0_1 = arith.constant 0 : index
    %c0_2 = arith.constant 0 : index
    %1 = vector.load %arg3[%c0_1, %c0_2] : memref<1x512xf32, #tpu.memory_space<vmem>>, vector<1x512xf32>
    %cst = arith.constant 0.000000e+00 : f32
    %2 = vector.broadcast %cst : f32 to vector<8x128xf32>
    %cst_3 = arith.constant 0.000000e+00 : f32
    %3 = vector.broadcast %cst_3 : f32 to vector<8x128xf32>
    %c0_4 = arith.constant 0 : index
    %c0_5 = arith.constant 0 : index
    %c0_6 = arith.constant 0 : index
    %4 = vector.load %arg0[%c0_4, %c0_5, %c0_6] : memref<7x8x128xf32, #tpu.memory_space<vmem>>, vector<1x8x128xf32>
    %5 = vector.shape_cast %4 : vector<1x8x128xf32> to vector<8x128xf32>
    %6 = tpu.concatenate %5, %2 in 1 : vector<8x128xf32>, vector<8x128xf32> -> vector<8x256xf32>
    %c0_7 = arith.constant 0 : index
    %c0_8 = arith.constant 0 : index
    %7 = vector.load %arg2[%c0_7, %c0_8] : memref<256x512xf32, #tpu.memory_space<vmem>>, vector<256x512xf32>
    %cst_9 = arith.constant dense<0.000000e+00> : vector<8x512xf32>
    %8 = tpu.matmul %6, %7, %cst_9 {dimension_numbers = #tpu.dot_dimension_numbers<[1], [0], [0], [1], [0, 0, 1, 1], [], []>} : vector<8x256xf32>, vector<256x512xf32>, vector<8x512xf32> -> vector<8x512xf32>
    %9 = vector.broadcast %1 : vector<1x512xf32> to vector<8x512xf32>
    %10 = arith.addf %8, %9 : vector<8x512xf32>
    %11 = vector.extract_strided_slice %10 {offsets = [0, 0], sizes = [8, 128], strides = [1, 1]} : vector<8x512xf32> to vector<8x128xf32>
    %12 = arith.negf %11 : vector<8x128xf32>
    %13 = math.exp %12 : vector<8x128xf32>
    %cst_10 = arith.constant 1.000000e+00 : f32
    %14 = vector.broadcast %cst_10 : f32 to vector<8x128xf32>
    %15 = arith.addf %14, %13 : vector<8x128xf32>
    %16 = arith.divf %14, %15 : vector<8x128xf32>
    %17 = vector.extract_strided_slice %10 {offsets = [0, 128], sizes = [8, 128], strides = [1, 1]} : vector<8x512xf32> to vector<8x128xf32>
    %18 = arith.negf %17 : vector<8x128xf32>
    %19 = math.exp %18 : vector<8x128xf32>
    %cst_11 = arith.constant 1.000000e+00 : f32
    %20 = vector.broadcast %cst_11 : f32 to vector<8x128xf32>
    %21 = arith.addf %20, %19 : vector<8x128xf32>
    %22 = arith.divf %20, %21 : vector<8x128xf32>
    %23 = vector.extract_strided_slice %10 {offsets = [0, 256], sizes = [8, 128], strides = [1, 1]} : vector<8x512xf32> to vector<8x128xf32>
    %24 = math.tanh %23 : vector<8x128xf32>
    %25 = vector.extract_strided_slice %10 {offsets = [0, 384], sizes = [8, 128], strides = [1, 1]} : vector<8x512xf32> to vector<8x128xf32>
    %26 = arith.negf %25 : vector<8x128xf32>
    %27 = math.exp %26 : vector<8x128xf32>
    %cst_12 = arith.constant 1.000000e+00 : f32
    %28 = vector.broadcast %cst_12 : f32 to vector<8x128xf32>
    %29 = arith.addf %28, %27 : vector<8x128xf32>
    %30 = arith.divf %28, %29 : vector<8x128xf32>
    %31 = arith.mulf %22, %3 : vector<8x128xf32>
    %32 = arith.mulf %16, %24 : vector<8x128xf32>
    %33 = arith.addf %31, %32 : vector<8x128xf32>
    %34 = math.tanh %33 : vector<8x128xf32>
    %35 = arith.mulf %30, %34 : vector<8x128xf32>
    %36 = arith.addf %0, %35 : vector<8x128xf32>
    %c1 = arith.constant 1 : index
    %c0_13 = arith.constant 0 : index
    %c0_14 = arith.constant 0 : index
    %37 = vector.load %arg0[%c1, %c0_13, %c0_14] : memref<7x8x128xf32, #tpu.memory_space<vmem>>, vector<1x8x128xf32>
    %38 = vector.shape_cast %37 : vector<1x8x128xf32> to vector<8x128xf32>
    %39 = tpu.concatenate %38, %35 in 1 : vector<8x128xf32>, vector<8x128xf32> -> vector<8x256xf32>
    %c0_15 = arith.constant 0 : index
    %c0_16 = arith.constant 0 : index
    %40 = vector.load %arg2[%c0_15, %c0_16] : memref<256x512xf32, #tpu.memory_space<vmem>>, vector<256x512xf32>
    %cst_17 = arith.constant dense<0.000000e+00> : vector<8x512xf32>
    %41 = tpu.matmul %39, %40, %cst_17 {dimension_numbers = #tpu.dot_dimension_numbers<[1], [0], [0], [1], [0, 0, 1, 1], [], []>} : vector<8x256xf32>, vector<256x512xf32>, vector<8x512xf32> -> vector<8x512xf32>
    %42 = vector.broadcast %1 : vector<1x512xf32> to vector<8x512xf32>
    %43 = arith.addf %41, %42 : vector<8x512xf32>
    %44 = vector.extract_strided_slice %43 {offsets = [0, 0], sizes = [8, 128], strides = [1, 1]} : vector<8x512xf32> to vector<8x128xf32>
    %45 = arith.negf %44 : vector<8x128xf32>
    %46 = math.exp %45 : vector<8x128xf32>
    %cst_18 = arith.constant 1.000000e+00 : f32
    %47 = vector.broadcast %cst_18 : f32 to vector<8x128xf32>
    %48 = arith.addf %47, %46 : vector<8x128xf32>
    %49 = arith.divf %47, %48 : vector<8x128xf32>
    %50 = vector.extract_strided_slice %43 {offsets = [0, 128], sizes = [8, 128], strides = [1, 1]} : vector<8x512xf32> to vector<8x128xf32>
    %51 = arith.negf %50 : vector<8x128xf32>
    %52 = math.exp %51 : vector<8x128xf32>
    %cst_19 = arith.constant 1.000000e+00 : f32
    %53 = vector.broadcast %cst_19 : f32 to vector<8x128xf32>
    %54 = arith.addf %53, %52 : vector<8x128xf32>
    %55 = arith.divf %53, %54 : vector<8x128xf32>
    %56 = vector.extract_strided_slice %43 {offsets = [0, 256], sizes = [8, 128], strides = [1, 1]} : vector<8x512xf32> to vector<8x128xf32>
    %57 = math.tanh %56 : vector<8x128xf32>
    %58 = vector.extract_strided_slice %43 {offsets = [0, 384], sizes = [8, 128], strides = [1, 1]} : vector<8x512xf32> to vector<8x128xf32>
    %59 = arith.negf %58 : vector<8x128xf32>
    %60 = math.exp %59 : vector<8x128xf32>
    %cst_20 = arith.constant 1.000000e+00 : f32
    %61 = vector.broadcast %cst_20 : f32 to vector<8x128xf32>
    %62 = arith.addf %61, %60 : vector<8x128xf32>
    %63 = arith.divf %61, %62 : vector<8x128xf32>
    %64 = arith.mulf %55, %33 : vector<8x128xf32>
    %65 = arith.mulf %49, %57 : vector<8x128xf32>
    %66 = arith.addf %64, %65 : vector<8x128xf32>
    %67 = math.tanh %66 : vector<8x128xf32>
    %68 = arith.mulf %63, %67 : vector<8x128xf32>
    %69 = arith.addf %0, %68 : vector<8x128xf32>
    %c2 = arith.constant 2 : index
    %c0_21 = arith.constant 0 : index
    %c0_22 = arith.constant 0 : index
    %70 = vector.load %arg0[%c2, %c0_21, %c0_22] : memref<7x8x128xf32, #tpu.memory_space<vmem>>, vector<1x8x128xf32>
    %71 = vector.shape_cast %70 : vector<1x8x128xf32> to vector<8x128xf32>
    %72 = tpu.concatenate %71, %68 in 1 : vector<8x128xf32>, vector<8x128xf32> -> vector<8x256xf32>
    %c0_23 = arith.constant 0 : index
    %c0_24 = arith.constant 0 : index
    %73 = vector.load %arg2[%c0_23, %c0_24] : memref<256x512xf32, #tpu.memory_space<vmem>>, vector<256x512xf32>
    %cst_25 = arith.constant dense<0.000000e+00> : vector<8x512xf32>
    %74 = tpu.matmul %72, %73, %cst_25 {dimension_numbers = #tpu.dot_dimension_numbers<[1], [0], [0], [1], [0, 0, 1, 1], [], []>} : vector<8x256xf32>, vector<256x512xf32>, vector<8x512xf32> -> vector<8x512xf32>
    %75 = vector.broadcast %1 : vector<1x512xf32> to vector<8x512xf32>
    %76 = arith.addf %74, %75 : vector<8x512xf32>
    %77 = vector.extract_strided_slice %76 {offsets = [0, 0], sizes = [8, 128], strides = [1, 1]} : vector<8x512xf32> to vector<8x128xf32>
    %78 = arith.negf %77 : vector<8x128xf32>
    %79 = math.exp %78 : vector<8x128xf32>
    %cst_26 = arith.constant 1.000000e+00 : f32
    %80 = vector.broadcast %cst_26 : f32 to vector<8x128xf32>
    %81 = arith.addf %80, %79 : vector<8x128xf32>
    %82 = arith.divf %80, %81 : vector<8x128xf32>
    %83 = vector.extract_strided_slice %76 {offsets = [0, 128], sizes = [8, 128], strides = [1, 1]} : vector<8x512xf32> to vector<8x128xf32>
    %84 = arith.negf %83 : vector<8x128xf32>
    %85 = math.exp %84 : vector<8x128xf32>
    %cst_27 = arith.constant 1.000000e+00 : f32
    %86 = vector.broadcast %cst_27 : f32 to vector<8x128xf32>
    %87 = arith.addf %86, %85 : vector<8x128xf32>
    %88 = arith.divf %86, %87 : vector<8x128xf32>
    %89 = vector.extract_strided_slice %76 {offsets = [0, 256], sizes = [8, 128], strides = [1, 1]} : vector<8x512xf32> to vector<8x128xf32>
    %90 = math.tanh %89 : vector<8x128xf32>
    %91 = vector.extract_strided_slice %76 {offsets = [0, 384], sizes = [8, 128], strides = [1, 1]} : vector<8x512xf32> to vector<8x128xf32>
    %92 = arith.negf %91 : vector<8x128xf32>
    %93 = math.exp %92 : vector<8x128xf32>
    %cst_28 = arith.constant 1.000000e+00 : f32
    %94 = vector.broadcast %cst_28 : f32 to vector<8x128xf32>
    %95 = arith.addf %94, %93 : vector<8x128xf32>
    %96 = arith.divf %94, %95 : vector<8x128xf32>
    %97 = arith.mulf %88, %66 : vector<8x128xf32>
    %98 = arith.mulf %82, %90 : vector<8x128xf32>
    %99 = arith.addf %97, %98 : vector<8x128xf32>
    %100 = math.tanh %99 : vector<8x128xf32>
    %101 = arith.mulf %96, %100 : vector<8x128xf32>
    %102 = arith.addf %0, %101 : vector<8x128xf32>
    %c3 = arith.constant 3 : index
    %c0_29 = arith.constant 0 : index
    %c0_30 = arith.constant 0 : index
    %103 = vector.load %arg0[%c3, %c0_29, %c0_30] : memref<7x8x128xf32, #tpu.memory_space<vmem>>, vector<1x8x128xf32>
    %104 = vector.shape_cast %103 : vector<1x8x128xf32> to vector<8x128xf32>
    %105 = tpu.concatenate %104, %101 in 1 : vector<8x128xf32>, vector<8x128xf32> -> vector<8x256xf32>
    %c0_31 = arith.constant 0 : index
    %c0_32 = arith.constant 0 : index
    %106 = vector.load %arg2[%c0_31, %c0_32] : memref<256x512xf32, #tpu.memory_space<vmem>>, vector<256x512xf32>
    %cst_33 = arith.constant dense<0.000000e+00> : vector<8x512xf32>
    %107 = tpu.matmul %105, %106, %cst_33 {dimension_numbers = #tpu.dot_dimension_numbers<[1], [0], [0], [1], [0, 0, 1, 1], [], []>} : vector<8x256xf32>, vector<256x512xf32>, vector<8x512xf32> -> vector<8x512xf32>
    %108 = vector.broadcast %1 : vector<1x512xf32> to vector<8x512xf32>
    %109 = arith.addf %107, %108 : vector<8x512xf32>
    %110 = vector.extract_strided_slice %109 {offsets = [0, 0], sizes = [8, 128], strides = [1, 1]} : vector<8x512xf32> to vector<8x128xf32>
    %111 = arith.negf %110 : vector<8x128xf32>
    %112 = math.exp %111 : vector<8x128xf32>
    %cst_34 = arith.constant 1.000000e+00 : f32
    %113 = vector.broadcast %cst_34 : f32 to vector<8x128xf32>
    %114 = arith.addf %113, %112 : vector<8x128xf32>
    %115 = arith.divf %113, %114 : vector<8x128xf32>
    %116 = vector.extract_strided_slice %109 {offsets = [0, 128], sizes = [8, 128], strides = [1, 1]} : vector<8x512xf32> to vector<8x128xf32>
    %117 = arith.negf %116 : vector<8x128xf32>
    %118 = math.exp %117 : vector<8x128xf32>
    %cst_35 = arith.constant 1.000000e+00 : f32
    %119 = vector.broadcast %cst_35 : f32 to vector<8x128xf32>
    %120 = arith.addf %119, %118 : vector<8x128xf32>
    %121 = arith.divf %119, %120 : vector<8x128xf32>
    %122 = vector.extract_strided_slice %109 {offsets = [0, 256], sizes = [8, 128], strides = [1, 1]} : vector<8x512xf32> to vector<8x128xf32>
    %123 = math.tanh %122 : vector<8x128xf32>
    %124 = vector.extract_strided_slice %109 {offsets = [0, 384], sizes = [8, 128], strides = [1, 1]} : vector<8x512xf32> to vector<8x128xf32>
    %125 = arith.negf %124 : vector<8x128xf32>
    %126 = math.exp %125 : vector<8x128xf32>
    %cst_36 = arith.constant 1.000000e+00 : f32
    %127 = vector.broadcast %cst_36 : f32 to vector<8x128xf32>
    %128 = arith.addf %127, %126 : vector<8x128xf32>
    %129 = arith.divf %127, %128 : vector<8x128xf32>
    %130 = arith.mulf %121, %99 : vector<8x128xf32>
    %131 = arith.mulf %115, %123 : vector<8x128xf32>
    %132 = arith.addf %130, %131 : vector<8x128xf32>
    %133 = math.tanh %132 : vector<8x128xf32>
    %134 = arith.mulf %129, %133 : vector<8x128xf32>
    %135 = arith.addf %0, %134 : vector<8x128xf32>
    %c4 = arith.constant 4 : index
    %c0_37 = arith.constant 0 : index
    %c0_38 = arith.constant 0 : index
    %136 = vector.load %arg0[%c4, %c0_37, %c0_38] : memref<7x8x128xf32, #tpu.memory_space<vmem>>, vector<1x8x128xf32>
    %137 = vector.shape_cast %136 : vector<1x8x128xf32> to vector<8x128xf32>
    %138 = tpu.concatenate %137, %134 in 1 : vector<8x128xf32>, vector<8x128xf32> -> vector<8x256xf32>
    %c0_39 = arith.constant 0 : index
    %c0_40 = arith.constant 0 : index
    %139 = vector.load %arg2[%c0_39, %c0_40] : memref<256x512xf32, #tpu.memory_space<vmem>>, vector<256x512xf32>
    %cst_41 = arith.constant dense<0.000000e+00> : vector<8x512xf32>
    %140 = tpu.matmul %138, %139, %cst_41 {dimension_numbers = #tpu.dot_dimension_numbers<[1], [0], [0], [1], [0, 0, 1, 1], [], []>} : vector<8x256xf32>, vector<256x512xf32>, vector<8x512xf32> -> vector<8x512xf32>
    %141 = vector.broadcast %1 : vector<1x512xf32> to vector<8x512xf32>
    %142 = arith.addf %140, %141 : vector<8x512xf32>
    %143 = vector.extract_strided_slice %142 {offsets = [0, 0], sizes = [8, 128], strides = [1, 1]} : vector<8x512xf32> to vector<8x128xf32>
    %144 = arith.negf %143 : vector<8x128xf32>
    %145 = math.exp %144 : vector<8x128xf32>
    %cst_42 = arith.constant 1.000000e+00 : f32
    %146 = vector.broadcast %cst_42 : f32 to vector<8x128xf32>
    %147 = arith.addf %146, %145 : vector<8x128xf32>
    %148 = arith.divf %146, %147 : vector<8x128xf32>
    %149 = vector.extract_strided_slice %142 {offsets = [0, 128], sizes = [8, 128], strides = [1, 1]} : vector<8x512xf32> to vector<8x128xf32>
    %150 = arith.negf %149 : vector<8x128xf32>
    %151 = math.exp %150 : vector<8x128xf32>
    %cst_43 = arith.constant 1.000000e+00 : f32
    %152 = vector.broadcast %cst_43 : f32 to vector<8x128xf32>
    %153 = arith.addf %152, %151 : vector<8x128xf32>
    %154 = arith.divf %152, %153 : vector<8x128xf32>
    %155 = vector.extract_strided_slice %142 {offsets = [0, 256], sizes = [8, 128], strides = [1, 1]} : vector<8x512xf32> to vector<8x128xf32>
    %156 = math.tanh %155 : vector<8x128xf32>
    %157 = vector.extract_strided_slice %142 {offsets = [0, 384], sizes = [8, 128], strides = [1, 1]} : vector<8x512xf32> to vector<8x128xf32>
    %158 = arith.negf %157 : vector<8x128xf32>
    %159 = math.exp %158 : vector<8x128xf32>
    %cst_44 = arith.constant 1.000000e+00 : f32
    %160 = vector.broadcast %cst_44 : f32 to vector<8x128xf32>
    %161 = arith.addf %160, %159 : vector<8x128xf32>
    %162 = arith.divf %160, %161 : vector<8x128xf32>
    %163 = arith.mulf %154, %132 : vector<8x128xf32>
    %164 = arith.mulf %148, %156 : vector<8x128xf32>
    %165 = arith.addf %163, %164 : vector<8x128xf32>
    %166 = math.tanh %165 : vector<8x128xf32>
    %167 = arith.mulf %162, %166 : vector<8x128xf32>
    %168 = arith.addf %0, %167 : vector<8x128xf32>
    %c5 = arith.constant 5 : index
    %c0_45 = arith.constant 0 : index
    %c0_46 = arith.constant 0 : index
    %169 = vector.load %arg0[%c5, %c0_45, %c0_46] : memref<7x8x128xf32, #tpu.memory_space<vmem>>, vector<1x8x128xf32>
    %170 = vector.shape_cast %169 : vector<1x8x128xf32> to vector<8x128xf32>
    %171 = tpu.concatenate %170, %167 in 1 : vector<8x128xf32>, vector<8x128xf32> -> vector<8x256xf32>
    %c0_47 = arith.constant 0 : index
    %c0_48 = arith.constant 0 : index
    %172 = vector.load %arg2[%c0_47, %c0_48] : memref<256x512xf32, #tpu.memory_space<vmem>>, vector<256x512xf32>
    %cst_49 = arith.constant dense<0.000000e+00> : vector<8x512xf32>
    %173 = tpu.matmul %171, %172, %cst_49 {dimension_numbers = #tpu.dot_dimension_numbers<[1], [0], [0], [1], [0, 0, 1, 1], [], []>} : vector<8x256xf32>, vector<256x512xf32>, vector<8x512xf32> -> vector<8x512xf32>
    %174 = vector.broadcast %1 : vector<1x512xf32> to vector<8x512xf32>
    %175 = arith.addf %173, %174 : vector<8x512xf32>
    %176 = vector.extract_strided_slice %175 {offsets = [0, 0], sizes = [8, 128], strides = [1, 1]} : vector<8x512xf32> to vector<8x128xf32>
    %177 = arith.negf %176 : vector<8x128xf32>
    %178 = math.exp %177 : vector<8x128xf32>
    %cst_50 = arith.constant 1.000000e+00 : f32
    %179 = vector.broadcast %cst_50 : f32 to vector<8x128xf32>
    %180 = arith.addf %179, %178 : vector<8x128xf32>
    %181 = arith.divf %179, %180 : vector<8x128xf32>
    %182 = vector.extract_strided_slice %175 {offsets = [0, 128], sizes = [8, 128], strides = [1, 1]} : vector<8x512xf32> to vector<8x128xf32>
    %183 = arith.negf %182 : vector<8x128xf32>
    %184 = math.exp %183 : vector<8x128xf32>
    %cst_51 = arith.constant 1.000000e+00 : f32
    %185 = vector.broadcast %cst_51 : f32 to vector<8x128xf32>
    %186 = arith.addf %185, %184 : vector<8x128xf32>
    %187 = arith.divf %185, %186 : vector<8x128xf32>
    %188 = vector.extract_strided_slice %175 {offsets = [0, 256], sizes = [8, 128], strides = [1, 1]} : vector<8x512xf32> to vector<8x128xf32>
    %189 = math.tanh %188 : vector<8x128xf32>
    %190 = vector.extract_strided_slice %175 {offsets = [0, 384], sizes = [8, 128], strides = [1, 1]} : vector<8x512xf32> to vector<8x128xf32>
    %191 = arith.negf %190 : vector<8x128xf32>
    %192 = math.exp %191 : vector<8x128xf32>
    %cst_52 = arith.constant 1.000000e+00 : f32
    %193 = vector.broadcast %cst_52 : f32 to vector<8x128xf32>
    %194 = arith.addf %193, %192 : vector<8x128xf32>
    %195 = arith.divf %193, %194 : vector<8x128xf32>
    %196 = arith.mulf %187, %165 : vector<8x128xf32>
    %197 = arith.mulf %181, %189 : vector<8x128xf32>
    %198 = arith.addf %196, %197 : vector<8x128xf32>
    %199 = math.tanh %198 : vector<8x128xf32>
    %200 = arith.mulf %195, %199 : vector<8x128xf32>
    %201 = arith.addf %0, %200 : vector<8x128xf32>
    %c6 = arith.constant 6 : index
    %c0_53 = arith.constant 0 : index
    %c0_54 = arith.constant 0 : index
    %202 = vector.load %arg0[%c6, %c0_53, %c0_54] : memref<7x8x128xf32, #tpu.memory_space<vmem>>, vector<1x8x128xf32>
    %203 = vector.shape_cast %202 : vector<1x8x128xf32> to vector<8x128xf32>
    %204 = tpu.concatenate %203, %200 in 1 : vector<8x128xf32>, vector<8x128xf32> -> vector<8x256xf32>
    %c0_55 = arith.constant 0 : index
    %c0_56 = arith.constant 0 : index
    %205 = vector.load %arg2[%c0_55, %c0_56] : memref<256x512xf32, #tpu.memory_space<vmem>>, vector<256x512xf32>
    %cst_57 = arith.constant dense<0.000000e+00> : vector<8x512xf32>
    %206 = tpu.matmul %204, %205, %cst_57 {dimension_numbers = #tpu.dot_dimension_numbers<[1], [0], [0], [1], [0, 0, 1, 1], [], []>} : vector<8x256xf32>, vector<256x512xf32>, vector<8x512xf32> -> vector<8x512xf32>
    %207 = vector.broadcast %1 : vector<1x512xf32> to vector<8x512xf32>
    %208 = arith.addf %206, %207 : vector<8x512xf32>
    %209 = vector.extract_strided_slice %208 {offsets = [0, 0], sizes = [8, 128], strides = [1, 1]} : vector<8x512xf32> to vector<8x128xf32>
    %210 = arith.negf %209 : vector<8x128xf32>
    %211 = math.exp %210 : vector<8x128xf32>
    %cst_58 = arith.constant 1.000000e+00 : f32
    %212 = vector.broadcast %cst_58 : f32 to vector<8x128xf32>
    %213 = arith.addf %212, %211 : vector<8x128xf32>
    %214 = arith.divf %212, %213 : vector<8x128xf32>
    %215 = vector.extract_strided_slice %208 {offsets = [0, 128], sizes = [8, 128], strides = [1, 1]} : vector<8x512xf32> to vector<8x128xf32>
    %216 = arith.negf %215 : vector<8x128xf32>
    %217 = math.exp %216 : vector<8x128xf32>
    %cst_59 = arith.constant 1.000000e+00 : f32
    %218 = vector.broadcast %cst_59 : f32 to vector<8x128xf32>
    %219 = arith.addf %218, %217 : vector<8x128xf32>
    %220 = arith.divf %218, %219 : vector<8x128xf32>
    %221 = vector.extract_strided_slice %208 {offsets = [0, 256], sizes = [8, 128], strides = [1, 1]} : vector<8x512xf32> to vector<8x128xf32>
    %222 = math.tanh %221 : vector<8x128xf32>
    %223 = vector.extract_strided_slice %208 {offsets = [0, 384], sizes = [8, 128], strides = [1, 1]} : vector<8x512xf32> to vector<8x128xf32>
    %224 = arith.negf %223 : vector<8x128xf32>
    %225 = math.exp %224 : vector<8x128xf32>
    %cst_60 = arith.constant 1.000000e+00 : f32
    %226 = vector.broadcast %cst_60 : f32 to vector<8x128xf32>
    %227 = arith.addf %226, %225 : vector<8x128xf32>
    %228 = arith.divf %226, %227 : vector<8x128xf32>
    %229 = arith.mulf %220, %198 : vector<8x128xf32>
    %230 = arith.mulf %214, %222 : vector<8x128xf32>
    %231 = arith.addf %229, %230 : vector<8x128xf32>
    %232 = math.tanh %231 : vector<8x128xf32>
    %233 = arith.mulf %228, %232 : vector<8x128xf32>
    %234 = arith.addf %0, %233 : vector<8x128xf32>
    %235 = tpu.concatenate %36, %69, %102, %135, %168, %201, %234 in 0 : vector<8x128xf32>, vector<8x128xf32>, vector<8x128xf32>, vector<8x128xf32>, vector<8x128xf32>, vector<8x128xf32>, vector<8x128xf32> -> vector<56x128xf32>
    %c0_61 = arith.constant 0 : index
    %c0_62 = arith.constant 0 : index
    %236 = vector.load %arg4[%c0_61, %c0_62] : memref<128x128xf32, #tpu.memory_space<vmem>>, vector<128x128xf32>
    %cst_63 = arith.constant dense<0.000000e+00> : vector<56x128xf32>
    %237 = tpu.matmul %235, %236, %cst_63 {dimension_numbers = #tpu.dot_dimension_numbers<[1], [0], [0], [1], [0, 0, 1, 1], [], []>} : vector<56x128xf32>, vector<128x128xf32>, vector<56x128xf32> -> vector<56x128xf32>
    %c0_64 = arith.constant 0 : index
    %c0_65 = arith.constant 0 : index
    %238 = vector.load %arg5[%c0_64, %c0_65] : memref<56x128xf32, #tpu.memory_space<vmem>>, vector<56x128xf32>
    tpu.vector_store %arg5[%c0_64, %c0_65], %237 {strides = array<i32>} : memref<56x128xf32, #tpu.memory_space<vmem>>, vector<56x128xf32>,
    return
  }
}

</mosaic_0001>

<bundles_post_ra>
// kernel: tpu_custom_call.1
= control target key start
LH: loop header
LB: loop body
LE: loop exit
PB: predicated region body
PF: predicated region fallthrough
CT: control target
= control target key end

     0   :  { %10 = vsyncpa [#allocation3], 0  ;;  %s3653_s0 = inlined_call_operand.hbm [shape: f32[7,8,128], index: 0, kind: input, shape index: {}]   ;;  %s3654_s1 = inlined_call_operand.hbm [shape: f32[8,128], index: 1, kind: input, shape index: {}]   ;;  %s3655_s2 = inlined_call_operand.hbm [shape: f32[256,512], index: 2, kind: input, shape index: {}]   ;;  %s3656_s3 = inlined_call_operand.vmem [shape: f32[1,512], index: 3, kind: input, shape index: {}]   ;;  %s3657_s4 = inlined_call_operand.hbm [shape: f32[128,128], index: 4, kind: input, shape index: {}]   ;;  %s3658_s5 = inlined_call_operand.hbm [shape: f32[56,128], index: 5, kind: output, shape index: {}]  }
   0x1   :  { %11 = vsyncpa [#allocation6], 0 }
   0x2   :  { %12 = vsyncpa [#allocation9], 0 }
   0x3   :  { %13 = vsyncpa [#allocation4], 0  ;;  %s2037_s18 = smov [#allocation5]   ;;  %s2038_s20 = smov [#allocation2]  }
   0x4   :  { %s32_s19 = sshll.u32 %s2037_s18, 4  ;;  %s19_s21 = sshll.u32 %s2038_s20, 4  ;;  %s33_s19 = int_to_ptr.vmem [resolvable:$true] %s32_s19  ;;  %s20_s21 = int_to_ptr.vmem [resolvable:$true] %s19_s21 }
   0x5   :  { %s1937_s22 = scalar_lea.vmem %s33_s19, 128  ;;  %p1942_p1 = scmp.lt.s32.totalorder %s33_s19, %s33_s19 }
   0x6   :  { %p1938_p0 = scmp.ne.s32.totalorder %s33_s19, %s1937_s22  ;;  %p1943_p2 = scmp.lt.s32.totalorder %s1937_s22, %s1937_s22 }
   0x8   :  { %p1944_p3 = por %p1943_p2, %p1942_p1 }
   0xa   :  { %p1945_p4 = pnand %p1944_p3, %p1938_p0 }
   0xc   :  { %1948 = shalt.err (!%p1945_p4)
}
   0xd   :  { %35 = dma.hbm_to_vmem [thread:$0]  %s3654_s1, 128, %s33_s19, [#allocation6]  }
   0xe   :  { %s1957_s25 = scalar_lea.vmem %s20_s21, 896  ;;  %p1962_p6 = scmp.lt.s32.totalorder %s20_s21, %s20_s21 }
   0xf   :  { %p1958_p5 = scmp.ne.s32.totalorder %s20_s21, %s1957_s25  ;;  %p1963_p7 = scmp.lt.s32.totalorder %s1957_s25, %s1957_s25 }
  0x11   :  { %p1964_p8 = por %p1963_p7, %p1962_p6 }
  0x13   :  { %p1965_p9 = pnand %p1964_p8, %p1958_p5 }
  0x15   :  { %1968 = shalt.err (!%p1965_p9)
}
  0x16   :  { %s2039_s26 = smov 128   ;;  %s2040_s27 = smov 8  }
  0x17   :  { %25 = dma.hbm_to_vmem [thread:$0]  %s3653_s0, 896, %s20_s21, [#allocation3], %s2039_s26, %s2039_s26, %s2040_s27  }
  0x18   :  { %s2041_s30 = smov [#allocation7]  }
  0x19   :  { %s41_s6 = sshll.u32 %s2041_s30, 4  ;;  %s42_s6 = int_to_ptr.vmem [resolvable:$true] %s41_s6 }
  0x1a   :  { %s1977_s1 = scalar_lea.vmem %s42_s6, 16384  ;;  %p1982_p11 = scmp.lt.s32.totalorder %s42_s6, %s42_s6 }
  0x1b   :  { %p1978_p10 = scmp.ne.s32.totalorder %s42_s6, %s1977_s1  ;;  %p1983_p12 = scmp.lt.s32.totalorder %s1977_s1, %s1977_s1 }
  0x1d   :  { %p1984_p13 = por %p1983_p12, %p1982_p11 }
  0x1f   :  { %p1985_p0 = pnand %p1984_p13, %p1978_p10 }
  0x21   :  { %1988 = shalt.err (!%p1985_p0)
}
  0x22   :  { %s2042_s7 = smov 512   ;;  %s2043_s8 = smov 32  }
  0x23   :  { %47 = dma.hbm_to_vmem [thread:$0]  %s3655_s2, 16384, %s42_s6, [#allocation6], %s2042_s7, %s2042_s7, %s2043_s8  }
  0x24   :  { %s2044_s11 = smov [#allocation8]  }
  0x25   :  { %s55_s12 = sshll.u32 %s2044_s11, 4  ;;  %s56_s12 = int_to_ptr.vmem [resolvable:$true] %s55_s12 }
  0x26   :  { %s1997_s0 = scalar_lea.vmem %s56_s12, 2048  ;;  %p2002_p2 = scmp.lt.s32.totalorder %s56_s12, %s56_s12 }
  0x27   :  { %p1998_p1 = scmp.ne.s32.totalorder %s56_s12, %s1997_s0  ;;  %p2003_p3 = scmp.lt.s32.totalorder %s1997_s0, %s1997_s0 }
  0x29   :  { %p2004_p4 = por %p2003_p3, %p2002_p2 }
  0x2b   :  { %p2005_p5 = pnand %p2004_p4, %p1998_p1 }
  0x2d   :  { %2008 = shalt.err (!%p2005_p5)
}
  0x2e   :  { %61 = dma.hbm_to_vmem [thread:$0]  %s3657_s4, 2048, %s56_s12, [#allocation9], %s2039_s26, %s2039_s26, %s2040_s27  }
  0x2f   :  { %2029 = dma.done.wait [#allocation3], 896  }
  0x30   :  { %2030 = vsyncadd [#allocation3], 4294966400 }
  0x31   :  { %2031 = dma.done.wait [#allocation6], 16512  }
  0x32   :  { %2032 = vsyncadd [#allocation6], 4294950784 }
  0x33   :  { %2033 = dma.done.wait [#allocation9], 2048  }
  0x34   :  { %2034 = vsyncadd [#allocation9], 4294965248  ;;  %v3659_v0 = vmov 0.0   ;;  %v2098_v1 = vld [vmem:[#allocation7 + $0x1e8] sm:$0xff]  ;;  %v2100_v2 = vld [vmem:[#allocation7 + $0x1e0] sm:$0xff]  ;;  %vm2046_vm0 = vmmov 0  }
  0x35   :  { %290 = vmatprep.mubr.f32.mxu0 %v3659_v0  ;;  %361 = vmatprep.mubr.f32.mxu1 %v3659_v0  ;;  %v2102_v3 = vld [vmem:[#allocation7 + $0x1c8] sm:$0xff]  ;;  %v2105_v4 = vld [vmem:[#allocation7 + $0x1c0] sm:$0xff]  ;;  %v2119_v9 = vld [vmem:[#allocation7 + $0x1f8] sm:$0xff] }
  0x36   :  { %226 = vmatprep.subr.mxu0 %v2098_v1  ;;  %v2108_v5 = vld [vmem:[#allocation7 + $0x1a8] sm:$0xff]  ;;  %v2111_v6 = vld [vmem:[#allocation7 + $0x1a0] sm:$0xff]  ;;  %297 = vmatprep.subr.mxu1 %v2119_v9  ;;  %v2125_v11 = vld [vmem:[#allocation7 + $0x1f0] sm:$0xff] }
  0x37   :  { %227 = vmatpush1.msra.mxu0 %v2100_v2  ;;  %v2114_v7 = vld [vmem:[#allocation7 + $0x188] sm:$0xff]  ;;  %v2117_v8 = vld [vmem:[#allocation7 + $0x180] sm:$0xff]  ;;  %298 = vmatpush1.msra.mxu1 %v2125_v11  ;;  %v2131_v13 = vld [vmem:[#allocation7 + $0x1d8] sm:$0xff] }
  0x38   :  { %228 = vmatprep.subr.mxu0 %v2102_v3  ;;  %v2122_v10 = vld [vmem:[#allocation7 + $0x168] sm:$0xff]  ;;  %v2128_v12 = vld [vmem:[#allocation7 + $0x160] sm:$0xff]  ;;  %v2133_v14 = vld [vmem:[#allocation7 + $0x1d0] sm:$0xff]  ;;  %299 = vmatprep.subr.mxu1 %v2131_v13 }
  0x39   :  { %229 = vmatpush1.msra.mxu0 %v2105_v4  ;;  %v2136_v15 = vld [vmem:[#allocation7 + $0x148] sm:$0xff]  ;;  %v2139_v16 = vld [vmem:[#allocation7 + $0x1b8] sm:$0xff]  ;;  %v2142_v17 = vld [vmem:[#allocation7 + $0x140] sm:$0xff]  ;;  %300 = vmatpush1.msra.mxu1 %v2133_v14 }
  0x3a   :  { %230 = vmatprep.subr.mxu0 %v2108_v5  ;;  %v2145_v18 = vld [vmem:[#allocation7 + $0x1b0] sm:$0xff]  ;;  %v2147_v19 = vld [vmem:[#allocation7 + $0x198] sm:$0xff]  ;;  %v2150_v20 = vld [vmem:[#allocation7 + $0x128] sm:$0xff]  ;;  %301 = vmatprep.subr.mxu1 %v2139_v16 }
  0x3b   :  { %231 = vmatpush1.msra.mxu0 %v2111_v6  ;;  %v2153_v21 = vld [vmem:[#allocation7 + $0x190] sm:$0xff]  ;;  %v2156_v22 = vld [vmem:[#allocation7 + $0x120] sm:$0xff]  ;;  %302 = vmatpush1.msra.mxu1 %v2145_v18  ;;  %v2159_v23 = vld [vmem:[#allocation7 + $0x178] sm:$0xff] }
  0x3c   :  { %232 = vmatprep.subr.mxu0 %v2114_v7  ;;  %v2162_v24 = vld [vmem:[#allocation7 + $0x108] sm:$0xff]  ;;  %303 = vmatprep.subr.mxu1 %v2147_v19  ;;  %v2165_v25 = vld [vmem:[#allocation7 + $0x170] sm:$0xff]  ;;  %v2168_v26 = vld [vmem:[#allocation7 + $0x100] sm:$0xff] }
  0x3d   :  { %233 = vmatpush1.msra.mxu0 %v2117_v8  ;;  %304 = vmatpush1.msra.mxu1 %v2153_v21  ;;  %v2171_v27 = vld [vmem:[#allocation7 + $0x158] sm:$0xff]  ;;  %v2174_v28 = vld [vmem:[#allocation7 + $0xe8] sm:$0xff]  ;;  %v2177_v29 = vld [vmem:[#allocation7 + $0x150] sm:$0xff] }
  0x3e   :  { %234 = vmatprep.subr.mxu0 %v2122_v10  ;;  %305 = vmatprep.subr.mxu1 %v2159_v23  ;;  %v2180_v30 = vld [vmem:[#allocation7 + $0xe0] sm:$0xff]  ;;  %v2183_v31 = vld [vmem:[#allocation7 + $0x138] sm:$0xff]  ;;  %v2186_v32 = vld [vmem:[#allocation7 + $0xc8] sm:$0xff] }
  0x3f   :  { %235 = vmatpush1.msra.mxu0 %v2128_v12  ;;  %306 = vmatpush1.msra.mxu1 %v2165_v25  ;;  %v2189_v33 = vld [vmem:[#allocation7 + $0x130] sm:$0xff]  ;;  %v2192_v34 = vld [vmem:[#allocation7 + $0xc0] sm:$0xff]  ;;  %v2195_v35 = vld [vmem:[#allocation7 + $0x118] sm:$0xff] }
  0x40   :  { %236 = vmatprep.subr.mxu0 %v2136_v15  ;;  %307 = vmatprep.subr.mxu1 %v2171_v27  ;;  %v2198_v36 = vld [vmem:[#allocation7 + $0xa8] sm:$0xff]  ;;  %v2201_v37 = vld [vmem:[#allocation7 + $0x110] sm:$0xff]  ;;  %v2204_v38 = vld [vmem:[#allocation7 + $0xa0] sm:$0xff] }
  0x41   :  { %237 = vmatpush1.msra.mxu0 %v2142_v17  ;;  %308 = vmatpush1.msra.mxu1 %v2177_v29  ;;  %v2207_v39 = vld [vmem:[#allocation7 + $0xf8] sm:$0xff]  ;;  %v2210_v40 = vld [vmem:[#allocation7 + $0x88] sm:$0xff]  ;;  %v2213_v41 = vld [vmem:[#allocation7 + $0xf0] sm:$0xff] }
  0x42   :  { %238 = vmatprep.subr.mxu0 %v2150_v20  ;;  %309 = vmatprep.subr.mxu1 %v2183_v31  ;;  %4051 = vst [vmem:[#allocation15_spill] sm:$0xff] %v2210_v40  ;;  %v2216_v42 = vld [vmem:[#allocation7 + $0x80] sm:$0xff]  ;;  %v2219_v43 = vld [vmem:[#allocation7 + $0xd8] sm:$0xff]  ;;  %v2222_v44 = vld [vmem:[#allocation7 + $0x68] sm:$0xff] }
  0x43   :  { %239 = vmatpush1.msra.mxu0 %v2156_v22  ;;  %310 = vmatpush1.msra.mxu1 %v2189_v33  ;;  %4052 = vst [vmem:[#allocation16_spill] sm:$0xff] %v2216_v42  ;;  %4053 = vst [vmem:[#allocation17_spill] sm:$0xff] %v2222_v44  ;;  %v2225_v45 = vld [vmem:[#allocation7 + $0xd0] sm:$0xff]  ;;  %v2228_v46 = vld [vmem:[#allocation7 + $0x60] sm:$0xff] }
  0x44   :  { %240 = vmatprep.subr.mxu0 %v2162_v24  ;;  %311 = vmatprep.subr.mxu1 %v2195_v35  ;;  %4054 = vst [vmem:[#allocation18_spill] sm:$0xff] %v2228_v46  ;;  %v2231_v47 = vld [vmem:[#allocation7 + $0xb8] sm:$0xff]  ;;  %v2234_v48 = vld [vmem:[#allocation7 + $0x48] sm:$0xff]  ;;  %v2237_v49 = vld [vmem:[#allocation7 + $0xb0] sm:$0xff] }
  0x45   :  { %241 = vmatpush1.msra.mxu0 %v2168_v26  ;;  %312 = vmatpush1.msra.mxu1 %v2201_v37  ;;  %4055 = vst [vmem:[#allocation19_spill] sm:$0xff] %v2234_v48  ;;  %4056 = vst [vmem:[#allocation20_spill] sm:$0xff] %v2237_v49  ;;  %v2240_v50 = vld [vmem:[#allocation7 + $0x40] sm:$0xff]  ;;  %v2243_v51 = vld [vmem:[#allocation7 + $0x98] sm:$0xff] }
  0x46   :  { %242 = vmatprep.subr.mxu0 %v2174_v28  ;;  %313 = vmatprep.subr.mxu1 %v2207_v39  ;;  %4057 = vst [vmem:[#allocation21_spill] sm:$0xff] %v2240_v50  ;;  %4058 = vst [vmem:[#allocation22_spill] sm:$0xff] %v2243_v51  ;;  %v2246_v52 = vld [vmem:[#allocation7 + $0x28] sm:$0xff]  ;;  %v2249_v53 = vld [vmem:[#allocation7 + $0x90] sm:$0xff] }
  0x47   :  { %243 = vmatpush1.msra.mxu0 %v2180_v30  ;;  %314 = vmatpush1.msra.mxu1 %v2213_v41  ;;  %4059 = vst [vmem:[#allocation23_spill] sm:$0xff] %v2246_v52  ;;  %4060 = vst [vmem:[#allocation24_spill] sm:$0xff] %v2249_v53  ;;  %v2252_v54 = vld [vmem:[#allocation7 + $0x20] sm:$0xff]  ;;  %v2255_v55 = vld [vmem:[#allocation7 + $0x78] sm:$0xff] }
  0x48   :  { %244 = vmatprep.subr.mxu0 %v2186_v32  ;;  %315 = vmatprep.subr.mxu1 %v2219_v43  ;;  %4061 = vst [vmem:[#allocation25_spill] sm:$0xff] %v2252_v54  ;;  %4062 = vst [vmem:[#allocation26_spill] sm:$0xff] %v2255_v55  ;;  %v2258_v56 = vld [vmem:[#allocation7 + $0x8] sm:$0xff]  ;;  %v2261_v57 = vld [vmem:[#allocation7 + $0x70] sm:$0xff] }
  0x49   :  { %245 = vmatpush1.msra.mxu0 %v2192_v34  ;;  %316 = vmatpush1.msra.mxu1 %v2225_v45  ;;  %4063 = vst [vmem:[#allocation27_spill] sm:$0xff] %v2258_v56  ;;  %4064 = vst [vmem:[#allocation28_spill] sm:$0xff] %v2261_v57  ;;  %v2264_v58 = vld [vmem:[#allocation7] sm:$0xff]  ;;  %v2267_v59 = vld [vmem:[#allocation7 + $0x58] sm:$0xff] }
  0x4a   :  { %246 = vmatprep.subr.mxu0 %v2198_v36  ;;  %317 = vmatprep.subr.mxu1 %v2231_v47  ;;  %4065 = vst [vmem:[#allocation29_spill] sm:$0xff] %v2264_v58  ;;  %4066 = vst [vmem:[#allocation30_spill] sm:$0xff] %v2267_v59  ;;  %v2270_v60 = vld [vmem:[#allocation7 + $0x3e8] sm:$0xff]  ;;  %v2273_v61 = vld [vmem:[#allocation7 + $0x50] sm:$0xff] }
  0x4b   :  { %247 = vmatpush1.msra.mxu0 %v2204_v38  ;;  %318 = vmatpush1.msra.mxu1 %v2237_v49  ;;  %4067 = vst [vmem:[#allocation31_spill] sm:$0xff] %v2270_v60  ;;  %4068 = vst [vmem:[#allocation32_spill] sm:$0xff] %v2273_v61  ;;  %v2276_v62 = vld [vmem:[#allocation7 + $0x3e0] sm:$0xff]  ;;  %v2279_v63 = vld [vmem:[#allocation7 + $0x38] sm:$0xff] }
  0x4c   :  { %248 = vmatprep.subr.mxu0 %v2210_v40  ;;  %319 = vmatprep.subr.mxu1 %v2243_v51  ;;  %4069 = vst [vmem:[#allocation33_spill] sm:$0xff] %v2276_v62  ;;  %4070 = vst [vmem:[#allocation34_spill] sm:$0xff] %v2279_v63  ;;  %v2282_v0 = vld [vmem:[#allocation7 + $0x3c8] sm:$0xff] }
  0x4d   :  { %249 = vmatpush1.msra.mxu0 %v2216_v42  ;;  %320 = vmatpush1.msra.mxu1 %v2249_v53  ;;  %4071 = vst [vmem:[#allocation35_spill] sm:$0xff] %v2282_v0 }
  0x4e   :  { %250 = vmatprep.subr.mxu0 %v2222_v44  ;;  %321 = vmatprep.subr.mxu1 %v2255_v55  ;;  %v2288_v55 = vld [vmem:[#allocation7 + $0x3c0] sm:$0xff] }
  0x4f   :  { %251 = vmatpush1.msra.mxu0 %v2228_v46  ;;  %322 = vmatpush1.msra.mxu1 %v2261_v57  ;;  %4073 = vst [vmem:[#allocation37_spill] sm:$0xff] %v2288_v55  ;;  %v2294_v57 = vld [vmem:[#allocation7 + $0x3a8] sm:$0xff] }
  0x50   :  { %252 = vmatprep.subr.mxu0 %v2234_v48  ;;  %323 = vmatprep.subr.mxu1 %v2267_v59  ;;  %4075 = vst [vmem:[#allocation39_spill] sm:$0xff] %v2294_v57  ;;  %v2300_v59 = vld [vmem:[#allocation7 + $0x3a0] sm:$0xff] }
  0x51   :  { %253 = vmatpush1.msra.mxu0 %v2240_v50  ;;  %324 = vmatpush1.msra.mxu1 %v2273_v61  ;;  %4077 = vst [vmem:[#allocation41_spill] sm:$0xff] %v2300_v59  ;;  %v2306_v61 = vld [vmem:[#allocation7 + $0x388] sm:$0xff] }
  0x52   :  { %254 = vmatprep.subr.mxu0 %v2246_v52  ;;  %325 = vmatprep.subr.mxu1 %v2279_v63  ;;  %4079 = vst [vmem:[#allocation43_spill] sm:$0xff] %v2306_v61  ;;  %v2312_v63 = vld [vmem:[#allocation7 + $0x380] sm:$0xff] }
  0x53   :  { %255 = vmatpush1.msra.mxu0 %v2252_v54  ;;  %v2285_v54 = vld [vmem:[#allocation7 + $0x30] sm:$0xff]  ;;  %4081 = vst [vmem:[#allocation45_spill] sm:$0xff] %v2312_v63 }
  0x54   :  { %256 = vmatprep.subr.mxu0 %v2258_v56  ;;  %4072 = vst [vmem:[#allocation36_spill] sm:$0xff] %v2285_v54  ;;  %v2291_v56 = vld [vmem:[#allocation7 + $0x18] sm:$0xff]  ;;  %326 = vmatpush1.msra.mxu1 %v2285_v54  ;;  %v2318_v54 = vld [vmem:[#allocation7 + $0x368] sm:$0xff] }
  0x55   :  { %257 = vmatpush1.msra.mxu0 %v2264_v58  ;;  %4074 = vst [vmem:[#allocation38_spill] sm:$0xff] %v2291_v56  ;;  %v2297_v58 = vld [vmem:[#allocation7 + $0x10] sm:$0xff]  ;;  %327 = vmatprep.subr.mxu1 %v2291_v56  ;;  %4083 = vst [vmem:[#allocation47_spill] sm:$0xff] %v2318_v54  ;;  %v2324_v56 = vld [vmem:[#allocation7 + $0x360] sm:$0xff] }
  0x56   :  { %258 = vmatprep.subr.mxu0 %v2270_v60  ;;  %4076 = vst [vmem:[#allocation40_spill] sm:$0xff] %v2297_v58  ;;  %v2303_v60 = vld [vmem:[#allocation7 + $0x3f8] sm:$0xff]  ;;  %328 = vmatpush1.msra.mxu1 %v2297_v58  ;;  %4085 = vst [vmem:[#allocation49_spill] sm:$0xff] %v2324_v56  ;;  %v2330_v58 = vld [vmem:[#allocation7 + $0x348] sm:$0xff] }
  0x57   :  { %259 = vmatpush2.msra.mxu0 %v2276_v62  ;;  %4078 = vst [vmem:[#allocation42_spill] sm:$0xff] %v2303_v60  ;;  %v2309_v62 = vld [vmem:[#allocation7 + $0x3f0] sm:$0xff]  ;;  %329 = vmatprep.subr.mxu1 %v2303_v60  ;;  %4087 = vst [vmem:[#allocation51_spill] sm:$0xff] %v2330_v58  ;;  %v2336_v60 = vld [vmem:[#allocation7 + $0x340] sm:$0xff] }
  0x58   :  { %260 = vmatprep.subr.mxu0 %v2282_v0  ;;  %4080 = vst [vmem:[#allocation44_spill] sm:$0xff] %v2309_v62  ;;  %v2315_v0 = vld [vmem:[#allocation7 + $0x3d8] sm:$0xff]  ;;  %330 = vmatpush2.msra.mxu1 %v2309_v62  ;;  %4089 = vst [vmem:[#allocation53_spill] sm:$0xff] %v2336_v60  ;;  %v2342_v62 = vld [vmem:[#allocation7 + $0x328] sm:$0xff] }
  0x59   :  { %261 = vmatpush2.msra.mxu0 %v2288_v55  ;;  %4082 = vst [vmem:[#allocation46_spill] sm:$0xff] %v2315_v0  ;;  %v2321_v55 = vld [vmem:[#allocation7 + $0x3d0] sm:$0xff]  ;;  %331 = vmatprep.subr.mxu1 %v2315_v0  ;;  %4091 = vst [vmem:[#allocation55_spill] sm:$0xff] %v2342_v62  ;;  %v2348_v0 = vld [vmem:[#allocation7 + $0x320] sm:$0xff] }
  0x5a   :  { %262 = vmatprep.subr.mxu0 %v2294_v57  ;;  %4084 = vst [vmem:[#allocation48_spill] sm:$0xff] %v2321_v55  ;;  %v2327_v57 = vld [vmem:[#allocation7 + $0x3b8] sm:$0xff]  ;;  %332 = vmatpush2.msra.mxu1 %v2321_v55  ;;  %4093 = vst [vmem:[#allocation57_spill] sm:$0xff] %v2348_v0  ;;  %v2354_v55 = vld [vmem:[#allocation7 + $0x308] sm:$0xff] }
  0x5b   :  { %263 = vmatpush2.msra.mxu0 %v2300_v59  ;;  %4086 = vst [vmem:[#allocation50_spill] sm:$0xff] %v2327_v57  ;;  %v2333_v59 = vld [vmem:[#allocation7 + $0x3b0] sm:$0xff]  ;;  %333 = vmatprep.subr.mxu1 %v2327_v57  ;;  %4095 = vst [vmem:[#allocation59_spill] sm:$0xff] %v2354_v55  ;;  %v2360_v57 = vld [vmem:[#allocation7 + $0x300] sm:$0xff] }
  0x5c   :  { %264 = vmatprep.subr.mxu0 %v2306_v61  ;;  %4088 = vst [vmem:[#allocation52_spill] sm:$0xff] %v2333_v59  ;;  %v2339_v61 = vld [vmem:[#allocation7 + $0x398] sm:$0xff]  ;;  %334 = vmatpush2.msra.mxu1 %v2333_v59  ;;  %4097 = vst [vmem:[#allocation61_spill] sm:$0xff] %v2360_v57  ;;  %v2366_v59 = vld [vmem:[#allocation7 + $0x2e8] sm:$0xff] }
  0x5d   :  { %265 = vmatpush2.msra.mxu0 %v2312_v63  ;;  %4090 = vst [vmem:[#allocation54_spill] sm:$0xff] %v2339_v61  ;;  %v2345_v63 = vld [vmem:[#allocation7 + $0x390] sm:$0xff]  ;;  %335 = vmatprep.subr.mxu1 %v2339_v61  ;;  %4099 = vst [vmem:[#allocation63_spill] sm:$0xff] %v2366_v59  ;;  %v2372_v61 = vld [vmem:[#allocation7 + $0x2e0] sm:$0xff] }
  0x5e   :  { %266 = vmatprep.subr.mxu0 %v2318_v54  ;;  %4092 = vst [vmem:[#allocation56_spill] sm:$0xff] %v2345_v63  ;;  %v2351_v54 = vld [vmem:[#allocation7 + $0x378] sm:$0xff]  ;;  %336 = vmatpush2.msra.mxu1 %v2345_v63  ;;  %4101 = vst [vmem:[#allocation65_spill] sm:$0xff] %v2372_v61  ;;  %v2378_v63 = vld [vmem:[#allocation7 + $0x2c8] sm:$0xff] }
  0x5f   :  { %267 = vmatpush2.msra.mxu0 %v2324_v56  ;;  %4094 = vst [vmem:[#allocation58_spill] sm:$0xff] %v2351_v54  ;;  %v2357_v56 = vld [vmem:[#allocation7 + $0x370] sm:$0xff]  ;;  %337 = vmatprep.subr.mxu1 %v2351_v54  ;;  %4103 = vst [vmem:[#allocation67_spill] sm:$0xff] %v2378_v63  ;;  %v2384_v54 = vld [vmem:[#allocation7 + $0x2c0] sm:$0xff] }
  0x60   :  { %268 = vmatprep.subr.mxu0 %v2330_v58  ;;  %4096 = vst [vmem:[#allocation60_spill] sm:$0xff] %v2357_v56  ;;  %v2363_v58 = vld [vmem:[#allocation7 + $0x358] sm:$0xff]  ;;  %338 = vmatpush2.msra.mxu1 %v2357_v56  ;;  %4105 = vst [vmem:[#allocation69_spill] sm:$0xff] %v2384_v54  ;;  %v2390_v56 = vld [vmem:[#allocation7 + $0x2a8] sm:$0xff] }
  0x61   :  { %269 = vmatpush2.msra.mxu0 %v2336_v60  ;;  %4098 = vst [vmem:[#allocation62_spill] sm:$0xff] %v2363_v58  ;;  %v2369_v60 = vld [vmem:[#allocation7 + $0x350] sm:$0xff]  ;;  %339 = vmatprep.subr.mxu1 %v2363_v58  ;;  %4107 = vst [vmem:[#allocation71_spill] sm:$0xff] %v2390_v56  ;;  %v2396_v58 = vld [vmem:[#allocation7 + $0x2a0] sm:$0xff] }
  0x62   :  { %270 = vmatprep.subr.mxu0 %v2342_v62  ;;  %4100 = vst [vmem:[#allocation64_spill] sm:$0xff] %v2369_v60  ;;  %v2375_v62 = vld [vmem:[#allocation7 + $0x338] sm:$0xff]  ;;  %340 = vmatpush2.msra.mxu1 %v2369_v60  ;;  %4109 = vst [vmem:[#allocation73_spill] sm:$0xff] %v2396_v58  ;;  %v2402_v60 = vld [vmem:[#allocation7 + $0x288] sm:$0xff] }
  0x63   :  { %271 = vmatpush2.msra.mxu0 %v2348_v0  ;;  %4102 = vst [vmem:[#allocation66_spill] sm:$0xff] %v2375_v62  ;;  %v2381_v0 = vld [vmem:[#allocation7 + $0x330] sm:$0xff]  ;;  %341 = vmatprep.subr.mxu1 %v2375_v62  ;;  %4111 = vst [vmem:[#allocation75_spill] sm:$0xff] %v2402_v60  ;;  %v2408_v62 = vld [vmem:[#allocation7 + $0x280] sm:$0xff] }
  0x64   :  { %272 = vmatprep.subr.mxu0 %v2354_v55  ;;  %4104 = vst [vmem:[#allocation68_spill] sm:$0xff] %v2381_v0  ;;  %v2387_v55 = vld [vmem:[#allocation7 + $0x318] sm:$0xff]  ;;  %342 = vmatpush2.msra.mxu1 %v2381_v0  ;;  %4113 = vst [vmem:[#allocation77_spill] sm:$0xff] %v2408_v62  ;;  %v2414_v0 = vld [vmem:[#allocation7 + $0x268] sm:$0xff] }
  0x65   :  { %273 = vmatpush2.msra.mxu0 %v2360_v57  ;;  %4106 = vst [vmem:[#allocation70_spill] sm:$0xff] %v2387_v55  ;;  %v2393_v57 = vld [vmem:[#allocation7 + $0x310] sm:$0xff]  ;;  %343 = vmatprep.subr.mxu1 %v2387_v55  ;;  %4115 = vst [vmem:[#allocation79_spill] sm:$0xff] %v2414_v0  ;;  %v2420_v55 = vld [vmem:[#allocation7 + $0x260] sm:$0xff] }
  0x66   :  { %274 = vmatprep.subr.mxu0 %v2366_v59  ;;  %4108 = vst [vmem:[#allocation72_spill] sm:$0xff] %v2393_v57  ;;  %v2399_v59 = vld [vmem:[#allocation7 + $0x2f8] sm:$0xff]  ;;  %344 = vmatpush2.msra.mxu1 %v2393_v57  ;;  %4117 = vst [vmem:[#allocation81_spill] sm:$0xff] %v2420_v55  ;;  %v2426_v57 = vld [vmem:[#allocation7 + $0x248] sm:$0xff] }
  0x67   :  { %275 = vmatpush2.msra.mxu0 %v2372_v61  ;;  %4110 = vst [vmem:[#allocation74_spill] sm:$0xff] %v2399_v59  ;;  %v2405_v61 = vld [vmem:[#allocation7 + $0x2f0] sm:$0xff]  ;;  %345 = vmatprep.subr.mxu1 %v2399_v59  ;;  %4119 = vst [vmem:[#allocation83_spill] sm:$0xff] %v2426_v57  ;;  %v2432_v59 = vld [vmem:[#allocation7 + $0x240] sm:$0xff] }
  0x68   :  { %276 = vmatprep.subr.mxu0 %v2378_v63  ;;  %4112 = vst [vmem:[#allocation76_spill] sm:$0xff] %v2405_v61  ;;  %v2411_v63 = vld [vmem:[#allocation7 + $0x2d8] sm:$0xff]  ;;  %346 = vmatpush2.msra.mxu1 %v2405_v61  ;;  %4121 = vst [vmem:[#allocation85_spill] sm:$0xff] %v2432_v59  ;;  %v2438_v61 = vld [vmem:[#allocation7 + $0x228] sm:$0xff] }
  0x69   :  { %277 = vmatpush2.msra.mxu0 %v2384_v54  ;;  %4114 = vst [vmem:[#allocation78_spill] sm:$0xff] %v2411_v63  ;;  %v2417_v54 = vld [vmem:[#allocation7 + $0x2d0] sm:$0xff]  ;;  %347 = vmatprep.subr.mxu1 %v2411_v63  ;;  %4123 = vst [vmem:[#allocation87_spill] sm:$0xff] %v2438_v61  ;;  %v2444_v63 = vld [vmem:[#allocation7 + $0x220] sm:$0xff] }
  0x6a   :  { %278 = vmatprep.subr.mxu0 %v2390_v56  ;;  %4116 = vst [vmem:[#allocation80_spill] sm:$0xff] %v2417_v54  ;;  %v2423_v56 = vld [vmem:[#allocation7 + $0x2b8] sm:$0xff]  ;;  %348 = vmatpush2.msra.mxu1 %v2417_v54  ;;  %4125 = vst [vmem:[#allocation89_spill] sm:$0xff] %v2444_v63  ;;  %v2450_v54 = vld [vmem:[#allocation7 + $0x208] sm:$0xff] }
  0x6b   :  { %279 = vmatpush2.msra.mxu0 %v2396_v58  ;;  %4118 = vst [vmem:[#allocation82_spill] sm:$0xff] %v2423_v56  ;;  %v2429_v58 = vld [vmem:[#allocation7 + $0x2b0] sm:$0xff]  ;;  %349 = vmatprep.subr.mxu1 %v2423_v56  ;;  %4127 = vst [vmem:[#allocation91_spill] sm:$0xff] %v2450_v54  ;;  %v2456_v56 = vld [vmem:[#allocation7 + $0x200] sm:$0xff] }
  0x6c   :  { %280 = vmatprep.subr.mxu0 %v2402_v60  ;;  %4120 = vst [vmem:[#allocation84_spill] sm:$0xff] %v2429_v58  ;;  %v2435_v60 = vld [vmem:[#allocation7 + $0x298] sm:$0xff]  ;;  %350 = vmatpush2.msra.mxu1 %v2429_v58  ;;  %4129 = vst [vmem:[#allocation93_spill] sm:$0xff] %v2456_v56  ;;  %v76_v58 = vld [vmem:[#allocation2] sm:$0xff] }
  0x6d   :  { %281 = vmatpush2.msra.mxu0 %v2408_v62  ;;  %4122 = vst [vmem:[#allocation86_spill] sm:$0xff] %v2435_v60  ;;  %v2441_v62 = vld [vmem:[#allocation7 + $0x290] sm:$0xff]  ;;  %351 = vmatprep.subr.mxu1 %v2435_v60  ;;  %v2467_v60 = vld [vmem:[#allocation7 + $0x238] sm:$0xff] }
  0x6e   :  { %282 = vmatprep.subr.mxu0 %v2414_v0  ;;  %4124 = vst [vmem:[#allocation88_spill] sm:$0xff] %v2441_v62  ;;  %v2447_v0 = vld [vmem:[#allocation7 + $0x278] sm:$0xff]  ;;  %352 = vmatpush2.msra.mxu1 %v2441_v62  ;;  %4132 = vst [vmem:[#allocation96_spill] sm:$0xff] %v2467_v60  ;;  %v2471_v62 = vld [vmem:[#allocation7 + $0x230] sm:$0xff] }
  0x6f   :  { %283 = vmatpush2.msra.mxu0 %v2420_v55  ;;  %4126 = vst [vmem:[#allocation90_spill] sm:$0xff] %v2447_v0  ;;  %v2453_v55 = vld [vmem:[#allocation7 + $0x270] sm:$0xff]  ;;  %353 = vmatprep.subr.mxu1 %v2447_v0  ;;  %4133 = vst [vmem:[#allocation97_spill] sm:$0xff] %v2471_v62 }
  0x70   :  { %284 = vmatprep.subr.mxu0 %v2426_v57  ;;  %4128 = vst [vmem:[#allocation92_spill] sm:$0xff] %v2453_v55  ;;  %v2459_v57 = vld [vmem:[#allocation7 + $0x258] sm:$0xff]  ;;  %354 = vmatpush2.msra.mxu1 %v2453_v55  ;;  %v2477_v0 = vld [vmem:[#allocation7 + $0x210] sm:$0xff] }
  0x71   :  { %285 = vmatpush2.msra.mxu0 %v2432_v59  ;;  %4130 = vst [vmem:[#allocation94_spill] sm:$0xff] %v2459_v57  ;;  %v2463_v59 = vld [vmem:[#allocation7 + $0x250] sm:$0xff]  ;;  %355 = vmatprep.subr.mxu1 %v2459_v57  ;;  %4135 = vst [vmem:[#allocation99_spill] sm:$0xff] %v2477_v0 }
  0x72   :  { %286 = vmatprep.subr.mxu0 %v2438_v61  ;;  %4131 = vst [vmem:[#allocation95_spill] sm:$0xff] %v2463_v59  ;;  %356 = vmatpush2.msra.mxu1 %v2463_v59 }
  0x73   :  { %287 = vmatpush2.msra.mxu0 %v2444_v63  ;;  %v2474_v63 = vld [vmem:[#allocation7 + $0x218] sm:$0xff]  ;;  %357 = vmatprep.subr.mxu1 %v2467_v60 }
  0x74   :  { %288 = vmatprep.subr.mxu0 %v2450_v54  ;;  %4134 = vst [vmem:[#allocation98_spill] sm:$0xff] %v2474_v63  ;;  %358 = vmatpush2.msra.mxu1 %v2471_v62 }
  0x75   :  { %289 = vmatpush2.msra.mxu0 %v2456_v56  ;;  %359 = vmatprep.subr.mxu1 %v2474_v63 }
  0x76   :  { %291 = vmatmul.mubr.f32.vlgmr.msra.gmra.mxu0 %v76_v58  ;;  %395 = vmatprep.subr.mxu0 %v2098_v1 }
  0x77   :  { %396 = vmatpush1.msra.mxu0 %v2100_v2  ;;  %360 = vmatpush2.msra.mxu1 %v2477_v0 }
  0x78   :  { %397 = vmatprep.subr.mxu0 %v2102_v3  ;;  %362 = vmatmul.mubr.f32.vlgmr.msra.gmra.mxu1 %v76_v58  ;;  %v4136_v58 = vld [vmem:[#allocation25_spill] sm:$0xff] }
  0x79   :  { %398 = vmatpush1.msra.mxu0 %v2105_v4  ;;  %466 = vmatprep.subr.mxu1 %v2119_v9 }
  0x7a   :  { %399 = vmatprep.subr.mxu0 %v2108_v5  ;;  %467 = vmatpush1.msra.mxu1 %v2125_v11 }
  0x7b   :  { %400 = vmatpush1.msra.mxu0 %v2111_v6  ;;  %468 = vmatprep.subr.mxu1 %v2131_v13 }
  0x7c   :  { %401 = vmatprep.subr.mxu0 %v2114_v7  ;;  %469 = vmatpush1.msra.mxu1 %v2133_v14 }
  0x7d   :  { %402 = vmatpush1.msra.mxu0 %v2117_v8  ;;  %470 = vmatprep.subr.mxu1 %v2139_v16 }
  0x7e   :  { %403 = vmatprep.subr.mxu0 %v2122_v10  ;;  %471 = vmatpush1.msra.mxu1 %v2145_v18 }
  0x7f   :  { %404 = vmatpush1.msra.mxu0 %v2128_v12  ;;  %472 = vmatprep.subr.mxu1 %v2147_v19 }
  0x80   :  { %405 = vmatprep.subr.mxu0 %v2136_v15  ;;  %473 = vmatpush1.msra.mxu1 %v2153_v21 }
  0x81   :  { %406 = vmatpush1.msra.mxu0 %v2142_v17  ;;  %474 = vmatprep.subr.mxu1 %v2159_v23 }
  0x82   :  { %407 = vmatprep.subr.mxu0 %v2150_v20  ;;  %475 = vmatpush1.msra.mxu1 %v2165_v25 }
  0x83   :  { %408 = vmatpush1.msra.mxu0 %v2156_v22  ;;  %476 = vmatprep.subr.mxu1 %v2171_v27 }
  0x84   :  { %409 = vmatprep.subr.mxu0 %v2162_v24  ;;  %477 = vmatpush1.msra.mxu1 %v2177_v29 }
  0x85   :  { %410 = vmatpush1.msra.mxu0 %v2168_v26  ;;  %478 = vmatprep.subr.mxu1 %v2183_v31 }
  0x86   :  { %411 = vmatprep.subr.mxu0 %v2174_v28  ;;  %479 = vmatpush1.msra.mxu1 %v2189_v33 }
  0x87   :  { %412 = vmatpush1.msra.mxu0 %v2180_v30  ;;  %480 = vmatprep.subr.mxu1 %v2195_v35 }
  0x88   :  { %413 = vmatprep.subr.mxu0 %v2186_v32  ;;  %481 = vmatpush1.msra.mxu1 %v2201_v37 }
  0x89   :  { %414 = vmatpush1.msra.mxu0 %v2192_v34  ;;  %482 = vmatprep.subr.mxu1 %v2207_v39 }
  0x8a   :  { %415 = vmatprep.subr.mxu0 %v2198_v36  ;;  %483 = vmatpush1.msra.mxu1 %v2213_v41 }
  0x8b   :  { %416 = vmatpush1.msra.mxu0 %v2204_v38  ;;  %484 = vmatprep.subr.mxu1 %v2219_v43 }
  0x8c   :  { %417 = vmatprep.subr.mxu0 %v2210_v40  ;;  %485 = vmatpush1.msra.mxu1 %v2225_v45  ;;  %v4140_v40 = vld [vmem:[#allocation29_spill] sm:$0xff] }
  0x8d   :  { %418 = vmatpush1.msra.mxu0 %v2216_v42  ;;  %486 = vmatprep.subr.mxu1 %v2231_v47  ;;  %v4138_v42 = vld [vmem:[#allocation27_spill] sm:$0xff] }
  0x8e   :  { %419 = vmatprep.subr.mxu0 %v2222_v44  ;;  %487 = vmatpush1.msra.mxu1 %v2237_v49  ;;  %v4137_v44 = vld [vmem:[#allocation26_spill] sm:$0xff]  ;;  %v4142_v49 = vld [vmem:[#allocation31_spill] sm:$0xff] }
  0x8f   :  { %420 = vmatpush1.msra.mxu0 %v2228_v46  ;;  %488 = vmatprep.subr.mxu1 %v2243_v51  ;;  %v4139_v46 = vld [vmem:[#allocation28_spill] sm:$0xff]  ;;  %v4144_v51 = vld [vmem:[#allocation33_spill] sm:$0xff] }
  0x90   :  { %421 = vmatprep.subr.mxu0 %v2234_v48  ;;  %489 = vmatpush1.msra.mxu1 %v2249_v53  ;;  %v4141_v48 = vld [vmem:[#allocation30_spill] sm:$0xff]  ;;  %v4146_v53 = vld [vmem:[#allocation35_spill] sm:$0xff] }
  0x91   :  { %422 = vmatpush1.msra.mxu0 %v2240_v50  ;;  %490 = vmatprep.subr.mxu1 %v4137_v44  ;;  %v4143_v50 = vld [vmem:[#allocation32_spill] sm:$0xff]  ;;  %v4148_v44 = vld [vmem:[#allocation37_spill] sm:$0xff] }
  0x92   :  { %423 = vmatprep.subr.mxu0 %v2246_v52  ;;  %491 = vmatpush1.msra.mxu1 %v4139_v46  ;;  %v4145_v52 = vld [vmem:[#allocation34_spill] sm:$0xff]  ;;  %v4150_v46 = vld [vmem:[#allocation39_spill] sm:$0xff] }
  0x93   :  { %424 = vmatpush1.msra.mxu0 %v4136_v58  ;;  %492 = vmatprep.subr.mxu1 %v4141_v48  ;;  %v4147_v58 = vld [vmem:[#allocation36_spill] sm:$0xff]  ;;  %v4152_v48 = vld [vmem:[#allocation41_spill] sm:$0xff] }
  0x94   :  { %425 = vmatprep.subr.mxu0 %v4138_v42  ;;  %493 = vmatpush1.msra.mxu1 %v4143_v50  ;;  %v4149_v42 = vld [vmem:[#allocation38_spill] sm:$0xff]  ;;  %v4154_v50 = vld [vmem:[#allocation43_spill] sm:$0xff] }
  0x95   :  { %426 = vmatpush1.msra.mxu0 %v4140_v40  ;;  %494 = vmatprep.subr.mxu1 %v4145_v52  ;;  %v4151_v40 = vld [vmem:[#allocation40_spill] sm:$0xff]  ;;  %v4156_v52 = vld [vmem:[#allocation45_spill] sm:$0xff] }
  0x96   :  { %427 = vmatprep.subr.mxu0 %v4142_v49  ;;  %495 = vmatpush1.msra.mxu1 %v4147_v58  ;;  %v4153_v49 = vld [vmem:[#allocation42_spill] sm:$0xff]  ;;  %v4158_v58 = vld [vmem:[#allocation47_spill] sm:$0xff] }
  0x97   :  { %428 = vmatpush2.msra.mxu0 %v4144_v51  ;;  %496 = vmatprep.subr.mxu1 %v4149_v42  ;;  %v4155_v51 = vld [vmem:[#allocation44_spill] sm:$0xff]  ;;  %v4160_v42 = vld [vmem:[#allocation49_spill] sm:$0xff] }
  0x98   :  { %429 = vmatprep.subr.mxu0 %v4146_v53  ;;  %497 = vmatpush1.msra.mxu1 %v4151_v40  ;;  %v4157_v53 = vld [vmem:[#allocation46_spill] sm:$0xff]  ;;  %v4162_v40 = vld [vmem:[#allocation51_spill] sm:$0xff] }
  0x99   :  { %430 = vmatpush2.msra.mxu0 %v4148_v44  ;;  %498 = vmatprep.subr.mxu1 %v4153_v49  ;;  %v4159_v44 = vld [vmem:[#allocation48_spill] sm:$0xff]  ;;  %v4164_v49 = vld [vmem:[#allocation53_spill] sm:$0xff] }
  0x9a   :  { %431 = vmatprep.subr.mxu0 %v4150_v46  ;;  %499 = vmatpush2.msra.mxu1 %v4155_v51  ;;  %v4161_v46 = vld [vmem:[#allocation50_spill] sm:$0xff]  ;;  %v4166_v51 = vld [vmem:[#allocation55_spill] sm:$0xff] }
  0x9b   :  { %432 = vmatpush2.msra.mxu0 %v4152_v48  ;;  %500 = vmatprep.subr.mxu1 %v4157_v53  ;;  %v4163_v48 = vld [vmem:[#allocation52_spill] sm:$0xff]  ;;  %v4168_v53 = vld [vmem:[#allocation57_spill] sm:$0xff] }
  0x9c   :  { %433 = vmatprep.subr.mxu0 %v4154_v50  ;;  %501 = vmatpush2.msra.mxu1 %v4159_v44  ;;  %v4165_v50 = vld [vmem:[#allocation54_spill] sm:$0xff]  ;;  %v4170_v44 = vld [vmem:[#allocation59_spill] sm:$0xff] }
  0x9d   :  { %434 = vmatpush2.msra.mxu0 %v4156_v52  ;;  %502 = vmatprep.subr.mxu1 %v4161_v46  ;;  %v4167_v52 = vld [vmem:[#allocation56_spill] sm:$0xff]  ;;  %v4172_v46 = vld [vmem:[#allocation61_spill] sm:$0xff] }
  0x9e   :  { %435 = vmatprep.subr.mxu0 %v4158_v58  ;;  %503 = vmatpush2.msra.mxu1 %v4163_v48  ;;  %v4169_v58 = vld [vmem:[#allocation58_spill] sm:$0xff]  ;;  %v4174_v48 = vld [vmem:[#allocation63_spill] sm:$0xff] }
  0x9f   :  { %436 = vmatpush2.msra.mxu0 %v4160_v42  ;;  %504 = vmatprep.subr.mxu1 %v4165_v50  ;;  %v4171_v42 = vld [vmem:[#allocation60_spill] sm:$0xff]  ;;  %v4176_v50 = vld [vmem:[#allocation65_spill] sm:$0xff] }
  0xa0   :  { %437 = vmatprep.subr.mxu0 %v4162_v40  ;;  %505 = vmatpush2.msra.mxu1 %v4167_v52  ;;  %v4173_v40 = vld [vmem:[#allocation62_spill] sm:$0xff]  ;;  %v4178_v52 = vld [vmem:[#allocation67_spill] sm:$0xff] }
  0xa1   :  { %438 = vmatpush2.msra.mxu0 %v4164_v49  ;;  %506 = vmatprep.subr.mxu1 %v4169_v58  ;;  %v4175_v49 = vld [vmem:[#allocation64_spill] sm:$0xff]  ;;  %v4180_v58 = vld [vmem:[#allocation69_spill] sm:$0xff] }
  0xa2   :  { %439 = vmatprep.subr.mxu0 %v4166_v51  ;;  %507 = vmatpush2.msra.mxu1 %v4171_v42  ;;  %v4177_v51 = vld [vmem:[#allocation66_spill] sm:$0xff]  ;;  %v4182_v42 = vld [vmem:[#allocation71_spill] sm:$0xff] }
  0xa3   :  { %440 = vmatpush2.msra.mxu0 %v4168_v53  ;;  %508 = vmatprep.subr.mxu1 %v4173_v40  ;;  %v4179_v53 = vld [vmem:[#allocation68_spill] sm:$0xff]  ;;  %v4184_v40 = vld [vmem:[#allocation73_spill] sm:$0xff] }
  0xa4   :  { %441 = vmatprep.subr.mxu0 %v4170_v44  ;;  %509 = vmatpush2.msra.mxu1 %v4175_v49  ;;  %v4181_v44 = vld [vmem:[#allocation70_spill] sm:$0xff]  ;;  %v4186_v49 = vld [vmem:[#allocation75_spill] sm:$0xff] }
  0xa5   :  { %442 = vmatpush2.msra.mxu0 %v4172_v46  ;;  %510 = vmatprep.subr.mxu1 %v4177_v51  ;;  %v4183_v46 = vld [vmem:[#allocation72_spill] sm:$0xff]  ;;  %v4188_v51 = vld [vmem:[#allocation77_spill] sm:$0xff] }
  0xa6   :  { %443 = vmatprep.subr.mxu0 %v4174_v48  ;;  %511 = vmatpush2.msra.mxu1 %v4179_v53  ;;  %v4185_v48 = vld [vmem:[#allocation74_spill] sm:$0xff]  ;;  %v4190_v53 = vld [vmem:[#allocation79_spill] sm:$0xff] }
  0xa7   :  { %444 = vmatpush2.msra.mxu0 %v4176_v50  ;;  %512 = vmatprep.subr.mxu1 %v4181_v44  ;;  %v4187_v50 = vld [vmem:[#allocation76_spill] sm:$0xff]  ;;  %v4192_v44 = vld [vmem:[#allocation81_spill] sm:$0xff] }
  0xa8   :  { %445 = vmatprep.subr.mxu0 %v4178_v52  ;;  %513 = vmatpush2.msra.mxu1 %v4183_v46  ;;  %v4189_v52 = vld [vmem:[#allocation78_spill] sm:$0xff]  ;;  %v4194_v46 = vld [vmem:[#allocation83_spill] sm:$0xff] }
  0xa9   :  { %446 = vmatpush2.msra.mxu0 %v4180_v58  ;;  %514 = vmatprep.subr.mxu1 %v4185_v48  ;;  %v4191_v58 = vld [vmem:[#allocation80_spill] sm:$0xff]  ;;  %v4196_v48 = vld [vmem:[#allocation85_spill] sm:$0xff] }
  0xaa   :  { %447 = vmatprep.subr.mxu0 %v4182_v42  ;;  %515 = vmatpush2.msra.mxu1 %v4187_v50  ;;  %v4193_v42 = vld [vmem:[#allocation82_spill] sm:$0xff] }
  0xab   :  { %448 = vmatpush2.msra.mxu0 %v4184_v40  ;;  %516 = vmatprep.subr.mxu1 %v4189_v52  ;;  %v4195_v40 = vld [vmem:[#allocation84_spill] sm:$0xff]  ;;  %v4199_v52 = vld [vmem:[#allocation89_spill] sm:$0xff] }
  0xac   :  { %449 = vmatprep.subr.mxu0 %v4186_v49  ;;  %517 = vmatpush2.msra.mxu1 %v4191_v58  ;;  %v4197_v49 = vld [vmem:[#allocation86_spill] sm:$0xff] }
  0xad   :  { %450 = vmatpush2.msra.mxu0 %v4188_v51  ;;  %518 = vmatprep.subr.mxu1 %v4193_v42  ;;  %v4198_v51 = vld [vmem:[#allocation88_spill] sm:$0xff] }
  0xae   :  { %451 = vmatprep.subr.mxu0 %v4190_v53  ;;  %519 = vmatpush2.msra.mxu1 %v4195_v40  ;;  %v4200_v53 = vld [vmem:[#allocation90_spill] sm:$0xff] }
  0xaf   :  { %452 = vmatpush2.msra.mxu0 %v4192_v44  ;;  %520 = vmatprep.subr.mxu1 %v4197_v49 }
  0xb0   :  { %453 = vmatprep.subr.mxu0 %v4194_v46  ;;  %521 = vmatpush2.msra.mxu1 %v4198_v51 }
  0xb1   :  { %454 = vmatpush2.msra.mxu0 %v4196_v48  ;;  %522 = vmatprep.subr.mxu1 %v4200_v53 }
  0xb2   :  { %455 = vmatprep.subr.mxu0 %v2438_v61  ;;  %523 = vmatpush2.msra.mxu1 %v2453_v55 }
  0xb3   :  { %456 = vmatpush2.msra.mxu0 %v4199_v52  ;;  %524 = vmatprep.subr.mxu1 %v2459_v57 }
  0xb4   :  { %457 = vmatprep.subr.mxu0 %v2450_v54  ;;  %525 = vmatpush2.msra.mxu1 %v2463_v59  ;;  %v206_v54 = vlaneseq }
  0xb5   :  { %458 = vmatpush2.msra.mxu0 %v2456_v56  ;;  %526 = vmatprep.subr.mxu1 %v2467_v60  ;;  %v75_v56 = vld [vmem:[%s3656_s3] sm:$0xf]  ;;  %s2047_s3 = smov [#allocation10]  }
  0xb6   :  { %564 = vmatprep.subr.mxu0 %v2098_v1  ;;  %527 = vmatpush2.msra.mxu1 %v2471_v62  ;;  %v207_v52 = vshrl.u32 %v206_v54, 7  ;;  %s1535_s15 = sshll.u32 %s2047_s3, 4  ;;  %s1536_s15 = int_to_ptr.vmem [resolvable:$true] %s1535_s15 }
  0xb7   :  { %528 = vmatprep.subr.mxu1 %v2474_v63  ;;  %s2009_s16 = scalar_lea.vmem %s1536_s15, 896  ;;  %p2014_p7 = scmp.lt.s32.totalorder %s1536_s15, %s1536_s15 }
  0xb8   :  { %529 = vmatpush2.msra.mxu1 %v2477_v0  ;;  %v208_v61 = vsub.s32 0, %v207_v52  ;;  %v212_v59 = vsub.s32 1, %v207_v52  ;;  %v216_v55 = vsub.s32 2, %v207_v52  ;;  %p2010_p6 = scmp.ne.s32.totalorder %s1536_s15, %s2009_s16  ;;  %p2015_p8 = scmp.lt.s32.totalorder %s2009_s16, %s2009_s16 }
  0xb9   :  { %635 = vmatprep.subr.mxu1 %v2119_v9  ;;  %v220_v9 = vsub.s32 3, %v207_v52 }
  0xba   :  { %v2615_v48 = vrot.slane %v75_v56, %v208_v61  ;;  %v2617_v1 = vrot.slane %v75_v56, %v212_v59  ;;  %v2623_v61 = vrot.slane %v75_v56, %v216_v55  ;;  %p2016_p9 = por %p2015_p8, %p2014_p7 }
  0xbb   :  { %v2621_v44 = vrot.slane %v75_v56, %v220_v9 }
  0xbc   :  { %4201 = vst [vmem:[#allocation76_spill] sm:$0xff] %v2615_v48  ;;  %4202 = vst [vmem:[#allocation80_spill] sm:$0xff] %v2617_v1  ;;  %p2017_p10 = pnand %p2016_p9, %p2010_p6 }
 0x136   :  { %v292_v60 = vpop.f32.mrf.mxu0 }
 0x137   :  { %v293_v62 = vadd.f32 %v292_v60, %v2615_v48 }
 0x138   :  { %v294_v63 = vpop.f32.mrf.mxu0  ;;  %v363_v46 = vpop.f32.mrf.mxu1 }
 0x139   :  { %v1549_v57 = vmul.f32 -1.442695, %v293_v62  ;;  %v295_v0 = vadd.f32 %v294_v63, %v2617_v1  ;;  %v364_v51 = vadd.f32 %v363_v46, %v2623_v61 }
 0x13a   :  { %v365_v53 = vpop.f32.mrf.mxu1 }
 0x13b   :  { %1689 = vpow2.f32 %v1549_v57  ;;  %v1550_v54 = vmul.f32 -1.442695, %v295_v0  ;;  %v366_v59 = vadd.f32 %v365_v53, %v2621_v44  ;;  %v394_v53 = vld [vmem:[#allocation2 + $0x8] sm:$0xff] }
 0x13d   :  { %1691 = vpow2.f32 %v1550_v54  ;;  %v1551_v60 = vmul.f32 -1.442695, %v366_v59  ;;  %v4246_v59 = vld [vmem:[#allocation62_spill] sm:$0xff] }
 0x13e   :  { %1693 = vtanh.f32 %v364_v51 }
 0x13f   :  { %1695 = vpow2.f32 %v1551_v60  ;;  %v4247_v60 = vld [vmem:[#allocation53_spill] sm:$0xff] }
 0x148   :  { %v1690_v48 = vpop.eup %1689 }
 0x149   :  { %v371_v62 = vadd.f32 1.0, %v1690_v48 }
 0x14a   :  { %v1692_v63 = vpop.eup %1691 }
 0x14b   :  { %1697 = vrcp.f32 %v371_v62  ;;  %v377_v0 = vadd.f32 1.0, %v1692_v63  ;;  %v1694_v57 = vpop.eup %1693  ;;  %v4248_v62 = vld [vmem:[#allocation64_spill] sm:$0xff]  ;;  %v4249_v63 = vld [vmem:[#allocation55_spill] sm:$0xff] }
 0x14c   :  { %v1696_v52 = vpop.eup %1695 }
 0x14d   :  { %1699 = vrcp.f32 %v377_v0  ;;  %v384_v1 = vadd.f32 1.0, %v1696_v52  ;;  %v4250_v0 = vld [vmem:[#allocation66_spill] sm:$0xff]  ;;  %v4252_v52 = vld [vmem:[#allocation68_spill] sm:$0xff] }
 0x14f   :  { %1701 = vrcp.f32 %v384_v1  ;;  %v4245_v1 = vld [vmem:[#allocation51_spill] sm:$0xff] }
 0x158   :  { %v1698_v9 = vpop.eup %1697 }
 0x159   :  { %v388_v56 = vmul.f32 %v1698_v9, %v1694_v57  ;;  %v4251_v57 = vld [vmem:[#allocation57_spill] sm:$0xff]  ;;  %v4253_v9 = vld [vmem:[#allocation59_spill] sm:$0xff] }
 0x15a   :  { %v1700_v54 = vpop.eup %1699 }
 0x15b   :  { %v387_v55 = vmul.f32 0.0, %v1700_v54  ;;  %v4254_v54 = vld [vmem:[#allocation70_spill] sm:$0xff] }
 0x15c   :  { %v1702_v46 = vpop.eup %1701 }
 0x15d   :  { %v2627_v49 = vadd.f32 %v388_v56, %v387_v55  ;;  %v4255_v55 = vld [vmem:[#allocation61_spill] sm:$0xff]  ;;  %v4256_v56 = vld [vmem:[#allocation72_spill] sm:$0xff] }
 0x15f   :  { %1703 = vtanh.f32 %v2627_v49 }
 0x16c   :  { %v1704_v48 = vpop.eup %1703 }
 0x16d   :  { %v2630_v51 = vmul.f32 %v1704_v48, %v1702_v46  ;;  %v4257_v46 = vld [vmem:[#allocation63_spill] sm:$0xff]  ;;  %v4258_v48 = vld [vmem:[#allocation74_spill] sm:$0xff] }
 0x16f   :  { %4203 = vst [vmem:[#allocation82_spill] sm:$0xff] %v2630_v51  ;;  %459 = vmatprep.mubr.f32.mxu0 %v2630_v51  ;;  %530 = vmatprep.mubr.f32.mxu1 %v2630_v51  ;;  %v2856_v51 = vld [vmem:[#allocation7 + $0x108] sm:$0xff] }
 0x170   :  { %460 = vmatmul.mubr.f32.vlgmr.msra.gmra.mxu0 %v394_v53  ;;  %531 = vmatmul.mubr.f32.vlgmr.msra.gmra.mxu1 %v394_v53  ;;  %v4259_v53 = vld [vmem:[#allocation65_spill] sm:$0xff] }
 0x171   :  { %565 = vmatpush1.msra.mxu0 %v2100_v2  ;;  %636 = vmatpush1.msra.mxu1 %v2125_v11  ;;  %v4204_v2 = vld [vmem:[#allocation20_spill] sm:$0xff] }
 0x172   :  { %566 = vmatprep.subr.mxu0 %v2102_v3  ;;  %637 = vmatprep.subr.mxu1 %v2131_v13  ;;  %v4205_v3 = vld [vmem:[#allocation15_spill] sm:$0xff]  ;;  %v4212_v11 = vld [vmem:[#allocation28_spill] sm:$0xff]  ;;  %v4214_v13 = vld [vmem:[#allocation30_spill] sm:$0xff] }
 0x173   :  { %567 = vmatpush1.msra.mxu0 %v2105_v4  ;;  %638 = vmatpush1.msra.mxu1 %v2133_v14  ;;  %v4206_v4 = vld [vmem:[#allocation22_spill] sm:$0xff]  ;;  %v4215_v14 = vld [vmem:[#allocation21_spill] sm:$0xff] }
 0x174   :  { %568 = vmatprep.subr.mxu0 %v2108_v5  ;;  %639 = vmatprep.subr.mxu1 %v2139_v16  ;;  %v4207_v5 = vld [vmem:[#allocation16_spill] sm:$0xff]  ;;  %v4217_v16 = vld [vmem:[#allocation23_spill] sm:$0xff] }
 0x175   :  { %569 = vmatpush1.msra.mxu0 %v2111_v6  ;;  %640 = vmatpush1.msra.mxu1 %v2145_v18  ;;  %v4208_v6 = vld [vmem:[#allocation24_spill] sm:$0xff]  ;;  %v4219_v18 = vld [vmem:[#allocation25_spill] sm:$0xff] }
 0x176   :  { %570 = vmatprep.subr.mxu0 %v2114_v7  ;;  %641 = vmatprep.subr.mxu1 %v2147_v19  ;;  %v4209_v7 = vld [vmem:[#allocation17_spill] sm:$0xff]  ;;  %v4220_v19 = vld [vmem:[#allocation36_spill] sm:$0xff] }
 0x177   :  { %571 = vmatpush1.msra.mxu0 %v2117_v8  ;;  %642 = vmatpush1.msra.mxu1 %v2153_v21  ;;  %v4210_v8 = vld [vmem:[#allocation26_spill] sm:$0xff] }
 0x178   :  { %572 = vmatprep.subr.mxu0 %v2122_v10  ;;  %643 = vmatprep.subr.mxu1 %v2159_v23  ;;  %v4211_v10 = vld [vmem:[#allocation18_spill] sm:$0xff]  ;;  %v4224_v23 = vld [vmem:[#allocation40_spill] sm:$0xff] }
 0x179   :  { %573 = vmatpush1.msra.mxu0 %v2128_v12  ;;  %644 = vmatpush1.msra.mxu1 %v2165_v25  ;;  %v4213_v12 = vld [vmem:[#allocation19_spill] sm:$0xff]  ;;  %v4222_v21 = vld [vmem:[#allocation38_spill] sm:$0xff]  ;;  %4295 = vst [vmem:[#allocation18_spill] sm:$0xff] %v2856_v51 }
 0x17a   :  { %574 = vmatprep.subr.mxu0 %v2136_v15  ;;  %645 = vmatprep.subr.mxu1 %v2171_v27  ;;  %v4216_v15 = vld [vmem:[#allocation32_spill] sm:$0xff]  ;;  %v4226_v25 = vld [vmem:[#allocation42_spill] sm:$0xff] }
 0x17b   :  { %575 = vmatpush1.msra.mxu0 %v2142_v17  ;;  %646 = vmatpush1.msra.mxu1 %v2177_v29  ;;  %v4218_v17 = vld [vmem:[#allocation34_spill] sm:$0xff]  ;;  %v4228_v27 = vld [vmem:[#allocation44_spill] sm:$0xff] }
 0x17c   :  { %576 = vmatprep.subr.mxu0 %v2150_v20  ;;  %647 = vmatprep.subr.mxu1 %v2183_v31  ;;  %v4221_v20 = vld [vmem:[#allocation27_spill] sm:$0xff]  ;;  %v4230_v29 = vld [vmem:[#allocation46_spill] sm:$0xff]  ;;  %v4232_v31 = vld [vmem:[#allocation48_spill] sm:$0xff] }
 0x17d   :  { %577 = vmatpush1.msra.mxu0 %v2156_v22  ;;  %648 = vmatpush1.msra.mxu1 %v2189_v33  ;;  %v4223_v22 = vld [vmem:[#allocation29_spill] sm:$0xff]  ;;  %v4234_v33 = vld [vmem:[#allocation50_spill] sm:$0xff] }
 0x17e   :  { %578 = vmatprep.subr.mxu0 %v2162_v24  ;;  %649 = vmatprep.subr.mxu1 %v2195_v35  ;;  %v4225_v24 = vld [vmem:[#allocation31_spill] sm:$0xff]  ;;  %v4236_v35 = vld [vmem:[#allocation52_spill] sm:$0xff] }
 0x17f   :  { %579 = vmatpush1.msra.mxu0 %v2168_v26  ;;  %650 = vmatpush1.msra.mxu1 %v2201_v37  ;;  %v4227_v26 = vld [vmem:[#allocation33_spill] sm:$0xff]  ;;  %v4238_v37 = vld [vmem:[#allocation54_spill] sm:$0xff] }
 0x180   :  { %580 = vmatprep.subr.mxu0 %v2174_v28  ;;  %651 = vmatprep.subr.mxu1 %v2207_v39  ;;  %v4229_v28 = vld [vmem:[#allocation35_spill] sm:$0xff]  ;;  %v4240_v39 = vld [vmem:[#allocation56_spill] sm:$0xff] }
 0x181   :  { %581 = vmatpush1.msra.mxu0 %v2180_v30  ;;  %652 = vmatpush1.msra.mxu1 %v2213_v41  ;;  %v4231_v30 = vld [vmem:[#allocation37_spill] sm:$0xff]  ;;  %v4241_v41 = vld [vmem:[#allocation47_spill] sm:$0xff] }
 0x182   :  { %582 = vmatprep.subr.mxu0 %v2186_v32  ;;  %653 = vmatprep.subr.mxu1 %v2219_v43  ;;  %v4233_v32 = vld [vmem:[#allocation39_spill] sm:$0xff]  ;;  %v4242_v43 = vld [vmem:[#allocation58_spill] sm:$0xff] }
 0x183   :  { %583 = vmatpush1.msra.mxu0 %v2192_v34  ;;  %654 = vmatpush1.msra.mxu1 %v2225_v45  ;;  %v4235_v34 = vld [vmem:[#allocation41_spill] sm:$0xff] }
 0x184   :  { %584 = vmatprep.subr.mxu0 %v2198_v36  ;;  %655 = vmatprep.subr.mxu1 %v2231_v47  ;;  %v4237_v36 = vld [vmem:[#allocation43_spill] sm:$0xff]  ;;  %v4243_v45 = vld [vmem:[#allocation49_spill] sm:$0xff]  ;;  %v4244_v47 = vld [vmem:[#allocation60_spill] sm:$0xff] }
 0x185   :  { %585 = vmatpush1.msra.mxu0 %v2204_v38  ;;  %656 = vmatpush1.msra.mxu1 %v4204_v2  ;;  %v4239_v38 = vld [vmem:[#allocation45_spill] sm:$0xff]  ;;  %v4260_v2 = vld [vmem:[#allocation67_spill] sm:$0xff] }
 0x186   :  { %586 = vmatprep.subr.mxu0 %v4205_v3  ;;  %657 = vmatprep.subr.mxu1 %v4206_v4  ;;  %v4261_v3 = vld [vmem:[#allocation78_spill] sm:$0xff]  ;;  %v4262_v4 = vld [vmem:[#allocation69_spill] sm:$0xff] }
 0x187   :  { %587 = vmatpush1.msra.mxu0 %v4207_v5  ;;  %658 = vmatpush1.msra.mxu1 %v4208_v6  ;;  %v4263_v5 = vld [vmem:[#allocation71_spill] sm:$0xff]  ;;  %v4264_v6 = vld [vmem:[#allocation73_spill] sm:$0xff] }
 0x188   :  { %588 = vmatprep.subr.mxu0 %v4209_v7  ;;  %659 = vmatprep.subr.mxu1 %v4210_v8  ;;  %v4265_v7 = vld [vmem:[#allocation75_spill] sm:$0xff]  ;;  %v4266_v8 = vld [vmem:[#allocation86_spill] sm:$0xff] }
 0x189   :  { %589 = vmatpush1.msra.mxu0 %v4211_v10  ;;  %660 = vmatpush1.msra.mxu1 %v4212_v11  ;;  %v4267_v10 = vld [vmem:[#allocation77_spill] sm:$0xff]  ;;  %v4268_v11 = vld [vmem:[#allocation88_spill] sm:$0xff] }
 0x18a   :  { %590 = vmatprep.subr.mxu0 %v4213_v12  ;;  %661 = vmatprep.subr.mxu1 %v4214_v13  ;;  %v4269_v12 = vld [vmem:[#allocation79_spill] sm:$0xff]  ;;  %v4270_v13 = vld [vmem:[#allocation90_spill] sm:$0xff] }
 0x18b   :  { %591 = vmatpush1.msra.mxu0 %v4215_v14  ;;  %662 = vmatpush1.msra.mxu1 %v4216_v15  ;;  %v4271_v14 = vld [vmem:[#allocation81_spill] sm:$0xff]  ;;  %v4272_v15 = vld [vmem:[#allocation92_spill] sm:$0xff] }
 0x18c   :  { %592 = vmatprep.subr.mxu0 %v4217_v16  ;;  %663 = vmatprep.subr.mxu1 %v4218_v17  ;;  %v4273_v16 = vld [vmem:[#allocation83_spill] sm:$0xff]  ;;  %v4274_v17 = vld [vmem:[#allocation94_spill] sm:$0xff] }
 0x18d   :  { %593 = vmatpush1.msra.mxu0 %v4219_v18  ;;  %664 = vmatpush1.msra.mxu1 %v4220_v19  ;;  %v4275_v18 = vld [vmem:[#allocation85_spill] sm:$0xff]  ;;  %v4276_v19 = vld [vmem:[#allocation95_spill] sm:$0xff] }
 0x18e   :  { %594 = vmatprep.subr.mxu0 %v4221_v20  ;;  %665 = vmatprep.subr.mxu1 %v4222_v21  ;;  %v4277_v20 = vld [vmem:[#allocation87_spill] sm:$0xff]  ;;  %v4278_v21 = vld [vmem:[#allocation96_spill] sm:$0xff] }
 0x18f   :  { %595 = vmatpush1.msra.mxu0 %v4223_v22  ;;  %666 = vmatpush1.msra.mxu1 %v4224_v23  ;;  %v4279_v22 = vld [vmem:[#allocation89_spill] sm:$0xff] }
 0x190   :  { %596 = vmatprep.subr.mxu0 %v4225_v24  ;;  %667 = vmatprep.subr.mxu1 %v4226_v25  ;;  %v4280_v23 = vld [vmem:[#allocation97_spill] sm:$0xff]  ;;  %v4281_v24 = vld [vmem:[#allocation91_spill] sm:$0xff]  ;;  %v4282_v25 = vld [vmem:[#allocation98_spill] sm:$0xff] }
 0x191   :  { %597 = vmatpush2.msra.mxu0 %v4227_v26  ;;  %668 = vmatpush2.msra.mxu1 %v4228_v27  ;;  %v4283_v26 = vld [vmem:[#allocation93_spill] sm:$0xff]  ;;  %v4284_v27 = vld [vmem:[#allocation99_spill] sm:$0xff] }
 0x192   :  { %598 = vmatprep.subr.mxu0 %v4229_v28  ;;  %669 = vmatprep.subr.mxu1 %v4230_v29  ;;  %v2760_v28 = vld [vmem:[#allocation7 + $0x1e8] sm:$0xff]  ;;  %v2763_v29 = vld [vmem:[#allocation7 + $0x1f8] sm:$0xff] }
 0x193   :  { %599 = vmatpush2.msra.mxu0 %v4231_v30  ;;  %670 = vmatpush2.msra.mxu1 %v4232_v31  ;;  %4285 = vst [vmem:[#allocation84_spill] sm:$0xff] %v2760_v28  ;;  %4286 = vst [vmem:[#allocation20_spill] sm:$0xff] %v2763_v29  ;;  %v4287_v31 = vld [vmem:[#allocation76_spill] sm:$0xff] }
 0x194   :  { %600 = vmatprep.subr.mxu0 %v4233_v32  ;;  %671 = vmatprep.subr.mxu1 %v4234_v33 }
 0x195   :  { %601 = vmatpush2.msra.mxu0 %v4235_v34  ;;  %672 = vmatpush2.msra.mxu1 %v4236_v35  ;;  %v4288_v35 = vld [vmem:[#allocation80_spill] sm:$0xff] }
 0x196   :  { %602 = vmatprep.subr.mxu0 %v4237_v36  ;;  %673 = vmatprep.subr.mxu1 %v4238_v37 }
 0x197   :  { %603 = vmatpush2.msra.mxu0 %v4239_v38  ;;  %674 = vmatpush2.msra.mxu1 %v4240_v39 }
 0x198   :  { %604 = vmatprep.subr.mxu0 %v4241_v41  ;;  %675 = vmatprep.subr.mxu1 %v4242_v43 }
 0x199   :  { %605 = vmatpush2.msra.mxu0 %v4243_v45  ;;  %676 = vmatpush2.msra.mxu1 %v4244_v47 }
 0x19a   :  { %606 = vmatprep.subr.mxu0 %v4245_v1  ;;  %677 = vmatprep.subr.mxu1 %v4246_v59 }
 0x19b   :  { %607 = vmatpush2.msra.mxu0 %v4247_v60  ;;  %678 = vmatpush2.msra.mxu1 %v4248_v62 }
 0x19c   :  { %608 = vmatprep.subr.mxu0 %v4249_v63  ;;  %679 = vmatprep.subr.mxu1 %v4250_v0 }
 0x19d   :  { %609 = vmatpush2.msra.mxu0 %v4251_v57  ;;  %680 = vmatpush2.msra.mxu1 %v4252_v52 }
 0x19e   :  { %610 = vmatprep.subr.mxu0 %v4253_v9  ;;  %681 = vmatprep.subr.mxu1 %v4254_v54 }
 0x19f   :  { %611 = vmatpush2.msra.mxu0 %v4255_v55  ;;  %682 = vmatpush2.msra.mxu1 %v4256_v56 }
 0x1a0   :  { %612 = vmatprep.subr.mxu0 %v4257_v46  ;;  %683 = vmatprep.subr.mxu1 %v4258_v48 }
 0x1a1   :  { %613 = vmatpush2.msra.mxu0 %v4259_v53  ;;  %684 = vmatpush2.msra.mxu1 %v4187_v50 }
 0x1a2   :  { %614 = vmatprep.subr.mxu0 %v4260_v2  ;;  %685 = vmatprep.subr.mxu1 %v4261_v3 }
 0x1a3   :  { %615 = vmatpush2.msra.mxu0 %v4262_v4  ;;  %686 = vmatpush2.msra.mxu1 %v4191_v58 }
 0x1a4   :  { %616 = vmatprep.subr.mxu0 %v4263_v5  ;;  %687 = vmatprep.subr.mxu1 %v4193_v42 }
 0x1a5   :  { %617 = vmatpush2.msra.mxu0 %v4264_v6  ;;  %688 = vmatpush2.msra.mxu1 %v4195_v40 }
 0x1a6   :  { %618 = vmatprep.subr.mxu0 %v4265_v7  ;;  %689 = vmatprep.subr.mxu1 %v4266_v8 }
 0x1a7   :  { %619 = vmatpush2.msra.mxu0 %v4267_v10  ;;  %690 = vmatpush2.msra.mxu1 %v4268_v11 }
 0x1a8   :  { %620 = vmatprep.subr.mxu0 %v4269_v12  ;;  %691 = vmatprep.subr.mxu1 %v4270_v13 }
 0x1a9   :  { %621 = vmatpush2.msra.mxu0 %v4271_v14  ;;  %692 = vmatpush2.msra.mxu1 %v4272_v15 }
 0x1aa   :  { %622 = vmatprep.subr.mxu0 %v4273_v16  ;;  %693 = vmatprep.subr.mxu1 %v4274_v17 }
 0x1ab   :  { %623 = vmatpush2.msra.mxu0 %v4275_v18  ;;  %694 = vmatpush2.msra.mxu1 %v4276_v19 }
 0x1ac   :  { %624 = vmatprep.subr.mxu0 %v4277_v20  ;;  %695 = vmatprep.subr.mxu1 %v4278_v21 }
 0x1ad   :  { %625 = vmatpush2.msra.mxu0 %v4279_v22  ;;  %696 = vmatpush2.msra.mxu1 %v4280_v23 }
 0x1ae   :  { %626 = vmatprep.subr.mxu0 %v4281_v24  ;;  %697 = vmatprep.subr.mxu1 %v4282_v25 }
 0x1af   :  { %627 = vmatpush2.msra.mxu0 %v4283_v26  ;;  %698 = vmatpush2.msra.mxu1 %v4284_v27 }
 0x1b0   :  { %733 = vmatprep.subr.mxu0 %v2760_v28  ;;  %804 = vmatprep.subr.mxu1 %v2763_v29 }
 0x230   :  { %v461_v30 = vpop.f32.mrf.mxu0  ;;  %v532_v38 = vpop.f32.mrf.mxu1 }
 0x231   :  { %v462_v32 = vadd.f32 %v461_v30, %v4287_v31  ;;  %v533_v43 = vadd.f32 %v532_v38, %v2623_v61  ;;  %v563_v30 = vld [vmem:[#allocation2 + $0x10] sm:$0xff]  ;;  %v2796_v38 = vld [vmem:[#allocation7 + $0x1a8] sm:$0xff] }
 0x232   :  { %v463_v33 = vpop.f32.mrf.mxu0  ;;  %v534_v39 = vpop.f32.mrf.mxu1 }
 0x233   :  { %v1552_v34 = vmul.f32 -1.442695, %v462_v32  ;;  %v464_v36 = vadd.f32 %v463_v33, %v4288_v35  ;;  %v535_v41 = vadd.f32 %v534_v39, %v2621_v44  ;;  %v2778_v32 = vld [vmem:[#allocation7 + $0x1e0] sm:$0xff]  ;;  %v2784_v33 = vld [vmem:[#allocation7 + $0x1c8] sm:$0xff]  ;;  %v2799_v39 = vld [vmem:[#allocation7 + $0x1b8] sm:$0xff] }
 0x235   :  { %1705 = vpow2.f32 %v1552_v34  ;;  %v1553_v37 = vmul.f32 -1.442695, %v464_v36  ;;  %v1554_v45 = vmul.f32 -1.442695, %v535_v41  ;;  %v2787_v34 = vld [vmem:[#allocation7 + $0x1d8] sm:$0xff]  ;;  %v2790_v36 = vld [vmem:[#allocation7 + $0x1c0] sm:$0xff] }
 0x236   :  { %v2802_v41 = vld [vmem:[#allocation7 + $0x1a0] sm:$0xff] }
 0x237   :  { %1707 = vpow2.f32 %v1553_v37  ;;  %v2793_v37 = vld [vmem:[#allocation7 + $0x1d0] sm:$0xff] }
 0x238   :  { %1709 = vtanh.f32 %v533_v43  ;;  %v2805_v43 = vld [vmem:[#allocation7 + $0x1b0] sm:$0xff] }
 0x239   :  { %1711 = vpow2.f32 %v1554_v45  ;;  %v2808_v45 = vld [vmem:[#allocation7 + $0x188] sm:$0xff] }
 0x242   :  { %v1706_v47 = vpop.eup %1705 }
 0x243   :  { %v540_v1 = vadd.f32 1.0, %v1706_v47  ;;  %v2811_v47 = vld [vmem:[#allocation7 + $0x198] sm:$0xff] }
 0x244   :  { %v1708_v59 = vpop.eup %1707 }
 0x245   :  { %1713 = vrcp.f32 %v540_v1  ;;  %v546_v60 = vadd.f32 1.0, %v1708_v59  ;;  %v1710_v62 = vpop.eup %1709  ;;  %v2814_v1 = vld [vmem:[#allocation7 + $0x180] sm:$0xff]  ;;  %v2817_v59 = vld [vmem:[#allocation7 + $0x190] sm:$0xff] }
 0x246   :  { %v1712_v63 = vpop.eup %1711 }
 0x247   :  { %1715 = vrcp.f32 %v546_v60  ;;  %v553_v55 = vadd.f32 1.0, %v1712_v63  ;;  %v2820_v60 = vld [vmem:[#allocation7 + $0x168] sm:$0xff]  ;;  %v2826_v63 = vld [vmem:[#allocation7 + $0x160] sm:$0xff] }
 0x249   :  { %1717 = vrcp.f32 %v553_v55  ;;  %v2835_v55 = vld [vmem:[#allocation7 + $0x158] sm:$0xff] }
 0x252   :  { %v1714_v57 = vpop.eup %1713 }
 0x253   :  { %v557_v53 = vmul.f32 %v1714_v57, %v1710_v62  ;;  %v2823_v62 = vld [vmem:[#allocation7 + $0x178] sm:$0xff]  ;;  %v2829_v57 = vld [vmem:[#allocation7 + $0x170] sm:$0xff] }
 0x254   :  { %v1716_v9 = vpop.eup %1715 }
 0x255   :  { %v556_v46 = vmul.f32 %v1716_v9, %v2627_v49  ;;  %v2781_v49 = vld [vmem:[#allocation7 + $0x1f0] sm:$0xff]  ;;  %v2832_v9 = vld [vmem:[#allocation7 + $0x148] sm:$0xff] }
 0x256   :  { %v1718_v4 = vpop.eup %1717 }
 0x257   :  { %v2771_v2 = vadd.f32 %v557_v53, %v556_v46  ;;  %v2838_v46 = vld [vmem:[#allocation7 + $0x140] sm:$0xff]  ;;  %v2841_v53 = vld [vmem:[#allocation7 + $0x150] sm:$0xff] }
 0x258   :  { %4290 = vst [vmem:[#allocation22_spill] sm:$0xff] %v2841_v53 }
 0x259   :  { %1719 = vtanh.f32 %v2771_v2 }
 0x266   :  { %v1720_v5 = vpop.eup %1719 }
 0x267   :  { %v2774_v6 = vmul.f32 %v1720_v5, %v1718_v4  ;;  %v2844_v4 = vld [vmem:[#allocation7 + $0x128] sm:$0xff]  ;;  %v2847_v5 = vld [vmem:[#allocation7 + $0x138] sm:$0xff] }
 0x268   :  { %4291 = vst [vmem:[#allocation16_spill] sm:$0xff] %v2844_v4  ;;  %4292 = vst [vmem:[#allocation24_spill] sm:$0xff] %v2847_v5 }
 0x269   :  { %4289 = vst [vmem:[#allocation15_spill] sm:$0xff] %v2774_v6  ;;  %628 = vmatprep.mubr.f32.mxu0 %v2774_v6  ;;  %699 = vmatprep.mubr.f32.mxu1 %v2774_v6  ;;  %v2853_v6 = vld [vmem:[#allocation7 + $0x130] sm:$0xff] }
 0x26a   :  { %629 = vmatmul.mubr.f32.vlgmr.msra.gmra.mxu0 %v563_v30  ;;  %700 = vmatmul.mubr.f32.vlgmr.msra.gmra.mxu1 %v563_v30  ;;  %v2850_v30 = vld [vmem:[#allocation7 + $0x120] sm:$0xff]  ;;  %4294 = vst [vmem:[#allocation26_spill] sm:$0xff] %v2853_v6 }
 0x26b   :  { %734 = vmatpush1.msra.mxu0 %v2778_v32  ;;  %805 = vmatpush1.msra.mxu1 %v2781_v49  ;;  %4293 = vst [vmem:[#allocation17_spill] sm:$0xff] %v2850_v30 }
 0x26c   :  { %735 = vmatprep.subr.mxu0 %v2784_v33  ;;  %806 = vmatprep.subr.mxu1 %v2787_v34 }
 0x26d   :  { %736 = vmatpush1.msra.mxu0 %v2790_v36  ;;  %807 = vmatpush1.msra.mxu1 %v2793_v37 }
 0x26e   :  { %737 = vmatprep.subr.mxu0 %v2796_v38  ;;  %808 = vmatprep.subr.mxu1 %v2799_v39 }
 0x26f   :  { %738 = vmatpush1.msra.mxu0 %v2802_v41  ;;  %809 = vmatpush1.msra.mxu1 %v2805_v43 }
 0x270   :  { %739 = vmatprep.subr.mxu0 %v2808_v45  ;;  %810 = vmatprep.subr.mxu1 %v2811_v47 }
 0x271   :  { %740 = vmatpush1.msra.mxu0 %v2814_v1  ;;  %811 = vmatpush1.msra.mxu1 %v2817_v59 }
 0x272   :  { %741 = vmatprep.subr.mxu0 %v2820_v60  ;;  %812 = vmatprep.subr.mxu1 %v2823_v62 }
 0x273   :  { %742 = vmatpush1.msra.mxu0 %v2826_v63  ;;  %813 = vmatpush1.msra.mxu1 %v2829_v57 }
 0x274   :  { %743 = vmatprep.subr.mxu0 %v2832_v9  ;;  %814 = vmatprep.subr.mxu1 %v2835_v55 }
 0x275   :  { %744 = vmatpush1.msra.mxu0 %v2838_v46  ;;  %815 = vmatpush1.msra.mxu1 %v2841_v53  ;;  %v2859_v53 = vld [vmem:[#allocation7 + $0x118] sm:$0xff] }
 0x276   :  { %745 = vmatprep.subr.mxu0 %v2844_v4  ;;  %816 = vmatprep.subr.mxu1 %v2847_v5  ;;  %4296 = vst [vmem:[#allocation28_spill] sm:$0xff] %v2859_v53  ;;  %v2862_v4 = vld [vmem:[#allocation7 + $0x100] sm:$0xff]  ;;  %v2865_v5 = vld [vmem:[#allocation7 + $0x110] sm:$0xff] }
 0x277   :  { %746 = vmatpush1.msra.mxu0 %v2850_v30  ;;  %817 = vmatpush1.msra.mxu1 %v2853_v6  ;;  %4297 = vst [vmem:[#allocation19_spill] sm:$0xff] %v2862_v4  ;;  %4298 = vst [vmem:[#allocation30_spill] sm:$0xff] %v2865_v5  ;;  %v2868_v30 = vld [vmem:[#allocation7 + $0xe8] sm:$0xff]  ;;  %v2871_v6 = vld [vmem:[#allocation7 + $0xf8] sm:$0xff] }
 0x278   :  { %747 = vmatprep.subr.mxu0 %v2856_v51  ;;  %818 = vmatprep.subr.mxu1 %v2859_v53  ;;  %4299 = vst [vmem:[#allocation21_spill] sm:$0xff] %v2868_v30  ;;  %4300 = vst [vmem:[#allocation32_spill] sm:$0xff] %v2871_v6  ;;  %v2874_v51 = vld [vmem:[#allocation7 + $0xe0] sm:$0xff]  ;;  %v2877_v53 = vld [vmem:[#allocation7 + $0xf0] sm:$0xff] }
 0x279   :  { %748 = vmatpush1.msra.mxu0 %v2862_v4  ;;  %819 = vmatpush1.msra.mxu1 %v2865_v5  ;;  %4301 = vst [vmem:[#allocation23_spill] sm:$0xff] %v2874_v51  ;;  %4302 = vst [vmem:[#allocation34_spill] sm:$0xff] %v2877_v53  ;;  %v2880_v4 = vld [vmem:[#allocation7 + $0xc8] sm:$0xff]  ;;  %v2883_v5 = vld [vmem:[#allocation7 + $0xd8] sm:$0xff] }
 0x27a   :  { %749 = vmatprep.subr.mxu0 %v2868_v30  ;;  %820 = vmatprep.subr.mxu1 %v2871_v6  ;;  %4303 = vst [vmem:[#allocation25_spill] sm:$0xff] %v2880_v4  ;;  %4304 = vst [vmem:[#allocation36_spill] sm:$0xff] %v2883_v5  ;;  %v2886_v30 = vld [vmem:[#allocation7 + $0xc0] sm:$0xff]  ;;  %v2889_v6 = vld [vmem:[#allocation7 + $0xd0] sm:$0xff] }
 0x27b   :  { %750 = vmatpush1.msra.mxu0 %v2874_v51  ;;  %821 = vmatpush1.msra.mxu1 %v2877_v53  ;;  %4305 = vst [vmem:[#allocation27_spill] sm:$0xff] %v2886_v30  ;;  %4306 = vst [vmem:[#allocation38_spill] sm:$0xff] %v2889_v6  ;;  %v2892_v51 = vld [vmem:[#allocation7 + $0xa8] sm:$0xff]  ;;  %v2895_v53 = vld [vmem:[#allocation7 + $0xb8] sm:$0xff] }
 0x27c   :  { %751 = vmatprep.subr.mxu0 %v2880_v4  ;;  %822 = vmatprep.subr.mxu1 %v2883_v5  ;;  %4307 = vst [vmem:[#allocation29_spill] sm:$0xff] %v2892_v51  ;;  %4308 = vst [vmem:[#allocation40_spill] sm:$0xff] %v2895_v53  ;;  %v2898_v4 = vld [vmem:[#allocation7 + $0xa0] sm:$0xff]  ;;  %v2901_v5 = vld [vmem:[#allocation7 + $0xb0] sm:$0xff] }
 0x27d   :  { %752 = vmatpush1.msra.mxu0 %v2886_v30  ;;  %823 = vmatpush1.msra.mxu1 %v2889_v6  ;;  %4309 = vst [vmem:[#allocation31_spill] sm:$0xff] %v2898_v4  ;;  %4310 = vst [vmem:[#allocation42_spill] sm:$0xff] %v2901_v5  ;;  %v2904_v30 = vld [vmem:[#allocation7 + $0x88] sm:$0xff]  ;;  %v2907_v6 = vld [vmem:[#allocation7 + $0x98] sm:$0xff] }
 0x27e   :  { %753 = vmatprep.subr.mxu0 %v2892_v51  ;;  %824 = vmatprep.subr.mxu1 %v2895_v53  ;;  %4311 = vst [vmem:[#allocation33_spill] sm:$0xff] %v2904_v30  ;;  %4312 = vst [vmem:[#allocation44_spill] sm:$0xff] %v2907_v6  ;;  %v2910_v51 = vld [vmem:[#allocation7 + $0x80] sm:$0xff]  ;;  %v2913_v53 = vld [vmem:[#allocation7 + $0x90] sm:$0xff] }
 0x27f   :  { %754 = vmatpush1.msra.mxu0 %v2898_v4  ;;  %825 = vmatpush1.msra.mxu1 %v2901_v5  ;;  %4313 = vst [vmem:[#allocation35_spill] sm:$0xff] %v2910_v51  ;;  %4314 = vst [vmem:[#allocation46_spill] sm:$0xff] %v2913_v53  ;;  %v2916_v4 = vld [vmem:[#allocation7 + $0x68] sm:$0xff]  ;;  %v2919_v5 = vld [vmem:[#allocation7 + $0x78] sm:$0xff] }
 0x280   :  { %755 = vmatprep.subr.mxu0 %v2904_v30  ;;  %826 = vmatprep.subr.mxu1 %v2907_v6  ;;  %4315 = vst [vmem:[#allocation37_spill] sm:$0xff] %v2916_v4  ;;  %4316 = vst [vmem:[#allocation48_spill] sm:$0xff] %v2919_v5  ;;  %v2922_v30 = vld [vmem:[#allocation7 + $0x60] sm:$0xff]  ;;  %v2925_v6 = vld [vmem:[#allocation7 + $0x70] sm:$0xff] }
 0x281   :  { %756 = vmatpush1.msra.mxu0 %v2910_v51  ;;  %827 = vmatpush1.msra.mxu1 %v2913_v53  ;;  %4317 = vst [vmem:[#allocation39_spill] sm:$0xff] %v2922_v30  ;;  %4318 = vst [vmem:[#allocation50_spill] sm:$0xff] %v2925_v6  ;;  %v2928_v51 = vld [vmem:[#allocation7 + $0x48] sm:$0xff]  ;;  %v2931_v53 = vld [vmem:[#allocation7 + $0x58] sm:$0xff] }
 0x282   :  { %757 = vmatprep.subr.mxu0 %v2916_v4  ;;  %828 = vmatprep.subr.mxu1 %v2919_v5  ;;  %4319 = vst [vmem:[#allocation41_spill] sm:$0xff] %v2928_v51  ;;  %4320 = vst [vmem:[#allocation52_spill] sm:$0xff] %v2931_v53  ;;  %v2934_v4 = vld [vmem:[#allocation7 + $0x40] sm:$0xff]  ;;  %v2937_v5 = vld [vmem:[#allocation7 + $0x50] sm:$0xff] }
 0x283   :  { %758 = vmatpush1.msra.mxu0 %v2922_v30  ;;  %829 = vmatpush1.msra.mxu1 %v2925_v6  ;;  %4321 = vst [vmem:[#allocation43_spill] sm:$0xff] %v2934_v4  ;;  %4322 = vst [vmem:[#allocation54_spill] sm:$0xff] %v2937_v5  ;;  %v2940_v30 = vld [vmem:[#allocation7 + $0x28] sm:$0xff]  ;;  %v2943_v6 = vld [vmem:[#allocation7 + $0x38] sm:$0xff] }
 0x284   :  { %759 = vmatprep.subr.mxu0 %v2928_v51  ;;  %830 = vmatprep.subr.mxu1 %v2931_v53  ;;  %4323 = vst [vmem:[#allocation45_spill] sm:$0xff] %v2940_v30  ;;  %4324 = vst [vmem:[#allocation56_spill] sm:$0xff] %v2943_v6  ;;  %v2946_v51 = vld [vmem:[#allocation7 + $0x20] sm:$0xff]  ;;  %v2949_v53 = vld [vmem:[#allocation7 + $0x30] sm:$0xff] }
 0x285   :  { %760 = vmatpush1.msra.mxu0 %v2934_v4  ;;  %831 = vmatpush1.msra.mxu1 %v2937_v5  ;;  %4325 = vst [vmem:[#allocation47_spill] sm:$0xff] %v2946_v51  ;;  %4326 = vst [vmem:[#allocation58_spill] sm:$0xff] %v2949_v53  ;;  %v2952_v4 = vld [vmem:[#allocation7 + $0x8] sm:$0xff]  ;;  %v2955_v5 = vld [vmem:[#allocation7 + $0x18] sm:$0xff] }
 0x286   :  { %761 = vmatprep.subr.mxu0 %v2940_v30  ;;  %832 = vmatprep.subr.mxu1 %v2943_v6  ;;  %4327 = vst [vmem:[#allocation49_spill] sm:$0xff] %v2952_v4  ;;  %4328 = vst [vmem:[#allocation60_spill] sm:$0xff] %v2955_v5  ;;  %v2958_v30 = vld [vmem:[#allocation7] sm:$0xff]  ;;  %v2961_v6 = vld [vmem:[#allocation7 + $0x10] sm:$0xff] }
 0x287   :  { %762 = vmatpush1.msra.mxu0 %v2946_v51  ;;  %833 = vmatpush1.msra.mxu1 %v2949_v53  ;;  %4329 = vst [vmem:[#allocation51_spill] sm:$0xff] %v2958_v30  ;;  %4330 = vst [vmem:[#allocation62_spill] sm:$0xff] %v2961_v6  ;;  %v2964_v51 = vld [vmem:[#allocation7 + $0x3e8] sm:$0xff]  ;;  %v2967_v53 = vld [vmem:[#allocation7 + $0x3f8] sm:$0xff] }
 0x288   :  { %763 = vmatprep.subr.mxu0 %v2952_v4  ;;  %834 = vmatprep.subr.mxu1 %v2955_v5  ;;  %4331 = vst [vmem:[#allocation53_spill] sm:$0xff] %v2964_v51  ;;  %4332 = vst [vmem:[#allocation64_spill] sm:$0xff] %v2967_v53  ;;  %v2970_v4 = vld [vmem:[#allocation7 + $0x3e0] sm:$0xff]  ;;  %v2973_v5 = vld [vmem:[#allocation7 + $0x3f0] sm:$0xff] }
 0x289   :  { %764 = vmatpush1.msra.mxu0 %v2958_v30  ;;  %835 = vmatpush1.msra.mxu1 %v2961_v6  ;;  %4333 = vst [vmem:[#allocation55_spill] sm:$0xff] %v2970_v4  ;;  %4334 = vst [vmem:[#allocation66_spill] sm:$0xff] %v2973_v5  ;;  %v2976_v30 = vld [vmem:[#allocation7 + $0x3c8] sm:$0xff]  ;;  %v2979_v6 = vld [vmem:[#allocation7 + $0x3d8] sm:$0xff] }
 0x28a   :  { %765 = vmatprep.subr.mxu0 %v2964_v51  ;;  %836 = vmatprep.subr.mxu1 %v2967_v53  ;;  %4335 = vst [vmem:[#allocation57_spill] sm:$0xff] %v2976_v30  ;;  %4336 = vst [vmem:[#allocation68_spill] sm:$0xff] %v2979_v6  ;;  %v2982_v51 = vld [vmem:[#allocation7 + $0x3c0] sm:$0xff]  ;;  %v2985_v53 = vld [vmem:[#allocation7 + $0x3d0] sm:$0xff] }
 0x28b   :  { %766 = vmatpush2.msra.mxu0 %v2970_v4  ;;  %837 = vmatpush2.msra.mxu1 %v2973_v5  ;;  %4337 = vst [vmem:[#allocation59_spill] sm:$0xff] %v2982_v51  ;;  %4338 = vst [vmem:[#allocation70_spill] sm:$0xff] %v2985_v53  ;;  %v2988_v4 = vld [vmem:[#allocation7 + $0x3a8] sm:$0xff]  ;;  %v2991_v5 = vld [vmem:[#allocation7 + $0x3b8] sm:$0xff] }
 0x28c   :  { %767 = vmatprep.subr.mxu0 %v2976_v30  ;;  %838 = vmatprep.subr.mxu1 %v2979_v6  ;;  %4339 = vst [vmem:[#allocation61_spill] sm:$0xff] %v2988_v4  ;;  %4340 = vst [vmem:[#allocation72_spill] sm:$0xff] %v2991_v5  ;;  %v2994_v30 = vld [vmem:[#allocation7 + $0x3a0] sm:$0xff]  ;;  %v2997_v6 = vld [vmem:[#allocation7 + $0x3b0] sm:$0xff] }
 0x28d   :  { %768 = vmatpush2.msra.mxu0 %v2982_v51  ;;  %839 = vmatpush2.msra.mxu1 %v2985_v53  ;;  %4341 = vst [vmem:[#allocation63_spill] sm:$0xff] %v2994_v30  ;;  %4342 = vst [vmem:[#allocation74_spill] sm:$0xff] %v2997_v6  ;;  %v3000_v51 = vld [vmem:[#allocation7 + $0x388] sm:$0xff]  ;;  %v3003_v53 = vld [vmem:[#allocation7 + $0x398] sm:$0xff] }
 0x28e   :  { %769 = vmatprep.subr.mxu0 %v2988_v4  ;;  %840 = vmatprep.subr.mxu1 %v2991_v5  ;;  %4343 = vst [vmem:[#allocation65_spill] sm:$0xff] %v3000_v51  ;;  %4344 = vst [vmem:[#allocation67_spill] sm:$0xff] %v3003_v53  ;;  %v3006_v4 = vld [vmem:[#allocation7 + $0x380] sm:$0xff]  ;;  %v3009_v5 = vld [vmem:[#allocation7 + $0x390] sm:$0xff] }
 0x28f   :  { %770 = vmatpush2.msra.mxu0 %v2994_v30  ;;  %841 = vmatpush2.msra.mxu1 %v2997_v6  ;;  %4345 = vst [vmem:[#allocation78_spill] sm:$0xff] %v3006_v4  ;;  %4346 = vst [vmem:[#allocation69_spill] sm:$0xff] %v3009_v5  ;;  %v3012_v30 = vld [vmem:[#allocation7 + $0x368] sm:$0xff]  ;;  %v3015_v6 = vld [vmem:[#allocation7 + $0x378] sm:$0xff] }
 0x290   :  { %771 = vmatprep.subr.mxu0 %v3000_v51  ;;  %842 = vmatprep.subr.mxu1 %v3003_v53  ;;  %4347 = vst [vmem:[#allocation71_spill] sm:$0xff] %v3012_v30  ;;  %4348 = vst [vmem:[#allocation73_spill] sm:$0xff] %v3015_v6  ;;  %v3018_v51 = vld [vmem:[#allocation7 + $0x360] sm:$0xff]  ;;  %v3021_v53 = vld [vmem:[#allocation7 + $0x370] sm:$0xff] }
 0x291   :  { %772 = vmatpush2.msra.mxu0 %v3006_v4  ;;  %843 = vmatpush2.msra.mxu1 %v3009_v5  ;;  %4349 = vst [vmem:[#allocation75_spill] sm:$0xff] %v3018_v51  ;;  %4350 = vst [vmem:[#allocation86_spill] sm:$0xff] %v3021_v53  ;;  %v3024_v4 = vld [vmem:[#allocation7 + $0x348] sm:$0xff]  ;;  %v3027_v5 = vld [vmem:[#allocation7 + $0x358] sm:$0xff] }
 0x292   :  { %773 = vmatprep.subr.mxu0 %v3012_v30  ;;  %844 = vmatprep.subr.mxu1 %v3015_v6  ;;  %4351 = vst [vmem:[#allocation77_spill] sm:$0xff] %v3024_v4  ;;  %4352 = vst [vmem:[#allocation88_spill] sm:$0xff] %v3027_v5  ;;  %v3030_v30 = vld [vmem:[#allocation7 + $0x340] sm:$0xff]  ;;  %v3033_v6 = vld [vmem:[#allocation7 + $0x350] sm:$0xff] }
 0x293   :  { %774 = vmatpush2.msra.mxu0 %v3018_v51  ;;  %845 = vmatpush2.msra.mxu1 %v3021_v53  ;;  %4353 = vst [vmem:[#allocation79_spill] sm:$0xff] %v3030_v30  ;;  %4354 = vst [vmem:[#allocation90_spill] sm:$0xff] %v3033_v6  ;;  %v3036_v51 = vld [vmem:[#allocation7 + $0x328] sm:$0xff]  ;;  %v3040_v53 = vld [vmem:[#allocation7 + $0x320] sm:$0xff] }
 0x294   :  { %775 = vmatprep.subr.mxu0 %v3024_v4  ;;  %846 = vmatprep.subr.mxu1 %v3027_v5  ;;  %4355 = vst [vmem:[#allocation81_spill] sm:$0xff] %v3036_v51  ;;  %4356 = vst [vmem:[#allocation92_spill] sm:$0xff] %v3040_v53  ;;  %v3044_v5 = vld [vmem:[#allocation7 + $0x308] sm:$0xff] }
 0x295   :  { %776 = vmatpush2.msra.mxu0 %v3030_v30  ;;  %847 = vmatpush2.msra.mxu1 %v3033_v6  ;;  %4357 = vst [vmem:[#allocation83_spill] sm:$0xff] %v3044_v5  ;;  %v3048_v30 = vld [vmem:[#allocation7 + $0x300] sm:$0xff] }
 0x296   :  { %777 = vmatprep.subr.mxu0 %v3036_v51  ;;  %848 = vmatprep.subr.mxu1 %v4250_v0  ;;  %4358 = vst [vmem:[#allocation94_spill] sm:$0xff] %v3048_v30  ;;  %v3052_v51 = vld [vmem:[#allocation7 + $0x2e8] sm:$0xff]  ;;  %v3056_v0 = vld [vmem:[#allocation7 + $0x2e0] sm:$0xff] }
 0x297   :  { %778 = vmatpush2.msra.mxu0 %v3040_v53  ;;  %849 = vmatpush2.msra.mxu1 %v4252_v52  ;;  %4359 = vst [vmem:[#allocation85_spill] sm:$0xff] %v3052_v51  ;;  %4360 = vst [vmem:[#allocation95_spill] sm:$0xff] %v3056_v0  ;;  %v3060_v52 = vld [vmem:[#allocation7 + $0x2c8] sm:$0xff] }
 0x298   :  { %779 = vmatprep.subr.mxu0 %v3044_v5  ;;  %850 = vmatprep.subr.mxu1 %v4254_v54  ;;  %4361 = vst [vmem:[#allocation87_spill] sm:$0xff] %v3060_v52  ;;  %v3064_v54 = vld [vmem:[#allocation7 + $0x2c0] sm:$0xff] }
 0x299   :  { %780 = vmatpush2.msra.mxu0 %v3048_v30  ;;  %851 = vmatpush2.msra.mxu1 %v4256_v56  ;;  %4362 = vst [vmem:[#allocation96_spill] sm:$0xff] %v3064_v54  ;;  %v3068_v56 = vld [vmem:[#allocation7 + $0x2a8] sm:$0xff] }
 0x29a   :  { %781 = vmatprep.subr.mxu0 %v3052_v51  ;;  %852 = vmatprep.subr.mxu1 %v4258_v48  ;;  %4363 = vst [vmem:[#allocation89_spill] sm:$0xff] %v3068_v56  ;;  %v3072_v48 = vld [vmem:[#allocation7 + $0x2a0] sm:$0xff] }
 0x29b   :  { %782 = vmatpush2.msra.mxu0 %v3056_v0  ;;  %853 = vmatpush2.msra.mxu1 %v4187_v50  ;;  %4364 = vst [vmem:[#allocation97_spill] sm:$0xff] %v3072_v48 }
 0x29c   :  { %783 = vmatprep.subr.mxu0 %v3060_v52  ;;  %854 = vmatprep.subr.mxu1 %v4261_v3 }
 0x29d   :  { %784 = vmatpush2.msra.mxu0 %v3064_v54  ;;  %855 = vmatpush2.msra.mxu1 %v4191_v58 }
 0x29e   :  { %785 = vmatprep.subr.mxu0 %v3068_v56  ;;  %856 = vmatprep.subr.mxu1 %v4193_v42 }
 0x29f   :  { %786 = vmatpush2.msra.mxu0 %v3072_v48  ;;  %857 = vmatpush2.msra.mxu1 %v4195_v40 }
 0x2a0   :  { %787 = vmatprep.subr.mxu0 %v4265_v7  ;;  %858 = vmatprep.subr.mxu1 %v4266_v8 }
 0x2a1   :  { %788 = vmatpush2.msra.mxu0 %v4267_v10  ;;  %859 = vmatpush2.msra.mxu1 %v4268_v11 }
 0x2a2   :  { %789 = vmatprep.subr.mxu0 %v4269_v12  ;;  %860 = vmatprep.subr.mxu1 %v4270_v13 }
 0x2a3   :  { %790 = vmatpush2.msra.mxu0 %v4271_v14  ;;  %861 = vmatpush2.msra.mxu1 %v4272_v15 }
 0x2a4   :  { %791 = vmatprep.subr.mxu0 %v4273_v16  ;;  %862 = vmatprep.subr.mxu1 %v4274_v17 }
 0x2a5   :  { %792 = vmatpush2.msra.mxu0 %v4275_v18  ;;  %863 = vmatpush2.msra.mxu1 %v4276_v19 }
 0x2a6   :  { %793 = vmatprep.subr.mxu0 %v4277_v20  ;;  %864 = vmatprep.subr.mxu1 %v4278_v21 }
 0x2a7   :  { %794 = vmatpush2.msra.mxu0 %v4279_v22  ;;  %865 = vmatpush2.msra.mxu1 %v4280_v23 }
 0x2a8   :  { %795 = vmatprep.subr.mxu0 %v4281_v24  ;;  %866 = vmatprep.subr.mxu1 %v4282_v25 }
 0x2a9   :  { %796 = vmatpush2.msra.mxu0 %v4283_v26  ;;  %867 = vmatpush2.msra.mxu1 %v4284_v27 }
 0x2aa   :  { %902 = vmatprep.subr.mxu0 %v2760_v28  ;;  %973 = vmatprep.subr.mxu1 %v2763_v29 }
 0x32a   :  { %v630_v40 = vpop.f32.mrf.mxu0  ;;  %v701_v8 = vpop.f32.mrf.mxu1 }
 0x32b   :  { %v631_v42 = vadd.f32 %v630_v40, %v4287_v31  ;;  %v702_v12 = vadd.f32 %v701_v8, %v2623_v61  ;;  %v4371_v8 = vld [vmem:[#allocation18_spill] sm:$0xff] }
 0x32c   :  { %v632_v50 = vpop.f32.mrf.mxu0  ;;  %v703_v10 = vpop.f32.mrf.mxu1 }
 0x32d   :  { %v1555_v58 = vmul.f32 -1.442695, %v631_v42  ;;  %v633_v3 = vadd.f32 %v632_v50, %v4288_v35  ;;  %v704_v11 = vadd.f32 %v703_v10, %v2621_v44  ;;  %v732_v42 = vld [vmem:[#allocation2 + $0x18] sm:$0xff]  ;;  %v4367_v50 = vld [vmem:[#allocation16_spill] sm:$0xff] }
 0x32e   :  { %v4372_v10 = vld [vmem:[#allocation28_spill] sm:$0xff] }
 0x32f   :  { %1721 = vpow2.f32 %v1555_v58  ;;  %v1556_v7 = vmul.f32 -1.442695, %v633_v3  ;;  %v1557_v13 = vmul.f32 -1.442695, %v704_v11  ;;  %v4368_v58 = vld [vmem:[#allocation24_spill] sm:$0xff]  ;;  %v4369_v3 = vld [vmem:[#allocation17_spill] sm:$0xff] }
 0x330   :  { %v4373_v11 = vld [vmem:[#allocation19_spill] sm:$0xff] }
 0x331   :  { %1723 = vpow2.f32 %v1556_v7  ;;  %v4370_v7 = vld [vmem:[#allocation26_spill] sm:$0xff] }
 0x332   :  { %1725 = vtanh.f32 %v702_v12  ;;  %v4374_v12 = vld [vmem:[#allocation30_spill] sm:$0xff] }
 0x333   :  { %1727 = vpow2.f32 %v1557_v13  ;;  %v4375_v13 = vld [vmem:[#allocation21_spill] sm:$0xff] }
 0x33c   :  { %v1722_v14 = vpop.eup %1721 }
 0x33d   :  { %v709_v15 = vadd.f32 1.0, %v1722_v14  ;;  %v4376_v14 = vld [vmem:[#allocation32_spill] sm:$0xff] }
 0x33e   :  { %v1724_v16 = vpop.eup %1723 }
 0x33f   :  { %1729 = vrcp.f32 %v709_v15  ;;  %v715_v17 = vadd.f32 1.0, %v1724_v16  ;;  %v1726_v18 = vpop.eup %1725  ;;  %v4377_v15 = vld [vmem:[#allocation23_spill] sm:$0xff]  ;;  %v4378_v16 = vld [vmem:[#allocation34_spill] sm:$0xff] }
 0x340   :  { %v1728_v19 = vpop.eup %1727 }
 0x341   :  { %1731 = vrcp.f32 %v715_v17  ;;  %v722_v22 = vadd.f32 1.0, %v1728_v19  ;;  %v4379_v17 = vld [vmem:[#allocation25_spill] sm:$0xff]  ;;  %v4381_v19 = vld [vmem:[#allocation27_spill] sm:$0xff] }
 0x343   :  { %1733 = vrcp.f32 %v722_v22  ;;  %v4384_v22 = vld [vmem:[#allocation40_spill] sm:$0xff] }
 0x34c   :  { %v1730_v20 = vpop.eup %1729 }
 0x34d   :  { %v726_v24 = vmul.f32 %v1730_v20, %v1726_v18  ;;  %v4380_v18 = vld [vmem:[#allocation36_spill] sm:$0xff]  ;;  %v4382_v20 = vld [vmem:[#allocation38_spill] sm:$0xff] }
 0x34e   :  { %v1732_v21 = vpop.eup %1731 }
 0x34f   :  { %v725_v23 = vmul.f32 %v1732_v21, %v2771_v2  ;;  %v4366_v2 = vld [vmem:[#allocation22_spill] sm:$0xff]  ;;  %v4383_v21 = vld [vmem:[#allocation29_spill] sm:$0xff] }
 0x350   :  { %v1734_v26 = vpop.eup %1733 }
 0x351   :  { %v3103_v25 = vadd.f32 %v726_v24, %v725_v23  ;;  %v4385_v23 = vld [vmem:[#allocation31_spill] sm:$0xff]  ;;  %v4386_v24 = vld [vmem:[#allocation42_spill] sm:$0xff] }
 0x353   :  { %1735 = vtanh.f32 %v3103_v25 }
 0x360   :  { %v1736_v27 = vpop.eup %1735 }
 0x361   :  { %v3106_v40 = vmul.f32 %v1736_v27, %v1734_v26  ;;  %v4387_v26 = vld [vmem:[#allocation33_spill] sm:$0xff]  ;;  %v4388_v27 = vld [vmem:[#allocation44_spill] sm:$0xff] }
 0x363   :  { %4365 = vst [vmem:[#allocation91_spill] sm:$0xff] %v3106_v40  ;;  %797 = vmatprep.mubr.f32.mxu0 %v3106_v40  ;;  %868 = vmatprep.mubr.f32.mxu1 %v3106_v40  ;;  %v4390_v40 = vld [vmem:[#allocation46_spill] sm:$0xff] }
 0x364   :  { %798 = vmatmul.mubr.f32.vlgmr.msra.gmra.mxu0 %v732_v42  ;;  %869 = vmatmul.mubr.f32.vlgmr.msra.gmra.mxu1 %v732_v42  ;;  %v4389_v42 = vld [vmem:[#allocation35_spill] sm:$0xff] }
 0x365   :  { %903 = vmatpush1.msra.mxu0 %v2778_v32  ;;  %974 = vmatpush1.msra.mxu1 %v2781_v49 }
 0x366   :  { %904 = vmatprep.subr.mxu0 %v2784_v33  ;;  %975 = vmatprep.subr.mxu1 %v2787_v34 }
 0x367   :  { %905 = vmatpush1.msra.mxu0 %v2790_v36  ;;  %976 = vmatpush1.msra.mxu1 %v2793_v37 }
 0x368   :  { %906 = vmatprep.subr.mxu0 %v2796_v38  ;;  %977 = vmatprep.subr.mxu1 %v2799_v39 }
 0x369   :  { %907 = vmatpush1.msra.mxu0 %v2802_v41  ;;  %978 = vmatpush1.msra.mxu1 %v2805_v43 }
 0x36a   :  { %908 = vmatprep.subr.mxu0 %v2808_v45  ;;  %979 = vmatprep.subr.mxu1 %v2811_v47 }
 0x36b   :  { %909 = vmatpush1.msra.mxu0 %v2814_v1  ;;  %980 = vmatpush1.msra.mxu1 %v2817_v59 }
 0x36c   :  { %910 = vmatprep.subr.mxu0 %v2820_v60  ;;  %981 = vmatprep.subr.mxu1 %v2823_v62 }
 0x36d   :  { %911 = vmatpush1.msra.mxu0 %v2826_v63  ;;  %982 = vmatpush1.msra.mxu1 %v2829_v57 }
 0x36e   :  { %912 = vmatprep.subr.mxu0 %v2832_v9  ;;  %983 = vmatprep.subr.mxu1 %v2835_v55 }
 0x36f   :  { %913 = vmatpush1.msra.mxu0 %v2838_v46  ;;  %984 = vmatpush1.msra.mxu1 %v4366_v2 }
 0x370   :  { %914 = vmatprep.subr.mxu0 %v4367_v50  ;;  %985 = vmatprep.subr.mxu1 %v4368_v58 }
 0x371   :  { %915 = vmatpush1.msra.mxu0 %v4369_v3  ;;  %986 = vmatpush1.msra.mxu1 %v4370_v7 }
 0x372   :  { %916 = vmatprep.subr.mxu0 %v4371_v8  ;;  %987 = vmatprep.subr.mxu1 %v4372_v10 }
 0x373   :  { %917 = vmatpush1.msra.mxu0 %v4373_v11  ;;  %988 = vmatpush1.msra.mxu1 %v4374_v12 }
 0x374   :  { %918 = vmatprep.subr.mxu0 %v4375_v13  ;;  %989 = vmatprep.subr.mxu1 %v4376_v14 }
 0x375   :  { %919 = vmatpush1.msra.mxu0 %v4377_v15  ;;  %990 = vmatpush1.msra.mxu1 %v4378_v16 }
 0x376   :  { %920 = vmatprep.subr.mxu0 %v4379_v17  ;;  %991 = vmatprep.subr.mxu1 %v4380_v18  ;;  %v4391_v18 = vld [vmem:[#allocation37_spill] sm:$0xff] }
 0x377   :  { %921 = vmatpush1.msra.mxu0 %v4381_v19  ;;  %992 = vmatpush1.msra.mxu1 %v4382_v20  ;;  %v4392_v19 = vld [vmem:[#allocation48_spill] sm:$0xff]  ;;  %v4393_v20 = vld [vmem:[#allocation39_spill] sm:$0xff] }
 0x378   :  { %922 = vmatprep.subr.mxu0 %v4383_v21  ;;  %993 = vmatprep.subr.mxu1 %v4384_v22  ;;  %v4394_v21 = vld [vmem:[#allocation50_spill] sm:$0xff]  ;;  %v4395_v22 = vld [vmem:[#allocation41_spill] sm:$0xff] }
 0x379   :  { %923 = vmatpush1.msra.mxu0 %v4385_v23  ;;  %994 = vmatpush1.msra.mxu1 %v4386_v24  ;;  %v4396_v23 = vld [vmem:[#allocation52_spill] sm:$0xff]  ;;  %v4397_v24 = vld [vmem:[#allocation43_spill] sm:$0xff] }
 0x37a   :  { %924 = vmatprep.subr.mxu0 %v4387_v26  ;;  %995 = vmatprep.subr.mxu1 %v4388_v27  ;;  %v4398_v26 = vld [vmem:[#allocation54_spill] sm:$0xff]  ;;  %v4399_v27 = vld [vmem:[#allocation45_spill] sm:$0xff] }
 0x37b   :  { %925 = vmatpush1.msra.mxu0 %v4389_v42  ;;  %996 = vmatpush1.msra.mxu1 %v4390_v40  ;;  %v4400_v42 = vld [vmem:[#allocation56_spill] sm:$0xff]  ;;  %v4401_v40 = vld [vmem:[#allocation47_spill] sm:$0xff] }
 0x37c   :  { %926 = vmatprep.subr.mxu0 %v4391_v18  ;;  %997 = vmatprep.subr.mxu1 %v4392_v19  ;;  %v4402_v18 = vld [vmem:[#allocation58_spill] sm:$0xff]  ;;  %v4403_v19 = vld [vmem:[#allocation49_spill] sm:$0xff] }
 0x37d   :  { %927 = vmatpush1.msra.mxu0 %v4393_v20  ;;  %998 = vmatpush1.msra.mxu1 %v4394_v21  ;;  %v4404_v20 = vld [vmem:[#allocation60_spill] sm:$0xff]  ;;  %v4405_v21 = vld [vmem:[#allocation51_spill] sm:$0xff] }
 0x37e   :  { %928 = vmatprep.subr.mxu0 %v4395_v22  ;;  %999 = vmatprep.subr.mxu1 %v4396_v23  ;;  %v4406_v22 = vld [vmem:[#allocation62_spill] sm:$0xff]  ;;  %v4407_v23 = vld [vmem:[#allocation53_spill] sm:$0xff] }
 0x37f   :  { %929 = vmatpush1.msra.mxu0 %v4397_v24  ;;  %1000 = vmatpush1.msra.mxu1 %v4398_v26  ;;  %v4408_v24 = vld [vmem:[#allocation64_spill] sm:$0xff]  ;;  %v4409_v26 = vld [vmem:[#allocation55_spill] sm:$0xff] }
 0x380   :  { %930 = vmatprep.subr.mxu0 %v4399_v27  ;;  %1001 = vmatprep.subr.mxu1 %v4400_v42  ;;  %v4410_v27 = vld [vmem:[#allocation66_spill] sm:$0xff]  ;;  %v4411_v42 = vld [vmem:[#allocation57_spill] sm:$0xff] }
 0x381   :  { %931 = vmatpush1.msra.mxu0 %v4401_v40  ;;  %1002 = vmatpush1.msra.mxu1 %v4402_v18  ;;  %v4412_v40 = vld [vmem:[#allocation68_spill] sm:$0xff]  ;;  %v4413_v18 = vld [vmem:[#allocation59_spill] sm:$0xff] }
 0x382   :  { %932 = vmatprep.subr.mxu0 %v4403_v19  ;;  %1003 = vmatprep.subr.mxu1 %v4404_v20  ;;  %v4414_v19 = vld [vmem:[#allocation70_spill] sm:$0xff]  ;;  %v4415_v20 = vld [vmem:[#allocation61_spill] sm:$0xff] }
 0x383   :  { %933 = vmatpush1.msra.mxu0 %v4405_v21  ;;  %1004 = vmatpush1.msra.mxu1 %v4406_v22  ;;  %v4416_v21 = vld [vmem:[#allocation72_spill] sm:$0xff]  ;;  %v4417_v22 = vld [vmem:[#allocation63_spill] sm:$0xff] }
 0x384   :  { %934 = vmatprep.subr.mxu0 %v4407_v23  ;;  %1005 = vmatprep.subr.mxu1 %v4408_v24  ;;  %v4418_v23 = vld [vmem:[#allocation74_spill] sm:$0xff]  ;;  %v4419_v24 = vld [vmem:[#allocation65_spill] sm:$0xff] }
 0x385   :  { %935 = vmatpush2.msra.mxu0 %v4409_v26  ;;  %1006 = vmatpush2.msra.mxu1 %v4410_v27  ;;  %v4420_v26 = vld [vmem:[#allocation67_spill] sm:$0xff]  ;;  %v4421_v27 = vld [vmem:[#allocation78_spill] sm:$0xff] }
 0x386   :  { %936 = vmatprep.subr.mxu0 %v4411_v42  ;;  %1007 = vmatprep.subr.mxu1 %v4412_v40  ;;  %v4422_v42 = vld [vmem:[#allocation69_spill] sm:$0xff]  ;;  %v4423_v40 = vld [vmem:[#allocation71_spill] sm:$0xff] }
 0x387   :  { %937 = vmatpush2.msra.mxu0 %v4413_v18  ;;  %1008 = vmatpush2.msra.mxu1 %v4414_v19  ;;  %v4424_v18 = vld [vmem:[#allocation73_spill] sm:$0xff]  ;;  %v4425_v19 = vld [vmem:[#allocation75_spill] sm:$0xff] }
 0x388   :  { %938 = vmatprep.subr.mxu0 %v4415_v20  ;;  %1009 = vmatprep.subr.mxu1 %v4416_v21  ;;  %v4426_v20 = vld [vmem:[#allocation86_spill] sm:$0xff] }
 0x389   :  { %939 = vmatpush2.msra.mxu0 %v4417_v22  ;;  %1010 = vmatpush2.msra.mxu1 %v4418_v23  ;;  %v4427_v22 = vld [vmem:[#allocation88_spill] sm:$0xff]  ;;  %v4428_v23 = vld [vmem:[#allocation79_spill] sm:$0xff] }
 0x38a   :  { %940 = vmatprep.subr.mxu0 %v4419_v24  ;;  %1011 = vmatprep.subr.mxu1 %v4420_v26  ;;  %v4429_v26 = vld [vmem:[#allocation81_spill] sm:$0xff] }
 0x38b   :  { %941 = vmatpush2.msra.mxu0 %v4421_v27  ;;  %1012 = vmatpush2.msra.mxu1 %v4422_v42  ;;  %v3197_v27 = vld [vmem:[#allocation7 + $0x338] sm:$0xff] }
 0x38c   :  { %942 = vmatprep.subr.mxu0 %v4423_v40  ;;  %1013 = vmatprep.subr.mxu1 %v4424_v18  ;;  %4430 = vst [vmem:[#allocation98_spill] sm:$0xff] %v3197_v27  ;;  %v3201_v18 = vld [vmem:[#allocation7 + $0x330] sm:$0xff] }
 0x38d   :  { %943 = vmatpush2.msra.mxu0 %v4425_v19  ;;  %1014 = vmatpush2.msra.mxu1 %v4426_v20  ;;  %4431 = vst [vmem:[#allocation93_spill] sm:$0xff] %v3201_v18 }
 0x38e   :  { %944 = vmatprep.subr.mxu0 %v3024_v4  ;;  %1015 = vmatprep.subr.mxu1 %v4427_v22  ;;  %v3205_v4 = vld [vmem:[#allocation7 + $0x318] sm:$0xff] }
 0x38f   :  { %945 = vmatpush2.msra.mxu0 %v4428_v23  ;;  %1016 = vmatpush2.msra.mxu1 %v3033_v6  ;;  %4432 = vst [vmem:[#allocation99_spill] sm:$0xff] %v3205_v4  ;;  %v3209_v6 = vld [vmem:[#allocation7 + $0x310] sm:$0xff] }
 0x390   :  { %946 = vmatprep.subr.mxu0 %v4429_v26  ;;  %1017 = vmatprep.subr.mxu1 %v3197_v27  ;;  %4433 = vst [vmem:[#allocation22_spill] sm:$0xff] %v3209_v6  ;;  %v3213_v27 = vld [vmem:[#allocation7 + $0x2f8] sm:$0xff] }
 0x391   :  { %947 = vmatpush2.msra.mxu0 %v3040_v53  ;;  %1018 = vmatpush2.msra.mxu1 %v3201_v18  ;;  %4434 = vst [vmem:[#allocation16_spill] sm:$0xff] %v3213_v27  ;;  %v3217_v18 = vld [vmem:[#allocation7 + $0x2f0] sm:$0xff] }
 0x392   :  { %948 = vmatprep.subr.mxu0 %v3044_v5  ;;  %1019 = vmatprep.subr.mxu1 %v3205_v4  ;;  %4435 = vst [vmem:[#allocation24_spill] sm:$0xff] %v3217_v18  ;;  %v3221_v4 = vld [vmem:[#allocation7 + $0x2d8] sm:$0xff] }
 0x393   :  { %949 = vmatpush2.msra.mxu0 %v3048_v30  ;;  %1020 = vmatpush2.msra.mxu1 %v3209_v6  ;;  %4436 = vst [vmem:[#allocation17_spill] sm:$0xff] %v3221_v4  ;;  %v3225_v6 = vld [vmem:[#allocation7 + $0x2d0] sm:$0xff] }
 0x394   :  { %950 = vmatprep.subr.mxu0 %v3052_v51  ;;  %1021 = vmatprep.subr.mxu1 %v3213_v27  ;;  %4437 = vst [vmem:[#allocation26_spill] sm:$0xff] %v3225_v6  ;;  %v3229_v27 = vld [vmem:[#allocation7 + $0x2b8] sm:$0xff] }
 0x395   :  { %951 = vmatpush2.msra.mxu0 %v3056_v0  ;;  %1022 = vmatpush2.msra.mxu1 %v3217_v18  ;;  %4438 = vst [vmem:[#allocation18_spill] sm:$0xff] %v3229_v27  ;;  %v3233_v18 = vld [vmem:[#allocation7 + $0x2b0] sm:$0xff] }
 0x396   :  { %952 = vmatprep.subr.mxu0 %v3060_v52  ;;  %1023 = vmatprep.subr.mxu1 %v3221_v4  ;;  %4439 = vst [vmem:[#allocation28_spill] sm:$0xff] %v3233_v18  ;;  %v3236_v52 = vld [vmem:[#allocation7 + $0x288] sm:$0xff] }
 0x397   :  { %953 = vmatpush2.msra.mxu0 %v3064_v54  ;;  %1024 = vmatpush2.msra.mxu1 %v3225_v6  ;;  %4440 = vst [vmem:[#allocation19_spill] sm:$0xff] %v3236_v52  ;;  %v3239_v54 = vld [vmem:[#allocation7 + $0x298] sm:$0xff]  ;;  %v3242_v6 = vld [vmem:[#allocation7 + $0x280] sm:$0xff] }
 0x398   :  { %954 = vmatprep.subr.mxu0 %v3068_v56  ;;  %1025 = vmatprep.subr.mxu1 %v3229_v27  ;;  %4441 = vst [vmem:[#allocation30_spill] sm:$0xff] %v3239_v54  ;;  %4442 = vst [vmem:[#allocation21_spill] sm:$0xff] %v3242_v6  ;;  %v3245_v56 = vld [vmem:[#allocation7 + $0x290] sm:$0xff] }
 0x399   :  { %955 = vmatpush2.msra.mxu0 %v3072_v48  ;;  %1026 = vmatpush2.msra.mxu1 %v3233_v18  ;;  %4443 = vst [vmem:[#allocation32_spill] sm:$0xff] %v3245_v56  ;;  %v3248_v48 = vld [vmem:[#allocation7 + $0x268] sm:$0xff]  ;;  %v3251_v18 = vld [vmem:[#allocation7 + $0x278] sm:$0xff] }
 0x39a   :  { %956 = vmatprep.subr.mxu0 %v3236_v52  ;;  %1027 = vmatprep.subr.mxu1 %v3239_v54  ;;  %4444 = vst [vmem:[#allocation23_spill] sm:$0xff] %v3248_v48  ;;  %4445 = vst [vmem:[#allocation34_spill] sm:$0xff] %v3251_v18  ;;  %v3254_v52 = vld [vmem:[#allocation7 + $0x260] sm:$0xff]  ;;  %v3257_v54 = vld [vmem:[#allocation7 + $0x270] sm:$0xff] }
 0x39b   :  { %957 = vmatpush2.msra.mxu0 %v3242_v6  ;;  %1028 = vmatpush2.msra.mxu1 %v3245_v56  ;;  %4446 = vst [vmem:[#allocation25_spill] sm:$0xff] %v3254_v52  ;;  %4447 = vst [vmem:[#allocation100_spill] sm:$0xff] %v3257_v54  ;;  %v3260_v6 = vld [vmem:[#allocation7 + $0x248] sm:$0xff]  ;;  %v3263_v56 = vld [vmem:[#allocation7 + $0x258] sm:$0xff] }
 0x39c   :  { %958 = vmatprep.subr.mxu0 %v3248_v48  ;;  %1029 = vmatprep.subr.mxu1 %v3251_v18  ;;  %4448 = vst [vmem:[#allocation101_spill] sm:$0xff] %v3260_v6  ;;  %4449 = vst [vmem:[#allocation102_spill] sm:$0xff] %v3263_v56  ;;  %v3266_v48 = vld [vmem:[#allocation7 + $0x240] sm:$0xff]  ;;  %v3269_v18 = vld [vmem:[#allocation7 + $0x250] sm:$0xff] }
 0x39d   :  { %959 = vmatpush2.msra.mxu0 %v3254_v52  ;;  %1030 = vmatpush2.msra.mxu1 %v3257_v54  ;;  %4450 = vst [vmem:[#allocation103_spill] sm:$0xff] %v3266_v48  ;;  %4451 = vst [vmem:[#allocation104_spill] sm:$0xff] %v3269_v18  ;;  %v3272_v52 = vld [vmem:[#allocation7 + $0x228] sm:$0xff]  ;;  %v3275_v54 = vld [vmem:[#allocation7 + $0x238] sm:$0xff] }
 0x39e   :  { %960 = vmatprep.subr.mxu0 %v3260_v6  ;;  %1031 = vmatprep.subr.mxu1 %v3263_v56  ;;  %4452 = vst [vmem:[#allocation105_spill] sm:$0xff] %v3272_v52  ;;  %4453 = vst [vmem:[#allocation106_spill] sm:$0xff] %v3275_v54  ;;  %v3278_v6 = vld [vmem:[#allocation7 + $0x220] sm:$0xff]  ;;  %v3281_v56 = vld [vmem:[#allocation7 + $0x230] sm:$0xff] }
 0x39f   :  { %961 = vmatpush2.msra.mxu0 %v3266_v48  ;;  %1032 = vmatpush2.msra.mxu1 %v3269_v18  ;;  %4454 = vst [vmem:[#allocation107_spill] sm:$0xff] %v3278_v6  ;;  %4455 = vst [vmem:[#allocation108_spill] sm:$0xff] %v3281_v56  ;;  %v3284_v48 = vld [vmem:[#allocation7 + $0x208] sm:$0xff]  ;;  %v3287_v18 = vld [vmem:[#allocation7 + $0x218] sm:$0xff] }
 0x3a0   :  { %962 = vmatprep.subr.mxu0 %v3272_v52  ;;  %1033 = vmatprep.subr.mxu1 %v3275_v54  ;;  %4456 = vst [vmem:[#allocation109_spill] sm:$0xff] %v3284_v48  ;;  %4457 = vst [vmem:[#allocation110_spill] sm:$0xff] %v3287_v18  ;;  %v3290_v52 = vld [vmem:[#allocation7 + $0x200] sm:$0xff]  ;;  %v3293_v54 = vld [vmem:[#allocation7 + $0x210] sm:$0xff] }
 0x3a1   :  { %963 = vmatpush2.msra.mxu0 %v3278_v6  ;;  %1034 = vmatpush2.msra.mxu1 %v3281_v56  ;;  %4458 = vst [vmem:[#allocation111_spill] sm:$0xff] %v3290_v52  ;;  %4459 = vst [vmem:[#allocation112_spill] sm:$0xff] %v3293_v54 }
 0x3a2   :  { %964 = vmatprep.subr.mxu0 %v3284_v48  ;;  %1035 = vmatprep.subr.mxu1 %v3287_v18 }
 0x3a3   :  { %965 = vmatpush2.msra.mxu0 %v3290_v52  ;;  %1036 = vmatpush2.msra.mxu1 %v3293_v54 }
 0x3a4   :  { %1071 = vmatprep.subr.mxu0 %v2760_v28  ;;  %1142 = vmatprep.subr.mxu1 %v2763_v29 }
 0x424   :  { %v799_v56 = vpop.f32.mrf.mxu0  ;;  %v870_v0 = vpop.f32.mrf.mxu1 }
 0x425   :  { %v800_v6 = vadd.f32 %v799_v56, %v4287_v31  ;;  %v871_v54 = vadd.f32 %v870_v0, %v2623_v61 }
 0x426   :  { %v801_v48 = vpop.f32.mrf.mxu0  ;;  %v872_v52 = vpop.f32.mrf.mxu1 }
 0x427   :  { %v1558_v27 = vmul.f32 -1.442695, %v800_v6  ;;  %v802_v4 = vadd.f32 %v801_v48, %v4288_v35  ;;  %v873_v51 = vadd.f32 %v872_v52, %v2621_v44 }
 0x429   :  { %1737 = vpow2.f32 %v1558_v27  ;;  %v1559_v18 = vmul.f32 -1.442695, %v802_v4  ;;  %v1560_v30 = vmul.f32 -1.442695, %v873_v51 }
 0x42b   :  { %1739 = vpow2.f32 %v1559_v18 }
 0x42c   :  { %1741 = vtanh.f32 %v871_v54  ;;  %v4465_v54 = vld [vmem:[#allocation40_spill] sm:$0xff] }
 0x42d   :  { %1743 = vpow2.f32 %v1560_v30  ;;  %v4464_v30 = vld [vmem:[#allocation29_spill] sm:$0xff] }
 0x436   :  { %v1738_v28 = vpop.eup %1737 }
 0x437   :  { %v878_v5 = vadd.f32 1.0, %v1738_v28 }
 0x438   :  { %v1740_v29 = vpop.eup %1739 }
 0x439   :  { %1745 = vrcp.f32 %v878_v5  ;;  %v884_v56 = vadd.f32 1.0, %v1740_v29  ;;  %v1742_v6 = vpop.eup %1741  ;;  %v901_v5 = vld [vmem:[#allocation2 + $0x20] sm:$0xff] }
 0x43a   :  { %v1744_v48 = vpop.eup %1743  ;;  %v4461_v29 = vld [vmem:[#allocation36_spill] sm:$0xff] }
 0x43b   :  { %1747 = vrcp.f32 %v884_v56  ;;  %v891_v35 = vadd.f32 1.0, %v1744_v48  ;;  %v4467_v56 = vld [vmem:[#allocation42_spill] sm:$0xff]  ;;  %v4469_v48 = vld [vmem:[#allocation44_spill] sm:$0xff] }
 0x43d   :  { %1749 = vrcp.f32 %v891_v35  ;;  %v4463_v35 = vld [vmem:[#allocation38_spill] sm:$0xff] }
 0x446   :  { %v1746_v27 = vpop.eup %1745 }
 0x447   :  { %v895_v31 = vmul.f32 %v1746_v27, %v1742_v6  ;;  %v4468_v6 = vld [vmem:[#allocation33_spill] sm:$0xff]  ;;  %v4470_v27 = vld [vmem:[#allocation35_spill] sm:$0xff] }
 0x448   :  { %v1748_v4 = vpop.eup %1747 }
 0x449   :  { %v894_v18 = vmul.f32 %v1748_v4, %v3103_v25  ;;  %v4466_v25 = vld [vmem:[#allocation31_spill] sm:$0xff]  ;;  %v4471_v4 = vld [vmem:[#allocation46_spill] sm:$0xff] }
 0x44a   :  { %v1750_v51 = vpop.eup %1749 }
 0x44b   :  { %v3303_v52 = vadd.f32 %v895_v31, %v894_v18  ;;  %v4462_v31 = vld [vmem:[#allocation27_spill] sm:$0xff]  ;;  %v4472_v18 = vld [vmem:[#allocation37_spill] sm:$0xff] }
 0x44d   :  { %1751 = vtanh.f32 %v3303_v52 }
 0x45a   :  { %v1752_v28 = vpop.eup %1751 }
 0x45b   :  { %v3306_v0 = vmul.f32 %v1752_v28, %v1750_v51  ;;  %v4473_v51 = vld [vmem:[#allocation48_spill] sm:$0xff]  ;;  %v4474_v28 = vld [vmem:[#allocation39_spill] sm:$0xff] }
 0x45d   :  { %4460 = vst [vmem:[#allocation113_spill] sm:$0xff] %v3306_v0  ;;  %966 = vmatprep.mubr.f32.mxu0 %v3306_v0  ;;  %1037 = vmatprep.mubr.f32.mxu1 %v3306_v0  ;;  %v4476_v0 = vld [vmem:[#allocation41_spill] sm:$0xff] }
 0x45e   :  { %967 = vmatmul.mubr.f32.vlgmr.msra.gmra.mxu0 %v901_v5  ;;  %1038 = vmatmul.mubr.f32.vlgmr.msra.gmra.mxu1 %v901_v5  ;;  %v4475_v5 = vld [vmem:[#allocation50_spill] sm:$0xff] }
 0x45f   :  { %1072 = vmatpush1.msra.mxu0 %v2778_v32  ;;  %1143 = vmatpush1.msra.mxu1 %v2781_v49 }
 0x460   :  { %1073 = vmatprep.subr.mxu0 %v2784_v33  ;;  %1144 = vmatprep.subr.mxu1 %v2787_v34 }
 0x461   :  { %1074 = vmatpush1.msra.mxu0 %v2790_v36  ;;  %1145 = vmatpush1.msra.mxu1 %v2793_v37 }
 0x462   :  { %1075 = vmatprep.subr.mxu0 %v2796_v38  ;;  %1146 = vmatprep.subr.mxu1 %v2799_v39 }
 0x463   :  { %1076 = vmatpush1.msra.mxu0 %v2802_v41  ;;  %1147 = vmatpush1.msra.mxu1 %v2805_v43 }
 0x464   :  { %1077 = vmatprep.subr.mxu0 %v2808_v45  ;;  %1148 = vmatprep.subr.mxu1 %v2811_v47 }
 0x465   :  { %1078 = vmatpush1.msra.mxu0 %v2814_v1  ;;  %1149 = vmatpush1.msra.mxu1 %v2817_v59 }
 0x466   :  { %1079 = vmatprep.subr.mxu0 %v2820_v60  ;;  %1150 = vmatprep.subr.mxu1 %v2823_v62 }
 0x467   :  { %1080 = vmatpush1.msra.mxu0 %v2826_v63  ;;  %1151 = vmatpush1.msra.mxu1 %v2829_v57 }
 0x468   :  { %1081 = vmatprep.subr.mxu0 %v2832_v9  ;;  %1152 = vmatprep.subr.mxu1 %v2835_v55 }
 0x469   :  { %1082 = vmatpush1.msra.mxu0 %v2838_v46  ;;  %1153 = vmatpush1.msra.mxu1 %v4366_v2 }
 0x46a   :  { %1083 = vmatprep.subr.mxu0 %v4367_v50  ;;  %1154 = vmatprep.subr.mxu1 %v4368_v58 }
 0x46b   :  { %1084 = vmatpush1.msra.mxu0 %v4369_v3  ;;  %1155 = vmatpush1.msra.mxu1 %v4370_v7 }
 0x46c   :  { %1085 = vmatprep.subr.mxu0 %v4371_v8  ;;  %1156 = vmatprep.subr.mxu1 %v4372_v10 }
 0x46d   :  { %1086 = vmatpush1.msra.mxu0 %v4373_v11  ;;  %1157 = vmatpush1.msra.mxu1 %v4374_v12 }
 0x46e   :  { %1087 = vmatprep.subr.mxu0 %v4375_v13  ;;  %1158 = vmatprep.subr.mxu1 %v4376_v14 }
 0x46f   :  { %1088 = vmatpush1.msra.mxu0 %v4377_v15  ;;  %1159 = vmatpush1.msra.mxu1 %v4378_v16 }
 0x470   :  { %1089 = vmatprep.subr.mxu0 %v4379_v17  ;;  %1160 = vmatprep.subr.mxu1 %v4461_v29 }
 0x471   :  { %1090 = vmatpush1.msra.mxu0 %v4462_v31  ;;  %1161 = vmatpush1.msra.mxu1 %v4463_v35 }
 0x472   :  { %1091 = vmatprep.subr.mxu0 %v4464_v30  ;;  %1162 = vmatprep.subr.mxu1 %v4465_v54 }
 0x473   :  { %1092 = vmatpush1.msra.mxu0 %v4466_v25  ;;  %1163 = vmatpush1.msra.mxu1 %v4467_v56  ;;  %v4477_v25 = vld [vmem:[#allocation52_spill] sm:$0xff]  ;;  %v4478_v56 = vld [vmem:[#allocation43_spill] sm:$0xff] }
 0x474   :  { %1093 = vmatprep.subr.mxu0 %v4468_v6  ;;  %1164 = vmatprep.subr.mxu1 %v4469_v48  ;;  %v4479_v6 = vld [vmem:[#allocation54_spill] sm:$0xff]  ;;  %v4480_v48 = vld [vmem:[#allocation45_spill] sm:$0xff] }
 0x475   :  { %1094 = vmatpush1.msra.mxu0 %v4470_v27  ;;  %1165 = vmatpush1.msra.mxu1 %v4471_v4  ;;  %v4481_v27 = vld [vmem:[#allocation56_spill] sm:$0xff]  ;;  %v4482_v4 = vld [vmem:[#allocation47_spill] sm:$0xff] }
 0x476   :  { %1095 = vmatprep.subr.mxu0 %v4472_v18  ;;  %1166 = vmatprep.subr.mxu1 %v4473_v51  ;;  %v4483_v18 = vld [vmem:[#allocation58_spill] sm:$0xff]  ;;  %v4484_v51 = vld [vmem:[#allocation49_spill] sm:$0xff] }
 0x477   :  { %1096 = vmatpush1.msra.mxu0 %v4474_v28  ;;  %1167 = vmatpush1.msra.mxu1 %v4475_v5  ;;  %v4485_v28 = vld [vmem:[#allocation60_spill] sm:$0xff]  ;;  %v4486_v5 = vld [vmem:[#allocation51_spill] sm:$0xff] }
 0x478   :  { %1097 = vmatprep.subr.mxu0 %v4476_v0  ;;  %1168 = vmatprep.subr.mxu1 %v4477_v25  ;;  %v4487_v0 = vld [vmem:[#allocation62_spill] sm:$0xff]  ;;  %v4488_v25 = vld [vmem:[#allocation53_spill] sm:$0xff] }
 0x479   :  { %1098 = vmatpush1.msra.mxu0 %v4478_v56  ;;  %1169 = vmatpush1.msra.mxu1 %v4479_v6  ;;  %v4489_v56 = vld [vmem:[#allocation64_spill] sm:$0xff]  ;;  %v4490_v6 = vld [vmem:[#allocation55_spill] sm:$0xff] }
 0x47a   :  { %1099 = vmatprep.subr.mxu0 %v4480_v48  ;;  %1170 = vmatprep.subr.mxu1 %v4481_v27  ;;  %v4491_v48 = vld [vmem:[#allocation66_spill] sm:$0xff]  ;;  %v4492_v27 = vld [vmem:[#allocation57_spill] sm:$0xff] }
 0x47b   :  { %1100 = vmatpush1.msra.mxu0 %v4482_v4  ;;  %1171 = vmatpush1.msra.mxu1 %v4483_v18  ;;  %v4493_v4 = vld [vmem:[#allocation68_spill] sm:$0xff]  ;;  %v4494_v18 = vld [vmem:[#allocation59_spill] sm:$0xff] }
 0x47c   :  { %1101 = vmatprep.subr.mxu0 %v4484_v51  ;;  %1172 = vmatprep.subr.mxu1 %v4485_v28  ;;  %v4495_v51 = vld [vmem:[#allocation70_spill] sm:$0xff]  ;;  %v4496_v28 = vld [vmem:[#allocation61_spill] sm:$0xff] }
 0x47d   :  { %1102 = vmatpush1.msra.mxu0 %v4486_v5  ;;  %1173 = vmatpush1.msra.mxu1 %v4487_v0  ;;  %v4497_v0 = vld [vmem:[#allocation63_spill] sm:$0xff] }
 0x47e   :  { %1103 = vmatprep.subr.mxu0 %v4488_v25  ;;  %1174 = vmatprep.subr.mxu1 %v4489_v56  ;;  %v4498_v25 = vld [vmem:[#allocation74_spill] sm:$0xff] }
 0x47f   :  { %1104 = vmatpush2.msra.mxu0 %v4490_v6  ;;  %1175 = vmatpush2.msra.mxu1 %v4491_v48  ;;  %v4499_v6 = vld [vmem:[#allocation67_spill] sm:$0xff]  ;;  %v4500_v48 = vld [vmem:[#allocation78_spill] sm:$0xff] }
 0x480   :  { %1105 = vmatprep.subr.mxu0 %v4492_v27  ;;  %1176 = vmatprep.subr.mxu1 %v4493_v4 }
 0x481   :  { %1106 = vmatpush2.msra.mxu0 %v4494_v18  ;;  %1177 = vmatpush2.msra.mxu1 %v4495_v51  ;;  %v4501_v18 = vld [vmem:[#allocation73_spill] sm:$0xff] }
 0x482   :  { %1107 = vmatprep.subr.mxu0 %v4496_v28  ;;  %1178 = vmatprep.subr.mxu1 %v4416_v21  ;;  %v4502_v21 = vld [vmem:[#allocation77_spill] sm:$0xff] }
 0x483   :  { %1108 = vmatpush2.msra.mxu0 %v4497_v0  ;;  %1179 = vmatpush2.msra.mxu1 %v4498_v25 }
 0x484   :  { %1109 = vmatprep.subr.mxu0 %v4419_v24  ;;  %1180 = vmatprep.subr.mxu1 %v4499_v6  ;;  %v4503_v24 = vld [vmem:[#allocation90_spill] sm:$0xff] }
 0x485   :  { %1110 = vmatpush2.msra.mxu0 %v4500_v48  ;;  %1181 = vmatpush2.msra.mxu1 %v4422_v42  ;;  %v4504_v48 = vld [vmem:[#allocation98_spill] sm:$0xff] }
 0x486   :  { %1111 = vmatprep.subr.mxu0 %v4423_v40  ;;  %1182 = vmatprep.subr.mxu1 %v4501_v18  ;;  %v4505_v40 = vld [vmem:[#allocation93_spill] sm:$0xff]  ;;  %v4506_v18 = vld [vmem:[#allocation83_spill] sm:$0xff] }
 0x487   :  { %1112 = vmatpush2.msra.mxu0 %v4425_v19  ;;  %1183 = vmatpush2.msra.mxu1 %v4426_v20  ;;  %v4507_v19 = vld [vmem:[#allocation99_spill] sm:$0xff]  ;;  %v4508_v20 = vld [vmem:[#allocation94_spill] sm:$0xff] }
 0x488   :  { %1113 = vmatprep.subr.mxu0 %v4502_v21  ;;  %1184 = vmatprep.subr.mxu1 %v4427_v22  ;;  %v4509_v21 = vld [vmem:[#allocation22_spill] sm:$0xff]  ;;  %v4510_v22 = vld [vmem:[#allocation85_spill] sm:$0xff] }
 0x489   :  { %1114 = vmatpush2.msra.mxu0 %v4428_v23  ;;  %1185 = vmatpush2.msra.mxu1 %v4503_v24  ;;  %v4511_v23 = vld [vmem:[#allocation16_spill] sm:$0xff]  ;;  %v4512_v24 = vld [vmem:[#allocation95_spill] sm:$0xff] }
 0x48a   :  { %1115 = vmatprep.subr.mxu0 %v4429_v26  ;;  %1186 = vmatprep.subr.mxu1 %v4504_v48  ;;  %v4513_v26 = vld [vmem:[#allocation24_spill] sm:$0xff]  ;;  %v4514_v48 = vld [vmem:[#allocation87_spill] sm:$0xff] }
 0x48b   :  { %1116 = vmatpush2.msra.mxu0 %v3040_v53  ;;  %1187 = vmatpush2.msra.mxu1 %v4505_v40  ;;  %v4515_v53 = vld [vmem:[#allocation17_spill] sm:$0xff]  ;;  %v4516_v40 = vld [vmem:[#allocation96_spill] sm:$0xff] }
 0x48c   :  { %1117 = vmatprep.subr.mxu0 %v4506_v18  ;;  %1188 = vmatprep.subr.mxu1 %v4507_v19  ;;  %v4517_v18 = vld [vmem:[#allocation26_spill] sm:$0xff]  ;;  %v4518_v19 = vld [vmem:[#allocation89_spill] sm:$0xff] }
 0x48d   :  { %1118 = vmatpush2.msra.mxu0 %v4508_v20  ;;  %1189 = vmatpush2.msra.mxu1 %v4509_v21  ;;  %v4519_v20 = vld [vmem:[#allocation18_spill] sm:$0xff]  ;;  %v4520_v21 = vld [vmem:[#allocation97_spill] sm:$0xff] }
 0x48e   :  { %1119 = vmatprep.subr.mxu0 %v4510_v22  ;;  %1190 = vmatprep.subr.mxu1 %v4511_v23  ;;  %v4521_v22 = vld [vmem:[#allocation28_spill] sm:$0xff]  ;;  %v4522_v23 = vld [vmem:[#allocation19_spill] sm:$0xff] }
 0x48f   :  { %1120 = vmatpush2.msra.mxu0 %v4512_v24  ;;  %1191 = vmatpush2.msra.mxu1 %v4513_v26  ;;  %v4523_v24 = vld [vmem:[#allocation30_spill] sm:$0xff]  ;;  %v4524_v26 = vld [vmem:[#allocation21_spill] sm:$0xff] }
 0x490   :  { %1121 = vmatprep.subr.mxu0 %v4514_v48  ;;  %1192 = vmatprep.subr.mxu1 %v4515_v53  ;;  %v4525_v48 = vld [vmem:[#allocation32_spill] sm:$0xff]  ;;  %v4526_v53 = vld [vmem:[#allocation23_spill] sm:$0xff] }
 0x491   :  { %1122 = vmatpush2.msra.mxu0 %v4516_v40  ;;  %1193 = vmatpush2.msra.mxu1 %v4517_v18  ;;  %v4527_v40 = vld [vmem:[#allocation34_spill] sm:$0xff]  ;;  %v4528_v18 = vld [vmem:[#allocation25_spill] sm:$0xff] }
 0x492   :  { %1123 = vmatprep.subr.mxu0 %v4518_v19  ;;  %1194 = vmatprep.subr.mxu1 %v4519_v20  ;;  %v4529_v19 = vld [vmem:[#allocation100_spill] sm:$0xff]  ;;  %v4530_v20 = vld [vmem:[#allocation101_spill] sm:$0xff] }
 0x493   :  { %1124 = vmatpush2.msra.mxu0 %v4520_v21  ;;  %1195 = vmatpush2.msra.mxu1 %v4521_v22  ;;  %v4531_v21 = vld [vmem:[#allocation102_spill] sm:$0xff]  ;;  %v4532_v22 = vld [vmem:[#allocation103_spill] sm:$0xff] }
 0x494   :  { %1125 = vmatprep.subr.mxu0 %v4522_v23  ;;  %1196 = vmatprep.subr.mxu1 %v4523_v24  ;;  %v4533_v23 = vld [vmem:[#allocation104_spill] sm:$0xff]  ;;  %v4534_v24 = vld [vmem:[#allocation105_spill] sm:$0xff] }
 0x495   :  { %1126 = vmatpush2.msra.mxu0 %v4524_v26  ;;  %1197 = vmatpush2.msra.mxu1 %v4525_v48  ;;  %v4535_v26 = vld [vmem:[#allocation106_spill] sm:$0xff]  ;;  %v4536_v48 = vld [vmem:[#allocation107_spill] sm:$0xff] }
 0x496   :  { %1127 = vmatprep.subr.mxu0 %v4526_v53  ;;  %1198 = vmatprep.subr.mxu1 %v4527_v40  ;;  %v4537_v53 = vld [vmem:[#allocation108_spill] sm:$0xff]  ;;  %v4538_v40 = vld [vmem:[#allocation109_spill] sm:$0xff] }
 0x497   :  { %1128 = vmatpush2.msra.mxu0 %v4528_v18  ;;  %1199 = vmatpush2.msra.mxu1 %v4529_v19  ;;  %v4539_v18 = vld [vmem:[#allocation110_spill] sm:$0xff]  ;;  %v4540_v19 = vld [vmem:[#allocation111_spill] sm:$0xff] }
 0x498   :  { %1129 = vmatprep.subr.mxu0 %v4530_v20  ;;  %1200 = vmatprep.subr.mxu1 %v4531_v21  ;;  %v4541_v20 = vld [vmem:[#allocation112_spill] sm:$0xff] }
 0x499   :  { %1130 = vmatpush2.msra.mxu0 %v4532_v22  ;;  %1201 = vmatpush2.msra.mxu1 %v4533_v23  ;;  %v4542_v21 = vld [vmem:[#allocation84_spill] sm:$0xff] }
 0x49a   :  { %1131 = vmatprep.subr.mxu0 %v4534_v24  ;;  %1202 = vmatprep.subr.mxu1 %v4535_v26  ;;  %v4543_v22 = vld [vmem:[#allocation20_spill] sm:$0xff] }
 0x49b   :  { %1132 = vmatpush2.msra.mxu0 %v4536_v48  ;;  %1203 = vmatpush2.msra.mxu1 %v4537_v53  ;;  %v4544_v24 = vld [vmem:[#allocation76_spill] sm:$0xff] }
 0x49c   :  { %1133 = vmatprep.subr.mxu0 %v4538_v40  ;;  %1204 = vmatprep.subr.mxu1 %v4539_v18  ;;  %v4545_v48 = vld [vmem:[#allocation80_spill] sm:$0xff] }
 0x49d   :  { %1134 = vmatpush2.msra.mxu0 %v4540_v19  ;;  %1205 = vmatpush2.msra.mxu1 %v4541_v20 }
 0x49e   :  { %1240 = vmatprep.subr.mxu0 %v4542_v21  ;;  %1311 = vmatprep.subr.mxu1 %v4543_v22 }
 0x51e   :  { %v968_v23 = vpop.f32.mrf.mxu0  ;;  %v1039_v40 = vpop.f32.mrf.mxu1 }
 0x51f   :  { %v969_v42 = vadd.f32 %v968_v23, %v4544_v24  ;;  %v1040_v20 = vadd.f32 %v1039_v40, %v2623_v61 }
 0x520   :  { %v970_v26 = vpop.f32.mrf.mxu0  ;;  %v1041_v18 = vpop.f32.mrf.mxu1 }
 0x521   :  { %v1561_v6 = vmul.f32 -1.442695, %v969_v42  ;;  %v971_v25 = vadd.f32 %v970_v26, %v4545_v48  ;;  %v1042_v19 = vadd.f32 %v1041_v18, %v2621_v44 }
 0x523   :  { %1753 = vpow2.f32 %v1561_v6  ;;  %v1562_v53 = vmul.f32 -1.442695, %v971_v25  ;;  %v1563_v0 = vmul.f32 -1.442695, %v1042_v19 }
 0x525   :  { %1755 = vpow2.f32 %v1562_v53 }
 0x526   :  { %1757 = vtanh.f32 %v1040_v20 }
 0x527   :  { %1759 = vpow2.f32 %v1563_v0  ;;  %v1070_v0 = vld [vmem:[#allocation2 + $0x28] sm:$0xff] }
 0x530   :  { %v1754_v21 = vpop.eup %1753 }
 0x531   :  { %v1047_v28 = vadd.f32 1.0, %v1754_v21  ;;  %v4595_v21 = vld [vmem:[#allocation85_spill] sm:$0xff] }
 0x532   :  { %v1756_v22 = vpop.eup %1755 }
 0x533   :  { %1761 = vrcp.f32 %v1047_v28  ;;  %v1053_v23 = vadd.f32 1.0, %v1756_v22  ;;  %v1758_v42 = vpop.eup %1757  ;;  %v4593_v28 = vld [vmem:[#allocation94_spill] sm:$0xff]  ;;  %v4596_v22 = vld [vmem:[#allocation16_spill] sm:$0xff] }
 0x534   :  { %v1760_v26 = vpop.eup %1759 }
 0x535   :  { %1763 = vrcp.f32 %v1053_v23  ;;  %v1060_v48 = vadd.f32 1.0, %v1760_v26  ;;  %v4597_v23 = vld [vmem:[#allocation95_spill] sm:$0xff] }
 0x536   :  { %v4599_v26 = vld [vmem:[#allocation87_spill] sm:$0xff] }
 0x537   :  { %1765 = vrcp.f32 %v1060_v48  ;;  %v4589_v48 = vld [vmem:[#allocation92_spill] sm:$0xff] }
 0x540   :  { %v1762_v6 = vpop.eup %1761 }
 0x541   :  { %v1064_v24 = vmul.f32 %v1762_v6, %v1758_v42  ;;  %v4598_v42 = vld [vmem:[#allocation24_spill] sm:$0xff]  ;;  %v4600_v6 = vld [vmem:[#allocation17_spill] sm:$0xff] }
 0x542   :  { %v1764_v25 = vpop.eup %1763 }
 0x543   :  { %v1063_v53 = vmul.f32 %v1764_v25, %v3303_v52  ;;  %v4582_v52 = vld [vmem:[#allocation86_spill] sm:$0xff]  ;;  %v4601_v25 = vld [vmem:[#allocation96_spill] sm:$0xff] }
 0x544   :  { %v1766_v40 = vpop.eup %1765 }
 0x545   :  { %v3443_v18 = vadd.f32 %v1064_v24, %v1063_v53  ;;  %v4581_v24 = vld [vmem:[#allocation75_spill] sm:$0xff]  ;;  %v4602_v53 = vld [vmem:[#allocation26_spill] sm:$0xff] }
 0x547   :  { %1767 = vtanh.f32 %v3443_v18 }
 0x554   :  { %v1768_v19 = vpop.eup %1767 }
 0x555   :  { %v3446_v20 = vmul.f32 %v1768_v19, %v1766_v40  ;;  %v4603_v40 = vld [vmem:[#allocation89_spill] sm:$0xff]  ;;  %v4604_v19 = vld [vmem:[#allocation18_spill] sm:$0xff] }
 0x557   :  { %1135 = vmatprep.mubr.f32.mxu0 %v3446_v20  ;;  %1206 = vmatprep.mubr.f32.mxu1 %v3446_v20 }
 0x558   :  { %1136 = vmatmul.mubr.f32.vlgmr.msra.gmra.mxu0 %v1070_v0  ;;  %1207 = vmatmul.mubr.f32.vlgmr.msra.gmra.mxu1 %v1070_v0  ;;  %v4605_v0 = vld [vmem:[#allocation97_spill] sm:$0xff] }
 0x559   :  { %1241 = vmatpush1.msra.mxu0 %v2778_v32  ;;  %1312 = vmatpush1.msra.mxu1 %v2781_v49  ;;  %v4546_v32 = vld [vmem:[#allocation31_spill] sm:$0xff]  ;;  %v4547_v49 = vld [vmem:[#allocation42_spill] sm:$0xff] }
 0x55a   :  { %1242 = vmatprep.subr.mxu0 %v2784_v33  ;;  %1313 = vmatprep.subr.mxu1 %v2787_v34  ;;  %v4548_v33 = vld [vmem:[#allocation33_spill] sm:$0xff]  ;;  %v4549_v34 = vld [vmem:[#allocation44_spill] sm:$0xff] }
 0x55b   :  { %1243 = vmatpush1.msra.mxu0 %v2790_v36  ;;  %1314 = vmatpush1.msra.mxu1 %v2793_v37  ;;  %v4550_v36 = vld [vmem:[#allocation35_spill] sm:$0xff]  ;;  %v4551_v37 = vld [vmem:[#allocation46_spill] sm:$0xff] }
 0x55c   :  { %1244 = vmatprep.subr.mxu0 %v2796_v38  ;;  %1315 = vmatprep.subr.mxu1 %v2799_v39  ;;  %v4552_v38 = vld [vmem:[#allocation37_spill] sm:$0xff]  ;;  %v4553_v39 = vld [vmem:[#allocation48_spill] sm:$0xff] }
 0x55d   :  { %1245 = vmatpush1.msra.mxu0 %v2802_v41  ;;  %1316 = vmatpush1.msra.mxu1 %v2805_v43  ;;  %v4554_v41 = vld [vmem:[#allocation39_spill] sm:$0xff]  ;;  %v4555_v43 = vld [vmem:[#allocation50_spill] sm:$0xff] }
 0x55e   :  { %1246 = vmatprep.subr.mxu0 %v2808_v45  ;;  %1317 = vmatprep.subr.mxu1 %v2811_v47  ;;  %v4556_v45 = vld [vmem:[#allocation41_spill] sm:$0xff]  ;;  %v4557_v47 = vld [vmem:[#allocation52_spill] sm:$0xff] }
 0x55f   :  { %1247 = vmatpush1.msra.mxu0 %v2814_v1  ;;  %1318 = vmatpush1.msra.mxu1 %v2817_v59  ;;  %v4558_v1 = vld [vmem:[#allocation43_spill] sm:$0xff]  ;;  %v4559_v59 = vld [vmem:[#allocation54_spill] sm:$0xff] }
 0x560   :  { %1248 = vmatprep.subr.mxu0 %v2820_v60  ;;  %1319 = vmatprep.subr.mxu1 %v2823_v62  ;;  %v4560_v60 = vld [vmem:[#allocation45_spill] sm:$0xff]  ;;  %v4561_v62 = vld [vmem:[#allocation56_spill] sm:$0xff] }
 0x561   :  { %1249 = vmatpush1.msra.mxu0 %v2826_v63  ;;  %1320 = vmatpush1.msra.mxu1 %v2829_v57  ;;  %v4562_v63 = vld [vmem:[#allocation47_spill] sm:$0xff]  ;;  %v4563_v57 = vld [vmem:[#allocation58_spill] sm:$0xff] }
 0x562   :  { %1250 = vmatprep.subr.mxu0 %v2832_v9  ;;  %1321 = vmatprep.subr.mxu1 %v2835_v55  ;;  %v4564_v9 = vld [vmem:[#allocation49_spill] sm:$0xff]  ;;  %v4565_v55 = vld [vmem:[#allocation60_spill] sm:$0xff] }
 0x563   :  { %1251 = vmatpush1.msra.mxu0 %v2838_v46  ;;  %1322 = vmatpush1.msra.mxu1 %v4366_v2  ;;  %v4566_v46 = vld [vmem:[#allocation62_spill] sm:$0xff]  ;;  %v4567_v2 = vld [vmem:[#allocation53_spill] sm:$0xff] }
 0x564   :  { %1252 = vmatprep.subr.mxu0 %v4367_v50  ;;  %1323 = vmatprep.subr.mxu1 %v4368_v58  ;;  %v4568_v50 = vld [vmem:[#allocation55_spill] sm:$0xff]  ;;  %v4569_v58 = vld [vmem:[#allocation66_spill] sm:$0xff] }
 0x565   :  { %1253 = vmatpush1.msra.mxu0 %v4369_v3  ;;  %1324 = vmatpush1.msra.mxu1 %v4370_v7  ;;  %v4570_v3 = vld [vmem:[#allocation59_spill] sm:$0xff]  ;;  %v4571_v7 = vld [vmem:[#allocation61_spill] sm:$0xff] }
 0x566   :  { %1254 = vmatprep.subr.mxu0 %v4371_v8  ;;  %1325 = vmatprep.subr.mxu1 %v4372_v10  ;;  %v4572_v8 = vld [vmem:[#allocation72_spill] sm:$0xff]  ;;  %v4573_v10 = vld [vmem:[#allocation63_spill] sm:$0xff] }
 0x567   :  { %1255 = vmatpush1.msra.mxu0 %v4373_v11  ;;  %1326 = vmatpush1.msra.mxu1 %v4374_v12  ;;  %v4574_v11 = vld [vmem:[#allocation74_spill] sm:$0xff]  ;;  %v4575_v12 = vld [vmem:[#allocation65_spill] sm:$0xff] }
 0x568   :  { %1256 = vmatprep.subr.mxu0 %v4375_v13  ;;  %1327 = vmatprep.subr.mxu1 %v4376_v14  ;;  %v4576_v13 = vld [vmem:[#allocation67_spill] sm:$0xff]  ;;  %v4577_v14 = vld [vmem:[#allocation78_spill] sm:$0xff] }
 0x569   :  { %1257 = vmatpush1.msra.mxu0 %v4377_v15  ;;  %1328 = vmatpush1.msra.mxu1 %v4378_v16  ;;  %v4578_v15 = vld [vmem:[#allocation69_spill] sm:$0xff]  ;;  %v4579_v16 = vld [vmem:[#allocation71_spill] sm:$0xff] }
 0x56a   :  { %1258 = vmatprep.subr.mxu0 %v4379_v17  ;;  %1329 = vmatprep.subr.mxu1 %v4461_v29  ;;  %v4580_v17 = vld [vmem:[#allocation73_spill] sm:$0xff] }
 0x56b   :  { %1259 = vmatpush1.msra.mxu0 %v4462_v31  ;;  %1330 = vmatpush1.msra.mxu1 %v4463_v35  ;;  %v4583_v29 = vld [vmem:[#allocation77_spill] sm:$0xff]  ;;  %v4584_v31 = vld [vmem:[#allocation88_spill] sm:$0xff]  ;;  %v4585_v35 = vld [vmem:[#allocation79_spill] sm:$0xff] }
 0x56c   :  { %1260 = vmatprep.subr.mxu0 %v4464_v30  ;;  %1331 = vmatprep.subr.mxu1 %v4465_v54  ;;  %v4586_v30 = vld [vmem:[#allocation90_spill] sm:$0xff]  ;;  %v4587_v54 = vld [vmem:[#allocation81_spill] sm:$0xff] }
 0x56d   :  { %1261 = vmatpush1.msra.mxu0 %v4546_v32  ;;  %1332 = vmatpush1.msra.mxu1 %v4547_v49  ;;  %v4606_v32 = vld [vmem:[#allocation28_spill] sm:$0xff]  ;;  %v4607_v49 = vld [vmem:[#allocation19_spill] sm:$0xff] }
 0x56e   :  { %1262 = vmatprep.subr.mxu0 %v4548_v33  ;;  %1333 = vmatprep.subr.mxu1 %v4549_v34  ;;  %v4608_v33 = vld [vmem:[#allocation30_spill] sm:$0xff]  ;;  %v4609_v34 = vld [vmem:[#allocation21_spill] sm:$0xff] }
 0x56f   :  { %1263 = vmatpush1.msra.mxu0 %v4550_v36  ;;  %1334 = vmatpush1.msra.mxu1 %v4551_v37  ;;  %v4610_v36 = vld [vmem:[#allocation32_spill] sm:$0xff]  ;;  %v4611_v37 = vld [vmem:[#allocation23_spill] sm:$0xff] }
 0x570   :  { %1264 = vmatprep.subr.mxu0 %v4552_v38  ;;  %1335 = vmatprep.subr.mxu1 %v4553_v39  ;;  %v4612_v38 = vld [vmem:[#allocation34_spill] sm:$0xff]  ;;  %v4613_v39 = vld [vmem:[#allocation25_spill] sm:$0xff] }
 0x571   :  { %1265 = vmatpush1.msra.mxu0 %v4554_v41  ;;  %1336 = vmatpush1.msra.mxu1 %v4555_v43  ;;  %v4614_v41 = vld [vmem:[#allocation100_spill] sm:$0xff]  ;;  %v4615_v43 = vld [vmem:[#allocation101_spill] sm:$0xff] }
 0x572   :  { %1266 = vmatprep.subr.mxu0 %v4556_v45  ;;  %1337 = vmatprep.subr.mxu1 %v4557_v47  ;;  %v4616_v45 = vld [vmem:[#allocation102_spill] sm:$0xff]  ;;  %v4617_v47 = vld [vmem:[#allocation103_spill] sm:$0xff] }
 0x573   :  { %1267 = vmatpush1.msra.mxu0 %v4558_v1  ;;  %1338 = vmatpush1.msra.mxu1 %v4559_v59  ;;  %v4618_v1 = vld [vmem:[#allocation104_spill] sm:$0xff]  ;;  %v4619_v59 = vld [vmem:[#allocation105_spill] sm:$0xff] }
 0x574   :  { %1268 = vmatprep.subr.mxu0 %v4560_v60  ;;  %1339 = vmatprep.subr.mxu1 %v4561_v62  ;;  %v4620_v60 = vld [vmem:[#allocation106_spill] sm:$0xff]  ;;  %v4621_v62 = vld [vmem:[#allocation107_spill] sm:$0xff] }
 0x575   :  { %1269 = vmatpush1.msra.mxu0 %v4562_v63  ;;  %1340 = vmatpush1.msra.mxu1 %v4563_v57  ;;  %v4622_v63 = vld [vmem:[#allocation108_spill] sm:$0xff]  ;;  %v4623_v57 = vld [vmem:[#allocation109_spill] sm:$0xff] }
 0x576   :  { %1270 = vmatprep.subr.mxu0 %v4564_v9  ;;  %1341 = vmatprep.subr.mxu1 %v4565_v55  ;;  %v4624_v9 = vld [vmem:[#allocation110_spill] sm:$0xff]  ;;  %v4625_v55 = vld [vmem:[#allocation111_spill] sm:$0xff] }
 0x577   :  { %1271 = vmatpush1.msra.mxu0 %v4486_v5  ;;  %1342 = vmatpush1.msra.mxu1 %v4566_v46  ;;  %v4594_v5 = vld [vmem:[#allocation22_spill] sm:$0xff]  ;;  %v4626_v46 = vld [vmem:[#allocation112_spill] sm:$0xff] }
 0x578   :  { %1272 = vmatprep.subr.mxu0 %v4567_v2  ;;  %1343 = vmatprep.subr.mxu1 %v4489_v56  ;;  %v4588_v56 = vld [vmem:[#allocation98_spill] sm:$0xff]  ;;  %v4627_v2 = vmov 0.0  }
 0x579   :  { %1273 = vmatpush2.msra.mxu0 %v4568_v50  ;;  %1344 = vmatpush2.msra.mxu1 %v4569_v58  ;;  %v4628_v58 = vld [vmem:[#allocation76_spill] sm:$0xff] }
 0x57a   :  { %1274 = vmatprep.subr.mxu0 %v4492_v27  ;;  %1345 = vmatprep.subr.mxu1 %v4493_v4  ;;  %v4590_v27 = vld [vmem:[#allocation93_spill] sm:$0xff]  ;;  %v4591_v4 = vld [vmem:[#allocation83_spill] sm:$0xff] }
 0x57b   :  { %1275 = vmatpush2.msra.mxu0 %v4570_v3  ;;  %1346 = vmatpush2.msra.mxu1 %v4495_v51  ;;  %v4592_v51 = vld [vmem:[#allocation99_spill] sm:$0xff] }
 0x57c   :  { %1276 = vmatprep.subr.mxu0 %v4571_v7  ;;  %1347 = vmatprep.subr.mxu1 %v4572_v8 }
 0x57d   :  { %1277 = vmatpush2.msra.mxu0 %v4573_v10  ;;  %1348 = vmatpush2.msra.mxu1 %v4574_v11  ;;  %v4629_v10 = vld [vmem:[#allocation80_spill] sm:$0xff] }
 0x57e   :  { %1278 = vmatprep.subr.mxu0 %v4575_v12  ;;  %1349 = vmatprep.subr.mxu1 %v4576_v13 }
 0x57f   :  { %1279 = vmatpush2.msra.mxu0 %v4577_v14  ;;  %1350 = vmatpush2.msra.mxu1 %v4578_v15 }
 0x580   :  { %1280 = vmatprep.subr.mxu0 %v4579_v16  ;;  %1351 = vmatprep.subr.mxu1 %v4580_v17 }
 0x581   :  { %1281 = vmatpush2.msra.mxu0 %v4581_v24  ;;  %1352 = vmatpush2.msra.mxu1 %v4582_v52 }
 0x582   :  { %1282 = vmatprep.subr.mxu0 %v4583_v29  ;;  %1353 = vmatprep.subr.mxu1 %v4584_v31 }
 0x583   :  { %1283 = vmatpush2.msra.mxu0 %v4585_v35  ;;  %1354 = vmatpush2.msra.mxu1 %v4586_v30 }
 0x584   :  { %1284 = vmatprep.subr.mxu0 %v4587_v54  ;;  %1355 = vmatprep.subr.mxu1 %v4588_v56 }
 0x585   :  { %1285 = vmatpush2.msra.mxu0 %v4589_v48  ;;  %1356 = vmatpush2.msra.mxu1 %v4590_v27 }
 0x586   :  { %1286 = vmatprep.subr.mxu0 %v4591_v4  ;;  %1357 = vmatprep.subr.mxu1 %v4592_v51 }
 0x587   :  { %1287 = vmatpush2.msra.mxu0 %v4593_v28  ;;  %1358 = vmatpush2.msra.mxu1 %v4594_v5 }
 0x588   :  { %1288 = vmatprep.subr.mxu0 %v4595_v21  ;;  %1359 = vmatprep.subr.mxu1 %v4596_v22  ;;  %v1239_v22 = vld [vmem:[#allocation2 + $0x30] sm:$0xff] }
 0x589   :  { %1289 = vmatpush2.msra.mxu0 %v4597_v23  ;;  %1360 = vmatpush2.msra.mxu1 %v4598_v42  ;;  %v1422_v23 = vld [vmem:[#allocation8 + $0x78] sm:$0xff]  ;;  %v1421_v42 = vld [vmem:[#allocation8 + $0x70] sm:$0xff] }
 0x58a   :  { %1290 = vmatprep.subr.mxu0 %v4599_v26  ;;  %1361 = vmatprep.subr.mxu1 %v4600_v6  ;;  %v1419_v26 = vld [vmem:[#allocation8 + $0x60] sm:$0xff]  ;;  %v1418_v6 = vld [vmem:[#allocation8 + $0x58] sm:$0xff] }
 0x58b   :  { %1291 = vmatpush2.msra.mxu0 %v4601_v25  ;;  %1362 = vmatpush2.msra.mxu1 %v4602_v53  ;;  %v1417_v25 = vld [vmem:[#allocation8 + $0x50] sm:$0xff]  ;;  %v1416_v53 = vld [vmem:[#allocation8 + $0x48] sm:$0xff] }
 0x58c   :  { %1292 = vmatprep.subr.mxu0 %v4603_v40  ;;  %1363 = vmatprep.subr.mxu1 %v4604_v19  ;;  %v1415_v40 = vld [vmem:[#allocation8 + $0x40] sm:$0xff]  ;;  %v1414_v19 = vld [vmem:[#allocation8 + $0x38] sm:$0xff] }
 0x58d   :  { %1293 = vmatpush2.msra.mxu0 %v4605_v0  ;;  %1364 = vmatpush2.msra.mxu1 %v4606_v32  ;;  %v1413_v0 = vld [vmem:[#allocation8 + $0x30] sm:$0xff]  ;;  %v1412_v32 = vld [vmem:[#allocation8 + $0x28] sm:$0xff] }
 0x58e   :  { %1294 = vmatprep.subr.mxu0 %v4607_v49  ;;  %1365 = vmatprep.subr.mxu1 %v4608_v33  ;;  %v1411_v49 = vld [vmem:[#allocation8 + $0x20] sm:$0xff]  ;;  %v1410_v33 = vld [vmem:[#allocation8 + $0x18] sm:$0xff] }
 0x58f   :  { %1295 = vmatpush2.msra.mxu0 %v4609_v34  ;;  %1366 = vmatpush2.msra.mxu1 %v4610_v36  ;;  %v1409_v34 = vld [vmem:[#allocation8 + $0x10] sm:$0xff]  ;;  %v1408_v36 = vld [vmem:[#allocation8 + $0x8] sm:$0xff] }
 0x590   :  { %1296 = vmatprep.subr.mxu0 %v4611_v37  ;;  %1367 = vmatprep.subr.mxu1 %v4612_v38  ;;  %v1407_v37 = vld [vmem:[#allocation8] sm:$0xff]  ;;  %v3618_v38 = vld [vmem:[#allocation5] sm:$0xff] }
 0x591   :  { %1297 = vmatpush2.msra.mxu0 %v4613_v39  ;;  %1368 = vmatpush2.msra.mxu1 %v4614_v41  ;;  %v4630_v39 = vld [vmem:[#allocation82_spill] sm:$0xff] }
 0x592   :  { %1298 = vmatprep.subr.mxu0 %v4615_v43  ;;  %1369 = vmatprep.subr.mxu1 %v4616_v45  ;;  %v392_v41 = vadd.f32 %v4630_v39, %v3618_v38  ;;  %v1068_v43 = vadd.f32 %v3446_v20, %v3618_v38  ;;  %v4631_v45 = vld [vmem:[#allocation15_spill] sm:$0xff] }
 0x593   :  { %1299 = vmatpush2.msra.mxu0 %v4617_v47  ;;  %1370 = vmatpush2.msra.mxu1 %v4618_v1  ;;  %v561_v47 = vadd.f32 %v4631_v45, %v3618_v38  ;;  %v4632_v20 = vld [vmem:[#allocation91_spill] sm:$0xff] }
 0x594   :  { %1300 = vmatprep.subr.mxu0 %v4619_v59  ;;  %1371 = vmatprep.subr.mxu1 %v4620_v60  ;;  %v730_v59 = vadd.f32 %v4632_v20, %v3618_v38  ;;  %v4633_v60 = vld [vmem:[#allocation113_spill] sm:$0xff] }
 0x595   :  { %1301 = vmatpush2.msra.mxu0 %v4621_v62  ;;  %1372 = vmatpush2.msra.mxu1 %v4622_v63  ;;  %v899_v62 = vadd.f32 %v4633_v60, %v3618_v38 }
 0x596   :  { %1302 = vmatprep.subr.mxu0 %v4623_v57  ;;  %1373 = vmatprep.subr.mxu1 %v4624_v9 }
 0x597   :  { %1303 = vmatpush2.msra.mxu0 %v4625_v55  ;;  %1374 = vmatpush2.msra.mxu1 %v4626_v46 }
 0x598   :  { %1593 = vmatprep.subr.mxu0 %v4627_v2  ;;  %1646 = vmatprep.subr.mxu1 %v4627_v2 }
 0x618   :  { %v1137_v50 = vpop.f32.mrf.mxu0  ;;  %v1208_v13 = vpop.f32.mrf.mxu1 }
 0x619   :  { %v1138_v3 = vadd.f32 %v1137_v50, %v4628_v58  ;;  %v1209_v16 = vadd.f32 %v1208_v13, %v2623_v61 }
 0x61a   :  { %v1139_v7 = vpop.f32.mrf.mxu0  ;;  %v1210_v14 = vpop.f32.mrf.mxu1 }
 0x61b   :  { %v1564_v8 = vmul.f32 -1.442695, %v1138_v3  ;;  %v1140_v11 = vadd.f32 %v1139_v7, %v4629_v10  ;;  %v1211_v15 = vadd.f32 %v1210_v14, %v2621_v44 }
 0x61d   :  { %1769 = vpow2.f32 %v1564_v8  ;;  %v1565_v12 = vmul.f32 -1.442695, %v1140_v11  ;;  %v1566_v17 = vmul.f32 -1.442695, %v1211_v15 }
 0x61f   :  { %1771 = vpow2.f32 %v1565_v12 }
 0x620   :  { %1773 = vtanh.f32 %v1209_v16 }
 0x621   :  { %1775 = vpow2.f32 %v1566_v17 }
 0x62a   :  { %v1770_v24 = vpop.eup %1769 }
 0x62b   :  { %v1216_v52 = vadd.f32 1.0, %v1770_v24 }
 0x62c   :  { %v1772_v29 = vpop.eup %1771 }
 0x62d   :  { %1777 = vrcp.f32 %v1216_v52  ;;  %v1222_v31 = vadd.f32 1.0, %v1772_v29  ;;  %v1774_v35 = vpop.eup %1773 }
 0x62e   :  { %v1776_v30 = vpop.eup %1775 }
 0x62f   :  { %1779 = vrcp.f32 %v1222_v31  ;;  %v1229_v48 = vadd.f32 1.0, %v1776_v30 }
 0x631   :  { %1781 = vrcp.f32 %v1229_v48 }
 0x63a   :  { %v1778_v54 = vpop.eup %1777 }
 0x63b   :  { %v1233_v4 = vmul.f32 %v1778_v54, %v1774_v35 }
 0x63c   :  { %v1780_v56 = vpop.eup %1779 }
 0x63d   :  { %v1232_v27 = vmul.f32 %v1780_v56, %v3443_v18  ;;  %v1420_v18 = vld [vmem:[#allocation8 + $0x68] sm:$0xff] }
 0x63e   :  { %v1782_v28 = vpop.eup %1781 }
 0x63f   :  { %v3583_v51 = vadd.f32 %v1233_v4, %v1232_v27 }
 0x641   :  { %1783 = vtanh.f32 %v3583_v51 }
 0x64e   :  { %v1784_v5 = vpop.eup %1783 }
 0x64f   :  { %v3586_v21 = vmul.f32 %v1784_v5, %v1782_v28 }
 0x651   :  { %1304 = vmatprep.mubr.f32.mxu0 %v3586_v21  ;;  %1375 = vmatprep.mubr.f32.mxu1 %v3586_v21  ;;  %v1237_v1 = vadd.f32 %v3586_v21, %v3618_v38 }
 0x652   :  { %1305 = vmatmul.mubr.f32.vlgmr.msra.gmra.mxu0 %v1239_v22  ;;  %1376 = vmatmul.mubr.f32.vlgmr.msra.gmra.mxu1 %v1239_v22 }
 0x653   :  { %1594 = vmatpush3.msra.mxu0 %v1422_v23  ;;  %1662 = vmatpush3.msra.mxu1 %v1422_v23 }
 0x654   :  { %1595 = vmatprep.subr.mxu0 %v4627_v2  ;;  %1647 = vmatprep.subr.mxu1 %v4627_v2 }
 0x655   :  { %1596 = vmatpush3.msra.mxu0 %v1421_v42  ;;  %1663 = vmatpush3.msra.mxu1 %v1421_v42 }
 0x656   :  { %1597 = vmatprep.subr.mxu0 %v4627_v2  ;;  %1648 = vmatprep.subr.mxu1 %v4627_v2 }
 0x657   :  { %1598 = vmatpush3.msra.mxu0 %v1420_v18  ;;  %1664 = vmatpush3.msra.mxu1 %v1420_v18 }
 0x658   :  { %1599 = vmatprep.subr.mxu0 %v4627_v2  ;;  %1649 = vmatprep.subr.mxu1 %v4627_v2 }
 0x659   :  { %1600 = vmatpush3.msra.mxu0 %v1419_v26  ;;  %1665 = vmatpush3.msra.mxu1 %v1419_v26 }
 0x65a   :  { %1601 = vmatprep.subr.mxu0 %v4627_v2  ;;  %1650 = vmatprep.subr.mxu1 %v4627_v2 }
 0x65b   :  { %1602 = vmatpush3.msra.mxu0 %v1418_v6  ;;  %1666 = vmatpush3.msra.mxu1 %v1418_v6 }
 0x65c   :  { %1603 = vmatprep.subr.mxu0 %v4627_v2  ;;  %1651 = vmatprep.subr.mxu1 %v4627_v2 }
 0x65d   :  { %1604 = vmatpush3.msra.mxu0 %v1417_v25  ;;  %1667 = vmatpush3.msra.mxu1 %v1417_v25 }
 0x65e   :  { %1605 = vmatprep.subr.mxu0 %v4627_v2  ;;  %1652 = vmatprep.subr.mxu1 %v4627_v2 }
 0x65f   :  { %1606 = vmatpush3.msra.mxu0 %v1416_v53  ;;  %1668 = vmatpush3.msra.mxu1 %v1416_v53 }
 0x660   :  { %1607 = vmatprep.subr.mxu0 %v4627_v2  ;;  %1653 = vmatprep.subr.mxu1 %v4627_v2 }
 0x661   :  { %1608 = vmatpush3.msra.mxu0 %v1415_v40  ;;  %1669 = vmatpush3.msra.mxu1 %v1415_v40 }
 0x662   :  { %1609 = vmatprep.subr.mxu0 %v4627_v2  ;;  %1654 = vmatprep.subr.mxu1 %v4627_v2 }
 0x663   :  { %1610 = vmatpush3.msra.mxu0 %v1414_v19  ;;  %1670 = vmatpush3.msra.mxu1 %v1414_v19 }
 0x664   :  { %1611 = vmatprep.subr.mxu0 %v4627_v2  ;;  %1655 = vmatprep.subr.mxu1 %v4627_v2 }
 0x665   :  { %1612 = vmatpush3.msra.mxu0 %v1413_v0  ;;  %1671 = vmatpush3.msra.mxu1 %v1413_v0 }
 0x666   :  { %1613 = vmatprep.subr.mxu0 %v4627_v2  ;;  %1656 = vmatprep.subr.mxu1 %v4627_v2 }
 0x667   :  { %1614 = vmatpush3.msra.mxu0 %v1412_v32  ;;  %1672 = vmatpush3.msra.mxu1 %v1412_v32 }
 0x668   :  { %1615 = vmatprep.subr.mxu0 %v4627_v2  ;;  %1657 = vmatprep.subr.mxu1 %v4627_v2 }
 0x669   :  { %1616 = vmatpush3.msra.mxu0 %v1411_v49  ;;  %1673 = vmatpush3.msra.mxu1 %v1411_v49 }
 0x66a   :  { %1617 = vmatprep.subr.mxu0 %v4627_v2  ;;  %1658 = vmatprep.subr.mxu1 %v4627_v2 }
 0x66b   :  { %1618 = vmatpush3.msra.mxu0 %v1410_v33  ;;  %1674 = vmatpush3.msra.mxu1 %v1410_v33 }
 0x66c   :  { %1619 = vmatprep.subr.mxu0 %v4627_v2  ;;  %1659 = vmatprep.subr.mxu1 %v4627_v2 }
 0x66d   :  { %1620 = vmatpush3.msra.mxu0 %v1409_v34  ;;  %1675 = vmatpush3.msra.mxu1 %v1409_v34 }
 0x66e   :  { %1621 = vmatprep.subr.mxu0 %v4627_v2  ;;  %1660 = vmatprep.subr.mxu1 %v4627_v2 }
 0x66f   :  { %1622 = vmatpush3.msra.mxu0 %v1408_v36  ;;  %1676 = vmatpush3.msra.mxu1 %v1408_v36 }
 0x670   :  { %1623 = vmatprep.subr.mxu0 %v4627_v2  ;;  %1661 = vmatprep.subr.mxu1 %v4627_v2 }
 0x671   :  { %1624 = vmatpush3.msra.mxu0 %v1407_v37  ;;  %1677 = vmatpush3.msra.mxu1 %v1407_v37 }
 0x672   :  { %1625 = vmatprep.mubr.msk.f32.mxu0 %vm2046_vm0, %v4627_v2  ;;  %1637 = vmatprep.mubr.msk.f32.mxu1 %vm2046_vm0, %v4627_v2 }
 0x673   :  { %1626 = vmatmul.mubr.f32.vlgmr.msra.gmra.mxu0 %v392_v41  ;;  %1638 = vmatmul.mubr.f32.vlgmr.msra.gmra.mxu1 %v1068_v43 }
 0x674   :  { %1628 = vmatprep.mubr.msk.f32.mxu0 %vm2046_vm0, %v4627_v2  ;;  %1640 = vmatprep.mubr.msk.f32.mxu1 %vm2046_vm0, %v4627_v2 }
 0x677   :  { %1629 = vmatmul.mubr.f32.gmra.mxu0 %v561_v47  ;;  %1641 = vmatmul.mubr.f32.gmra.mxu1 %v1237_v1 }
 0x678   :  { %1631 = vmatprep.mubr.msk.f32.mxu0 %vm2046_vm0, %v4627_v2  ;;  %1643 = vmatprep.mubr.msk.f32.mxu1 %vm2046_vm0, %v4627_v2 }
 0x67b   :  { %1632 = vmatmul.mubr.f32.gmra.mxu0 %v730_v59 }
 0x67c   :  { %1634 = vmatprep.mubr.msk.f32.mxu0 %vm2046_vm0, %v4627_v2 }
 0x67f   :  { %1635 = vmatmul.mubr.f32.gmra.mxu0 %v899_v62 }
 0x712   :  { %v1306_v63 = vpop.f32.mrf.mxu0  ;;  %v1377_v3 = vpop.f32.mrf.mxu1 }
 0x713   :  { %v1307_v57 = vadd.f32 %v1306_v63, %v4628_v58  ;;  %v1378_v2 = vadd.f32 %v1377_v3, %v2623_v61 }
 0x714   :  { %v1308_v9 = vpop.f32.mrf.mxu0  ;;  %v1379_v7 = vpop.f32.mrf.mxu1 }
 0x715   :  { %v1567_v55 = vmul.f32 -1.442695, %v1307_v57  ;;  %v1309_v46 = vadd.f32 %v1308_v9, %v4629_v10  ;;  %v1380_v8 = vadd.f32 %v1379_v7, %v2621_v44 }
 0x717   :  { %1785 = vpow2.f32 %v1567_v55  ;;  %v1568_v50 = vmul.f32 -1.442695, %v1309_v46  ;;  %v1569_v11 = vmul.f32 -1.442695, %v1380_v8 }
 0x719   :  { %1787 = vpow2.f32 %v1568_v50 }
 0x71a   :  { %1789 = vtanh.f32 %v1378_v2 }
 0x71b   :  { %1791 = vpow2.f32 %v1569_v11 }
 0x724   :  { %v1786_v12 = vpop.eup %1785 }
 0x725   :  { %v1385_v13 = vadd.f32 1.0, %v1786_v12 }
 0x726   :  { %v1788_v14 = vpop.eup %1787 }
 0x727   :  { %1793 = vrcp.f32 %v1385_v13  ;;  %v1391_v58 = vadd.f32 1.0, %v1788_v14  ;;  %v1790_v15 = vpop.eup %1789 }
 0x728   :  { %v1792_v10 = vpop.eup %1791 }
 0x729   :  { %1795 = vrcp.f32 %v1391_v58  ;;  %v1398_v61 = vadd.f32 1.0, %v1792_v10 }
 0x72b   :  { %1797 = vrcp.f32 %v1398_v61 }
 0x733   :  { %v1489_v16 = vpop.f32.mrf.mxu0  ;;  %v1509_v17 = vpop.f32.mrf.mxu1 }
 0x734   :  { %v1794_v24 = vpop.eup %1793  ;;  %1523 = vst [vmem:[#allocation10] sm:$0xff] %v1489_v16  ;;  %1527 = vst [vmem:[#allocation10 + $0x20] sm:$0xff] %v1509_v17 }
 0x735   :  { %v1627_v52 = vpop.f32.mrf.mxu0  ;;  %v1639_v44 = vpop.f32.mrf.mxu1  ;;  %v1402_v35 = vmul.f32 %v1794_v24, %v1790_v15 }
 0x736   :  { %v1796_v29 = vpop.eup %1795 }
 0x737   :  { %v1401_v31 = vmul.f32 %v1796_v29, %v3583_v51  ;;  %v1494_v30 = vpop.f32.mrf.mxu0  ;;  %v1514_v54 = vpop.f32.mrf.mxu1 }
 0x738   :  { %1524 = vst [vmem:[#allocation10 + $0x8] sm:$0xff] %v1494_v30  ;;  %1528 = vst [vmem:[#allocation10 + $0x28] sm:$0xff] %v1514_v54  ;;  %v1798_v22 = vpop.eup %1797 }
 0x739   :  { %v1403_v56 = vadd.f32 %v1402_v35, %v1401_v31  ;;  %v1630_v48 = vpop.f32.mrf.mxu0  ;;  %v1642_v27 = vpop.f32.mrf.mxu1 }
 0x73b   :  { %1799 = vtanh.f32 %v1403_v56  ;;  %v1499_v4 = vpop.f32.mrf.mxu0 }
 0x73c   :  { %1525 = vst [vmem:[#allocation10 + $0x10] sm:$0xff] %v1499_v4 }
 0x73d   :  { %v1633_v28 = vpop.f32.mrf.mxu0 }
 0x73f   :  { %v1504_v5 = vpop.f32.mrf.mxu0 }
 0x740   :  { %1526 = vst [vmem:[#allocation10 + $0x18] sm:$0xff] %v1504_v5 }
 0x741   :  { %v1636_v21 = vpop.f32.mrf.mxu0 }
 0x748   :  { %v1800_v23 = vpop.eup %1799 }
 0x749   :  { %v1405_v42 = vmul.f32 %v1800_v23, %v1798_v22 }
 0x74b   :  { %v1406_v51 = vadd.f32 %v1405_v42, %v3618_v38 }
 0x74d   :  { %1644 = vmatmul.mubr.f32.gmra.mxu1 %v1406_v51 }
 0x80d   :  { %v1519_v18 = vpop.f32.mrf.mxu1 }
 0x80e   :  { %1529 = vst [vmem:[#allocation10 + $0x30] sm:$0xff] %v1519_v18 }
 0x80f   :  { %v1645_v26 = vpop.f32.mrf.mxu1 }
 0x810   :  { %2020 = shalt.err (!%p2017_p10)
}
 0x811   :  { %1541 = dma.vmem_to_hbm [thread:$0]  %s1536_s15, 896, %s3658_s5, [#allocation4], %s2039_s26, %s2039_s26, %s2040_s27  }
 0x812   :  { %2035 = dma.done.wait [#allocation4], 896  }
 0x813   :  { %2036 = vsyncadd [#allocation4], 4294966400 }
 0x814   :  { %1545 = vsyncpa [#allocation3], 1 }
 0x815   :  { %1546 = vsyncpa [#allocation6], 1 }
 0x816   :  { %1547 = vsyncpa [#allocation9], 1 }
 0x817   :  { %1548 = vsyncpa [#allocation4], 1 }

</bundles_post_ra>
